<compile_context>
chip_gen: v5e
topology: v5e:2x2
jax: 0.10.0
libtpu: 0.0.40
codegen_flags: <defaults>
</compile_context>

<pallas_src>
import jax
import jax.numpy as jnp
from jax import lax
from jax.experimental import pallas as pl
from jax.experimental.pallas import tpu as pltpu

NUM_FEATURES = 128   # backbone.num_features (RFNet resnet18 encoder -> 128)
NUM_CLASSES = 8
COUT_PAD = 128       # matmul N (lane-dense): head1 -> cols 0:8, head2 -> 8:16, rest 0
COUT_STORE = 32      # lanes that actually hit HBM (bf16): 16 useful + 16 zero sentinel
BN_EPS = 1e-5


# ----------------------------------------------------------------------------
# Pallas kernel: fused (BN -> ReLU -> Conv3x3, pad=1, no bias) for BOTH heads.
# ----------------------------------------------------------------------------
def _rfnet_heads_kernel(x_ref, xt_ref, xb_ref, sb_ref, w_ref, o_ref,
                        y_scr, acc_scr):
    # x_ref  : (1, HS, W, CIN)     bf16  one H-strip of backbone features (NHWC)
    # xt_ref : (1, 1,  W, CIN)     bf16  feature row just above the strip (clamped)
    # xb_ref : (1, 1,  W, CIN)     bf16  feature row just below the strip (clamped)
    # sb_ref : (4, CIN)            f32   [scale1, shift1, scale2, shift2] fused eval-BN
    # w_ref  : (3, 6*CIN, NP)      bf16  per-kh packed conv weights (kw-stacked K)
    # o_ref  : (1, HS, W, CS)      bf16  narrow lane-dense output
    # y_scr  : (HS+2, W, 6*CIN)    bf16  halo'd staging scratch (3 kw taps on lanes)
    # acc_scr: (HS*W, NP)          f32   accumulator
    _, HS, W, CIN = x_ref.shape
    C6 = 6 * CIN
    NP = acc_scr.shape[-1]
    CS = o_ref.shape[-1]
    M = HS * W
    strip = pl.program_id(1)
    n_strips = pl.num_programs(1)

    s1 = sb_ref[0:1, :].reshape(1, 1, CIN)
    b1 = sb_ref[1:2, :].reshape(1, 1, CIN)
    s2 = sb_ref[2:3, :].reshape(1, 1, CIN)
    b2 = sb_ref[3:4, :].reshape(1, 1, CIN)

    def bn_relu_pack(v, on=None):
        # (R, W, CIN) bf16 -> (R, W, 2*CIN) bf16.  f32 VPU math; `on` zero-masks
        # post-BN activations at image borders (== the conv's zero padding).
        vf = v.astype(jnp.float32)
        y1 = jnp.maximum(vf * s1 + b1, 0.0)
        y2 = jnp.maximum(vf * s2 + b2, 0.0)
        if on is not None:
            y1 = y1 * on
            y2 = y2 * on
        return jnp.concatenate([y1, y2], axis=-1).astype(jnp.bfloat16)

    def pack_taps(p):
        # p: (R, W, 2*CIN).  Lay the three kw taps side by side on the lane axis:
        #   lanes [0:2C)   column w holds p[w-1] (kw=0, zero at w=0)
        #   lanes [2C:4C)  column w holds p[w]   (kw=1)
        #   lanes [4C:6C)  column w holds p[w+1] (kw=2, zero at w=W-1)
        z = jnp.zeros_like(p[:, :1, :])
        left = jnp.concatenate([z, p[:, :W - 1, :]], axis=1)
        right = jnp.concatenate([p[:, 1:, :], z], axis=1)
        return jnp.concatenate([left, p, right], axis=-1)          # (R, W, 6*CIN)

    top_on = (strip > 0).astype(jnp.float32)
    bot_on = (strip < n_strips - 1).astype(jnp.float32)

    # One staging pass per strip: BN+ReLU (both heads) + kw lane packing into a
    # halo'd scratch; every conv tap below is a tile-aligned row-offset view.
    y_scr[1:HS + 1, :, :] = pack_taps(bn_relu_pack(x_ref[0]))
    y_scr[0:1, :, :] = pack_taps(bn_relu_pack(xt_ref[0], top_on))
    y_scr[HS + 1:HS + 2, :, :] = pack_taps(bn_relu_pack(xb_ref[0], bot_on))

    # 3 matmuls (one per kh), K = 3 taps * 2 heads * CIN = 768: the MXU
    # accumulates over K internally; only 3 f32 accumulator round-trips.
    for kh in range(3):
        v = y_scr[kh:kh + HS, :, :].reshape(M, C6)
        contrib = jnp.dot(v, w_ref[kh], preferred_element_type=jnp.float32)
        if kh == 0:
            acc_scr[...] = contrib
        else:
            acc_scr[...] += contrib

    # Narrow bf16 writeback: only CS of the NP matmul lanes hit HBM.
    o_ref[0] = acc_scr[:, :CS].reshape(HS, W, CS).astype(jnp.bfloat16)


def _pick_block_h(Hf, Wf, cin, batch, *, cap=64, vmem_budget=20 * 1024 * 1024):
    """Largest divisor of Hf under `cap` and a VMEM byte budget; keeps >=2 grid steps."""
    divisors = [d for d in range(1, Hf + 1) if Hf % d == 0]

    def footprint(hs):
        c6, npad = 6 * cin, COUT_PAD
        x_io = 2 * (hs * Wf * cin * 2) + 4 * (Wf * cin * 2)   # bf16 strip + halos, dbl-buffered
        out_io = 2 * (hs * Wf * COUT_STORE * 2)               # bf16 out, dbl-buffered
        w_res = 2 * (3 * c6 * npad * 2)                       # resident packed weights
        y_scr = (hs + 2) * Wf * c6 * 2                        # halo'd bf16 staging scratch
        acc = hs * Wf * npad * 4                              # f32 accumulator scratch
        return x_io + out_io + w_res + y_scr + acc

    ok = [d for d in divisors if d <= cap and footprint(d) <= vmem_budget]
    hs = max(ok) if ok else min(divisors)
    if batch * (Hf // hs) < 2:   # v7x: give both TensorCores at least one strip
        smaller = [d for d in (ok or divisors) if Hf // d >= 2]
        if smaller:
            hs = max(smaller)
    return hs


def rfnet_heads(x_nhwc, sb, w_packed, *, block_h=None):
    """Both _BNReluConv heads in one Pallas call -> (B, Hf, Wf, COUT_STORE) bf16."""
    B, Hf, Wf, Cin = x_nhwc.shape
    kh3, c6, npad = w_packed.shape
    assert kh3 == 3 and c6 == 6 * Cin and npad == COUT_PAD
    hs = block_h if (block_h and Hf % block_h == 0) else _pick_block_h(Hf, Wf, Cin, B)
    nh = Hf // hs
    x_bf16 = x_nhwc.astype(jnp.bfloat16)   # halves the dominant HBM stream + x buffers

    spec_x = pl.BlockSpec((1, hs, Wf, Cin), lambda b, i: (b, i, 0, 0))
    # 1-row halos above/below the strip, clamped at the image border (the kernel
    # zero-masks them there, realizing the conv's zero padding).  NOTE: the halo
    # block height along H is 1, so the returned block index IS the element row.
    spec_top = pl.BlockSpec((1, 1, Wf, Cin),
                            lambda b, i: (b, jnp.maximum(i * hs - 1, 0), 0, 0))
    spec_bot = pl.BlockSpec((1, 1, Wf, Cin),
                            lambda b, i: (b, jnp.minimum((i + 1) * hs, Hf - 1), 0, 0))
    spec_sb = pl.BlockSpec((4, Cin), lambda b, i: (0, 0))
    spec_w = pl.BlockSpec((3, c6, npad), lambda b, i: (0, 0, 0))
    spec_o = pl.BlockSpec((1, hs, Wf, COUT_STORE), lambda b, i: (b, i, 0, 0))

    return pl.pallas_call(
        _rfnet_heads_kernel,
        out_shape=jax.ShapeDtypeStruct((B, Hf, Wf, COUT_STORE), jnp.bfloat16),
        grid_spec=pltpu.PrefetchScalarGridSpec(
            num_scalar_prefetch=0,
            grid=(B, nh),
            in_specs=[spec_x, spec_top, spec_bot, spec_sb, spec_w],
            out_specs=spec_o,
            scratch_shapes=[pltpu.VMEM((hs + 2, Wf, 6 * Cin), jnp.bfloat16),
                            pltpu.VMEM((hs * Wf, COUT_PAD), jnp.float32)]),
        compiler_params=pltpu.CompilerParams(
            dimension_semantics=("parallel", "parallel"),
            vmem_limit_bytes=32 * 1024 * 1024),
    )(x_bf16, x_bf16, x_bf16, sb, w_packed)


# ----------------------------------------------------------------------------
# Glue (plain JAX): synthetic backbone stub, upsample, parameter packing
# ----------------------------------------------------------------------------
def _conv2d_nhwc(x, w_hwio, stride):
    return lax.conv_general_dilated(
        x, w_hwio, window_strides=(stride, stride), padding="SAME",
        dimension_numbers=("NHWC", "HWIO", "NHWC"))


def backbone_stub(params, rgb_nhwc, depth_nhwc=None):
    # TODO(synk): the real RFNet backbone (ResNet-18 RGB-D encoder + SPP) is an
    # injected dependency of the PyTorch module; replaced by a small deterministic
    # 2-conv NHWC encoder producing NUM_FEATURES channels at 1/4 resolution.
    h1 = jax.nn.relu(_conv2d_nhwc(rgb_nhwc, params["bb_w1"], 2))
    h2 = jax.nn.relu(_conv2d_nhwc(h1, params["bb_w2"], 2))
    additional = h1
    da_features = [h1, h2]
    return h2, additional, da_features


def rfnet_forward(params, rgb_inputs, depth_inputs=None):
    """NCHW in / NCHW out (PyTorch convention); NHWC internally."""
    rgb_nhwc = jnp.transpose(rgb_inputs, (0, 2, 3, 1))
    x, _additional, da_features = backbone_stub(params, rgb_nhwc, depth_inputs)

    heads = rfnet_heads(x, params["sb"], params["w_packed"])    # (B, Hf, Wf, 32) bf16
    logits_nhwc = heads[..., :NUM_CLASSES].astype(jnp.float32)            # self.logits
    logits_aux_nhwc = heads[..., NUM_CLASSES:2 * NUM_CLASSES].astype(jnp.float32)

    Hi, Wi = rgb_inputs.shape[2], rgb_inputs.shape[3]

    def up(t):  # bilinear (align_corners=False) in NHWC, single transpose to NCHW
        t = jax.image.resize(t, (t.shape[0], Hi, Wi, t.shape[3]), method="bilinear")
        return jnp.transpose(t, (0, 3, 1, 2))

    da_nchw = [jnp.transpose(f, (0, 3, 1, 2)) for f in da_features]
    return up(logits_nhwc), up(logits_aux_nhwc), da_nchw


def _fuse_bn(gamma, beta, mean, var):
    scale = gamma / jnp.sqrt(var + BN_EPS)
    shift = beta - mean * scale
    return scale, shift                                   # (C,)


def _pack_head_weights(w1_hwio, w2_hwio, cout_pad=COUT_PAD):
    """(3,3,Cin,Cout) x2 -> (3, 3*2*Cin, cout_pad) bf16.

    For each kh, the K axis stacks the three kw taps (matching the kernel's
    lane-packed staging buffer); each tap is the block-diagonal two-head weight
    (y1 channels -> cols [0:Cout], y2 channels -> cols [Cout:2*Cout], rest zero).
    """
    kh, kw, cin, cout = w1_hwio.shape
    assert (kh, kw) == (3, 3)
    z = jnp.zeros((kh, kw, cin, cout), w1_hwio.dtype)
    top = jnp.concatenate([w1_hwio, z], axis=-1)        # y1 rows -> cols [0:Cout]
    bot = jnp.concatenate([z, w2_hwio], axis=-1)        # y2 rows -> cols [Cout:2Cout]
    blk = jnp.concatenate([top, bot], axis=2)           # (3, 3, 2*Cin, 2*Cout)
    pad = jnp.zeros((kh, kw, 2 * cin, cout_pad - 2 * cout), blk.dtype)
    blk = jnp.concatenate([blk, pad], axis=-1)          # (3, 3, 2*Cin, cout_pad)
    return blk.reshape(kh, kw * 2 * cin, cout_pad).astype(jnp.bfloat16)


def init_params(key):
    ks = jax.random.split(key, 12)
    p = {}
    # synthetic backbone (HWIO weights, NHWC convs)
    p["bb_w1"] = 0.1 * jax.random.normal(ks[0], (3, 3, 3, 32), jnp.float32)
    p["bb_w2"] = 0.05 * jax.random.normal(ks[1], (3, 3, 32, NUM_FEATURES), jnp.float32)
    # head 1 (self.logits): eval-mode BN params + conv weight (bias=False)
    g1 = 1.0 + 0.1 * jax.random.normal(ks[2], (NUM_FEATURES,), jnp.float32)
    be1 = 0.1 * jax.random.normal(ks[3], (NUM_FEATURES,), jnp.float32)
    m1 = 0.1 * jax.random.normal(ks[4], (NUM_FEATURES,), jnp.float32)
    v1 = 1.0 + 0.1 * jax.random.uniform(ks[5], (NUM_FEATURES,), jnp.float32)
    p["s1"], p["b1"] = _fuse_bn(g1, be1, m1, v1)
    w1_oihw = 0.05 * jax.random.normal(ks[6], (NUM_CLASSES, NUM_FEATURES, 3, 3),
                                       jnp.float32)
    p["w1_hwio"] = jnp.transpose(w1_oihw, (2, 3, 1, 0))
    # head 2 (self.logits_aux)
    g2 = 1.0 + 0.1 * jax.random.normal(ks[7], (NUM_FEATURES,), jnp.float32)
    be2 = 0.1 * jax.random.normal(ks[8], (NUM_FEATURES,), jnp.float32)
    m2 = 0.1 * jax.random.normal(ks[9], (NUM_FEATURES,), jnp.float32)
    v2 = 1.0 + 0.1 * jax.random.uniform(ks[10], (NUM_FEATURES,), jnp.float32)
    p["s2"], p["b2"] = _fuse_bn(g2, be2, m2, v2)
    w2_oihw = 0.05 * jax.random.normal(ks[11], (NUM_CLASSES, NUM_FEATURES, 3, 3),
                                       jnp.float32)
    p["w2_hwio"] = jnp.transpose(w2_oihw, (2, 3, 1, 0))
    # packed kernel-side parameters
    p["sb"] = jnp.stack([p["s1"], p["b1"], p["s2"], p["b2"]], axis=0)   # (4, Cin)
    p["w_packed"] = _pack_head_weights(p["w1_hwio"], p["w2_hwio"])
    return p


def _head_ref_nhwc(x_nhwc, s, b, w_hwio):
    """Plain-JAX reference: eval-BN -> ReLU -> conv3x3 (pad=1, no bias), NHWC.

    Matches the kernel's rounding: bf16 features in, bf16 MXU operands/weights,
    f32 accumulation (output left in f32; the kernel additionally rounds to bf16).
    """
    x = x_nhwc.astype(jnp.bfloat16).astype(jnp.float32)
    y = jnp.maximum(x * s[None, None, None, :] + b[None, None, None, :], 0.0)
    y = y.astype(jnp.bfloat16).astype(jnp.float32)
    w = w_hwio.astype(jnp.bfloat16).astype(jnp.float32)
    return lax.conv_general_dilated(
        y, w, window_strides=(1, 1), padding="SAME",
        dimension_numbers=("NHWC", "HWIO", "NHWC"),
        precision=lax.Precision.HIGHEST)


if __name__ == "__main__":
    key = jax.random.PRNGKey(0)
    kp, kx = jax.random.split(key)
    params = init_params(kp)

    # Small NCHW input (PyTorch convention); backbone stub -> 16x16x128 features,
    # so the kernel grid is (batch=2, H-strips=1) full-height strips.
    rgb = jax.random.normal(kx, (2, 3, 64, 64), jnp.float32)

    fwd = jax.jit(rfnet_forward)
    logits_up, logits_aux_up, da_features = jax.block_until_ready(fwd(params, rgb))
    assert logits_up.shape == (2, NUM_CLASSES, 64, 64)
    assert logits_aux_up.shape == (2, NUM_CLASSES, 64, 64)

    # Correctness: Pallas fused heads vs a lax.conv reference (bf16-matched operands).
    x_feat, _, _ = backbone_stub(params, jnp.transpose(rgb, (0, 2, 3, 1)))
    heads = jax.block_until_ready(
        rfnet_heads(x_feat, params["sb"], params["w_packed"]))
    l1 = heads[..., :NUM_CLASSES].astype(jnp.float32)
    l2 = heads[..., NUM_CLASSES:2 * NUM_CLASSES].astype(jnp.float32)
    r1 = _head_ref_nhwc(x_feat, params["s1"], params["b1"], params["w1_hwio"])
    r2 = _head_ref_nhwc(x_feat, params["s2"], params["b2"], params["w2_hwio"])
    assert jnp.allclose(l1, r1, atol=2e-2, rtol=2e-2), float(jnp.max(jnp.abs(l1 - r1)))
    assert jnp.allclose(l2, r2, atol=2e-2, rtol=2e-2), float(jnp.max(jnp.abs(l2 - r2)))
    # lanes stored only for alignment (16:32) must stay exactly zero
    assert jnp.all(heads[..., 2 * NUM_CLASSES:] == 0.0)

    print("KERNEL_OK")
</pallas_src>

<mosaic_0001>
module attributes {stable_mosaic.version = 11 : i64} {
  func.func @_rfnet_heads_kernel(%arg0: i32, %arg1: i32, %arg2: memref<1x16x16x128xbf16, #tpu.memory_space<vmem>>, %arg3: memref<1x1x16x128xbf16, #tpu.memory_space<vmem>>, %arg4: memref<1x1x16x128xbf16, #tpu.memory_space<vmem>>, %arg5: memref<4x128xf32, #tpu.memory_space<vmem>>, %arg6: memref<3x768x128xbf16, #tpu.memory_space<vmem>>, %arg7: memref<1x16x16x32xbf16, #tpu.memory_space<vmem>>, %arg8: memref<18x16x768xbf16, #tpu.memory_space<vmem>>, %arg9: memref<256x128xf32, #tpu.memory_space<vmem>>) attributes {dimension_semantics = [#tpu.dimension_semantics<parallel>, #tpu.dimension_semantics<parallel>], iteration_bounds = array<i64: 2, 1>, scalar_prefetch = 0 : i64, scratch_operands = 2 : i64, tpu.core_type = #tpu.core_type<tc>, window_params = [{transform_indices = @transform_0, window_bounds = array<i64: 1, 16, 16, 128>}, {transform_indices = @transform_1, window_bounds = array<i64: 1, 1, 16, 128>}, {transform_indices = @transform_2, window_bounds = array<i64: 1, 1, 16, 128>}, {pipeline_mode = #tpu.pipeline_mode<synchronous>, transform_indices = @transform_3, window_bounds = array<i64: 4, 128>}, {pipeline_mode = #tpu.pipeline_mode<synchronous>, transform_indices = @transform_4, window_bounds = array<i64: 3, 768, 128>}, {transform_indices = @transform_5, window_bounds = array<i64: 1, 16, 16, 32>}]} {
    %c0 = arith.constant 0 : index
    %c0_0 = arith.constant 0 : index
    %0 = vector.load %arg5[%c0, %c0_0] : memref<4x128xf32, #tpu.memory_space<vmem>>, vector<1x128xf32>
    %1 = vector.shape_cast %0 : vector<1x128xf32> to vector<1x1x128xf32>
    %c1 = arith.constant 1 : index
    %c0_1 = arith.constant 0 : index
    %2 = vector.load %arg5[%c1, %c0_1] : memref<4x128xf32, #tpu.memory_space<vmem>>, vector<1x128xf32>
    %3 = vector.shape_cast %2 : vector<1x128xf32> to vector<1x1x128xf32>
    %c2 = arith.constant 2 : index
    %c0_2 = arith.constant 0 : index
    %4 = vector.load %arg5[%c2, %c0_2] : memref<4x128xf32, #tpu.memory_space<vmem>>, vector<1x128xf32>
    %5 = vector.shape_cast %4 : vector<1x128xf32> to vector<1x1x128xf32>
    %c3 = arith.constant 3 : index
    %c0_3 = arith.constant 0 : index
    %6 = vector.load %arg5[%c3, %c0_3] : memref<4x128xf32, #tpu.memory_space<vmem>>, vector<1x128xf32>
    %7 = vector.shape_cast %6 : vector<1x128xf32> to vector<1x1x128xf32>
    %c0_i32 = arith.constant 0 : i32
    %8 = arith.cmpi sgt, %arg1, %c0_i32 : i32
    %9 = arith.extui %8 : i1 to i32
    %10 = arith.sitofp %9 : i32 to f32
    %c0_i32_4 = arith.constant 0 : i32
    %11 = arith.cmpi slt, %arg1, %c0_i32_4 : i32
    %12 = arith.extui %11 : i1 to i32
    %13 = arith.sitofp %12 : i32 to f32
    %c0_5 = arith.constant 0 : index
    %c0_6 = arith.constant 0 : index
    %c0_7 = arith.constant 0 : index
    %c0_8 = arith.constant 0 : index
    %14 = vector.load %arg2[%c0_5, %c0_6, %c0_7, %c0_8] : memref<1x16x16x128xbf16, #tpu.memory_space<vmem>>, vector<1x16x16x128xbf16>
    %15 = vector.shape_cast %14 : vector<1x16x16x128xbf16> to vector<16x16x128xbf16>
    %16 = arith.extf %15 : vector<16x16x128xbf16> to vector<16x16x128xf32>
    %17 = vector.broadcast %1 : vector<1x1x128xf32> to vector<16x16x128xf32>
    %18 = arith.mulf %16, %17 : vector<16x16x128xf32>
    %19 = vector.broadcast %3 : vector<1x1x128xf32> to vector<16x16x128xf32>
    %20 = arith.addf %18, %19 : vector<16x16x128xf32>
    %cst = arith.constant 0.000000e+00 : f32
    %21 = vector.broadcast %cst : f32 to vector<16x16x128xf32>
    %22 = arith.maximumf %20, %21 : vector<16x16x128xf32>
    %23 = vector.broadcast %5 : vector<1x1x128xf32> to vector<16x16x128xf32>
    %24 = arith.mulf %16, %23 : vector<16x16x128xf32>
    %25 = vector.broadcast %7 : vector<1x1x128xf32> to vector<16x16x128xf32>
    %26 = arith.addf %24, %25 : vector<16x16x128xf32>
    %cst_9 = arith.constant 0.000000e+00 : f32
    %27 = vector.broadcast %cst_9 : f32 to vector<16x16x128xf32>
    %28 = arith.maximumf %26, %27 : vector<16x16x128xf32>
    %29 = tpu.concatenate %22, %28 in 2 : vector<16x16x128xf32>, vector<16x16x128xf32> -> vector<16x16x256xf32>
    %30 = arith.truncf %29 : vector<16x16x256xf32> to vector<16x16x256xbf16>
    %cst_10 = arith.constant 0.000000e+00 : bf16
    %31 = vector.broadcast %cst_10 : bf16 to vector<16x1x256xbf16>
    %32 = vector.extract_strided_slice %30 {offsets = [0, 0, 0], sizes = [16, 15, 256], strides = [1, 1, 1]} : vector<16x16x256xbf16> to vector<16x15x256xbf16>
    %33 = tpu.concatenate %31, %32 in 1 : vector<16x1x256xbf16>, vector<16x15x256xbf16> -> vector<16x16x256xbf16>
    %34 = vector.extract_strided_slice %30 {offsets = [0, 1, 0], sizes = [16, 15, 256], strides = [1, 1, 1]} : vector<16x16x256xbf16> to vector<16x15x256xbf16>
    %35 = tpu.concatenate %34, %31 in 1 : vector<16x15x256xbf16>, vector<16x1x256xbf16> -> vector<16x16x256xbf16>
    %36 = tpu.concatenate %33, %30, %35 in 2 : vector<16x16x256xbf16>, vector<16x16x256xbf16>, vector<16x16x256xbf16> -> vector<16x16x768xbf16>
    %c1_11 = arith.constant 1 : index
    %c0_12 = arith.constant 0 : index
    %c0_13 = arith.constant 0 : index
    %37 = vector.load %arg8[%c1_11, %c0_12, %c0_13] : memref<18x16x768xbf16, #tpu.memory_space<vmem>>, vector<16x16x768xbf16>
    tpu.vector_store %arg8[%c1_11, %c0_12, %c0_13], %36 {strides = array<i32>} : memref<18x16x768xbf16, #tpu.memory_space<vmem>>, vector<16x16x768xbf16>,
    %c0_14 = arith.constant 0 : index
    %c0_15 = arith.constant 0 : index
    %c0_16 = arith.constant 0 : index
    %c0_17 = arith.constant 0 : index
    %38 = vector.load %arg3[%c0_14, %c0_15, %c0_16, %c0_17] : memref<1x1x16x128xbf16, #tpu.memory_space<vmem>>, vector<1x1x16x128xbf16>
    %39 = vector.shape_cast %38 : vector<1x1x16x128xbf16> to vector<1x16x128xbf16>
    %40 = arith.extf %39 : vector<1x16x128xbf16> to vector<1x16x128xf32>
    %41 = vector.broadcast %1 : vector<1x1x128xf32> to vector<1x16x128xf32>
    %42 = arith.mulf %40, %41 : vector<1x16x128xf32>
    %43 = vector.broadcast %3 : vector<1x1x128xf32> to vector<1x16x128xf32>
    %44 = arith.addf %42, %43 : vector<1x16x128xf32>
    %cst_18 = arith.constant 0.000000e+00 : f32
    %45 = vector.broadcast %cst_18 : f32 to vector<1x16x128xf32>
    %46 = arith.maximumf %44, %45 : vector<1x16x128xf32>
    %47 = vector.broadcast %5 : vector<1x1x128xf32> to vector<1x16x128xf32>
    %48 = arith.mulf %40, %47 : vector<1x16x128xf32>
    %49 = vector.broadcast %7 : vector<1x1x128xf32> to vector<1x16x128xf32>
    %50 = arith.addf %48, %49 : vector<1x16x128xf32>
    %cst_19 = arith.constant 0.000000e+00 : f32
    %51 = vector.broadcast %cst_19 : f32 to vector<1x16x128xf32>
    %52 = arith.maximumf %50, %51 : vector<1x16x128xf32>
    %53 = vector.broadcast %10 : f32 to vector<1x16x128xf32>
    %54 = arith.mulf %46, %53 : vector<1x16x128xf32>
    %55 = vector.broadcast %10 : f32 to vector<1x16x128xf32>
    %56 = arith.mulf %52, %55 : vector<1x16x128xf32>
    %57 = tpu.concatenate %54, %56 in 2 : vector<1x16x128xf32>, vector<1x16x128xf32> -> vector<1x16x256xf32>
    %58 = arith.truncf %57 : vector<1x16x256xf32> to vector<1x16x256xbf16>
    %cst_20 = arith.constant 0.000000e+00 : bf16
    %59 = vector.broadcast %cst_20 : bf16 to vector<1x1x256xbf16>
    %60 = vector.extract_strided_slice %58 {offsets = [0, 0, 0], sizes = [1, 15, 256], strides = [1, 1, 1]} : vector<1x16x256xbf16> to vector<1x15x256xbf16>
    %61 = tpu.concatenate %59, %60 in 1 : vector<1x1x256xbf16>, vector<1x15x256xbf16> -> vector<1x16x256xbf16>
    %62 = vector.extract_strided_slice %58 {offsets = [0, 1, 0], sizes = [1, 15, 256], strides = [1, 1, 1]} : vector<1x16x256xbf16> to vector<1x15x256xbf16>
    %63 = tpu.concatenate %62, %59 in 1 : vector<1x15x256xbf16>, vector<1x1x256xbf16> -> vector<1x16x256xbf16>
    %64 = tpu.concatenate %61, %58, %63 in 2 : vector<1x16x256xbf16>, vector<1x16x256xbf16>, vector<1x16x256xbf16> -> vector<1x16x768xbf16>
    %c0_21 = arith.constant 0 : index
    %c0_22 = arith.constant 0 : index
    %c0_23 = arith.constant 0 : index
    %65 = vector.load %arg8[%c0_21, %c0_22, %c0_23] : memref<18x16x768xbf16, #tpu.memory_space<vmem>>, vector<1x16x768xbf16>
    tpu.vector_store %arg8[%c0_21, %c0_22, %c0_23], %64 {strides = array<i32>} : memref<18x16x768xbf16, #tpu.memory_space<vmem>>, vector<1x16x768xbf16>,
    %c0_24 = arith.constant 0 : index
    %c0_25 = arith.constant 0 : index
    %c0_26 = arith.constant 0 : index
    %c0_27 = arith.constant 0 : index
    %66 = vector.load %arg4[%c0_24, %c0_25, %c0_26, %c0_27] : memref<1x1x16x128xbf16, #tpu.memory_space<vmem>>, vector<1x1x16x128xbf16>
    %67 = vector.shape_cast %66 : vector<1x1x16x128xbf16> to vector<1x16x128xbf16>
    %68 = arith.extf %67 : vector<1x16x128xbf16> to vector<1x16x128xf32>
    %69 = vector.broadcast %1 : vector<1x1x128xf32> to vector<1x16x128xf32>
    %70 = arith.mulf %68, %69 : vector<1x16x128xf32>
    %71 = vector.broadcast %3 : vector<1x1x128xf32> to vector<1x16x128xf32>
    %72 = arith.addf %70, %71 : vector<1x16x128xf32>
    %cst_28 = arith.constant 0.000000e+00 : f32
    %73 = vector.broadcast %cst_28 : f32 to vector<1x16x128xf32>
    %74 = arith.maximumf %72, %73 : vector<1x16x128xf32>
    %75 = vector.broadcast %5 : vector<1x1x128xf32> to vector<1x16x128xf32>
    %76 = arith.mulf %68, %75 : vector<1x16x128xf32>
    %77 = vector.broadcast %7 : vector<1x1x128xf32> to vector<1x16x128xf32>
    %78 = arith.addf %76, %77 : vector<1x16x128xf32>
    %cst_29 = arith.constant 0.000000e+00 : f32
    %79 = vector.broadcast %cst_29 : f32 to vector<1x16x128xf32>
    %80 = arith.maximumf %78, %79 : vector<1x16x128xf32>
    %81 = vector.broadcast %13 : f32 to vector<1x16x128xf32>
    %82 = arith.mulf %74, %81 : vector<1x16x128xf32>
    %83 = vector.broadcast %13 : f32 to vector<1x16x128xf32>
    %84 = arith.mulf %80, %83 : vector<1x16x128xf32>
    %85 = tpu.concatenate %82, %84 in 2 : vector<1x16x128xf32>, vector<1x16x128xf32> -> vector<1x16x256xf32>
    %86 = arith.truncf %85 : vector<1x16x256xf32> to vector<1x16x256xbf16>
    %cst_30 = arith.constant 0.000000e+00 : bf16
    %87 = vector.broadcast %cst_30 : bf16 to vector<1x1x256xbf16>
    %88 = vector.extract_strided_slice %86 {offsets = [0, 0, 0], sizes = [1, 15, 256], strides = [1, 1, 1]} : vector<1x16x256xbf16> to vector<1x15x256xbf16>
    %89 = tpu.concatenate %87, %88 in 1 : vector<1x1x256xbf16>, vector<1x15x256xbf16> -> vector<1x16x256xbf16>
    %90 = vector.extract_strided_slice %86 {offsets = [0, 1, 0], sizes = [1, 15, 256], strides = [1, 1, 1]} : vector<1x16x256xbf16> to vector<1x15x256xbf16>
    %91 = tpu.concatenate %90, %87 in 1 : vector<1x15x256xbf16>, vector<1x1x256xbf16> -> vector<1x16x256xbf16>
    %92 = tpu.concatenate %89, %86, %91 in 2 : vector<1x16x256xbf16>, vector<1x16x256xbf16>, vector<1x16x256xbf16> -> vector<1x16x768xbf16>
    %c17 = arith.constant 17 : index
    %c0_31 = arith.constant 0 : index
    %c0_32 = arith.constant 0 : index
    %93 = vector.load %arg8[%c17, %c0_31, %c0_32] : memref<18x16x768xbf16, #tpu.memory_space<vmem>>, vector<1x16x768xbf16>
    tpu.vector_store %arg8[%c17, %c0_31, %c0_32], %92 {strides = array<i32>} : memref<18x16x768xbf16, #tpu.memory_space<vmem>>, vector<1x16x768xbf16>,
    %c0_33 = arith.constant 0 : index
    %c0_34 = arith.constant 0 : index
    %c0_35 = arith.constant 0 : index
    %94 = vector.load %arg8[%c0_33, %c0_34, %c0_35] : memref<18x16x768xbf16, #tpu.memory_space<vmem>>, vector<16x16x768xbf16>
    %95 = vector.shape_cast %94 : vector<16x16x768xbf16> to vector<256x768xbf16>
    %c0_36 = arith.constant 0 : index
    %c0_37 = arith.constant 0 : index
    %c0_38 = arith.constant 0 : index
    %96 = vector.load %arg6[%c0_36, %c0_37, %c0_38] : memref<3x768x128xbf16, #tpu.memory_space<vmem>>, vector<1x768x128xbf16>
    %97 = vector.shape_cast %96 : vector<1x768x128xbf16> to vector<768x128xbf16>
    %cst_39 = arith.constant dense<0.000000e+00> : vector<256x128xf32>
    %98 = tpu.matmul %95, %97, %cst_39 {dimension_numbers = #tpu.dot_dimension_numbers<[1], [0], [0], [1], [0, 0, 1, 1], [], []>} : vector<256x768xbf16>, vector<768x128xbf16>, vector<256x128xf32> -> vector<256x128xf32>
    %c0_40 = arith.constant 0 : index
    %c0_41 = arith.constant 0 : index
    %99 = vector.load %arg9[%c0_40, %c0_41] : memref<256x128xf32, #tpu.memory_space<vmem>>, vector<256x128xf32>
    tpu.vector_store %arg9[%c0_40, %c0_41], %98 {strides = array<i32>} : memref<256x128xf32, #tpu.memory_space<vmem>>, vector<256x128xf32>,
    %c1_42 = arith.constant 1 : index
    %c0_43 = arith.constant 0 : index
    %c0_44 = arith.constant 0 : index
    %100 = vector.load %arg8[%c1_42, %c0_43, %c0_44] : memref<18x16x768xbf16, #tpu.memory_space<vmem>>, vector<16x16x768xbf16>
    %101 = vector.shape_cast %100 : vector<16x16x768xbf16> to vector<256x768xbf16>
    %c1_45 = arith.constant 1 : index
    %c0_46 = arith.constant 0 : index
    %c0_47 = arith.constant 0 : index
    %102 = vector.load %arg6[%c1_45, %c0_46, %c0_47] : memref<3x768x128xbf16, #tpu.memory_space<vmem>>, vector<1x768x128xbf16>
    %103 = vector.shape_cast %102 : vector<1x768x128xbf16> to vector<768x128xbf16>
    %cst_48 = arith.constant dense<0.000000e+00> : vector<256x128xf32>
    %104 = tpu.matmul %101, %103, %cst_48 {dimension_numbers = #tpu.dot_dimension_numbers<[1], [0], [0], [1], [0, 0, 1, 1], [], []>} : vector<256x768xbf16>, vector<768x128xbf16>, vector<256x128xf32> -> vector<256x128xf32>
    %c0_49 = arith.constant 0 : index
    %c0_50 = arith.constant 0 : index
    %105 = vector.load %arg9[%c0_49, %c0_50] : memref<256x128xf32, #tpu.memory_space<vmem>>, vector<256x128xf32>
    %106 = arith.addf %105, %104 : vector<256x128xf32>
    %c0_51 = arith.constant 0 : index
    %c0_52 = arith.constant 0 : index
    %107 = vector.load %arg9[%c0_51, %c0_52] : memref<256x128xf32, #tpu.memory_space<vmem>>, vector<256x128xf32>
    tpu.vector_store %arg9[%c0_51, %c0_52], %106 {strides = array<i32>} : memref<256x128xf32, #tpu.memory_space<vmem>>, vector<256x128xf32>,
    %c2_53 = arith.constant 2 : index
    %c0_54 = arith.constant 0 : index
    %c0_55 = arith.constant 0 : index
    %108 = vector.load %arg8[%c2_53, %c0_54, %c0_55] : memref<18x16x768xbf16, #tpu.memory_space<vmem>>, vector<16x16x768xbf16>
    %109 = vector.shape_cast %108 : vector<16x16x768xbf16> to vector<256x768xbf16>
    %c2_56 = arith.constant 2 : index
    %c0_57 = arith.constant 0 : index
    %c0_58 = arith.constant 0 : index
    %110 = vector.load %arg6[%c2_56, %c0_57, %c0_58] : memref<3x768x128xbf16, #tpu.memory_space<vmem>>, vector<1x768x128xbf16>
    %111 = vector.shape_cast %110 : vector<1x768x128xbf16> to vector<768x128xbf16>
    %cst_59 = arith.constant dense<0.000000e+00> : vector<256x128xf32>
    %112 = tpu.matmul %109, %111, %cst_59 {dimension_numbers = #tpu.dot_dimension_numbers<[1], [0], [0], [1], [0, 0, 1, 1], [], []>} : vector<256x768xbf16>, vector<768x128xbf16>, vector<256x128xf32> -> vector<256x128xf32>
    %c0_60 = arith.constant 0 : index
    %c0_61 = arith.constant 0 : index
    %113 = vector.load %arg9[%c0_60, %c0_61] : memref<256x128xf32, #tpu.memory_space<vmem>>, vector<256x128xf32>
    %114 = arith.addf %113, %112 : vector<256x128xf32>
    %c0_62 = arith.constant 0 : index
    %c0_63 = arith.constant 0 : index
    %115 = vector.load %arg9[%c0_62, %c0_63] : memref<256x128xf32, #tpu.memory_space<vmem>>, vector<256x128xf32>
    tpu.vector_store %arg9[%c0_62, %c0_63], %114 {strides = array<i32>} : memref<256x128xf32, #tpu.memory_space<vmem>>, vector<256x128xf32>,
    %c0_64 = arith.constant 0 : index
    %c0_65 = arith.constant 0 : index
    %116 = vector.load %arg9[%c0_64, %c0_65] : memref<256x128xf32, #tpu.memory_space<vmem>>, vector<256x32xf32>
    %117 = vector.shape_cast %116 : vector<256x32xf32> to vector<16x16x32xf32>
    %118 = arith.truncf %117 : vector<16x16x32xf32> to vector<16x16x32xbf16>
    %c0_66 = arith.constant 0 : index
    %c0_67 = arith.constant 0 : index
    %c0_68 = arith.constant 0 : index
    %c0_69 = arith.constant 0 : index
    %119 = vector.load %arg7[%c0_66, %c0_67, %c0_68, %c0_69] : memref<1x16x16x32xbf16, #tpu.memory_space<vmem>>, vector<1x16x16x32xbf16>
    %120 = vector.shape_cast %119 : vector<1x16x16x32xbf16> to vector<16x16x32xbf16>
    %121 = vector.shape_cast %118 : vector<16x16x32xbf16> to vector<1x16x16x32xbf16>
    tpu.vector_store %arg7[%c0_66, %c0_67, %c0_68, %c0_69], %121 {strides = array<i32>} : memref<1x16x16x32xbf16, #tpu.memory_space<vmem>>, vector<1x16x16x32xbf16>,
    return
  }
  func.func @transform_0(%arg0: i32, %arg1: i32) -> (i32, i32, i32, i32) {
    %c0_i32 = arith.constant 0 : i32
    %c0_i32_0 = arith.constant 0 : i32
    %c0_i32_1 = arith.constant 0 : i32
    return %arg0, %arg1, %c0_i32, %c0_i32_0 : i32, i32, i32, i32
  }
  func.func @transform_1(%arg0: i32, %arg1: i32) -> (i32, i32, i32, i32) {
    %c16_i32 = arith.constant 16 : i32
    %0 = arith.muli %arg1, %c16_i32 : i32
    %c1_i32 = arith.constant 1 : i32
    %1 = arith.subi %0, %c1_i32 : i32
    %c0_i32 = arith.constant 0 : i32
    %2 = arith.maxsi %1, %c0_i32 : i32
    %c0_i32_0 = arith.constant 0 : i32
    %c0_i32_1 = arith.constant 0 : i32
    %c0_i32_2 = arith.constant 0 : i32
    return %arg0, %2, %c0_i32_0, %c0_i32_1 : i32, i32, i32, i32
  }
  func.func @transform_2(%arg0: i32, %arg1: i32) -> (i32, i32, i32, i32) {
    %c1_i32 = arith.constant 1 : i32
    %0 = arith.addi %arg1, %c1_i32 : i32
    %c16_i32 = arith.constant 16 : i32
    %1 = arith.muli %0, %c16_i32 : i32
    %c15_i32 = arith.constant 15 : i32
    %2 = arith.minsi %1, %c15_i32 : i32
    %c0_i32 = arith.constant 0 : i32
    %c0_i32_0 = arith.constant 0 : i32
    %c0_i32_1 = arith.constant 0 : i32
    return %arg0, %2, %c0_i32, %c0_i32_0 : i32, i32, i32, i32
  }
  func.func @transform_3(%arg0: i32, %arg1: i32) -> (i32, i32) {
    %c0_i32 = arith.constant 0 : i32
    %c0_i32_0 = arith.constant 0 : i32
    %c0_i32_1 = arith.constant 0 : i32
    return %c0_i32, %c0_i32_0 : i32, i32
  }
  func.func @transform_4(%arg0: i32, %arg1: i32) -> (i32, i32, i32) {
    %c0_i32 = arith.constant 0 : i32
    %c0_i32_0 = arith.constant 0 : i32
    %c0_i32_1 = arith.constant 0 : i32
    %c0_i32_2 = arith.constant 0 : i32
    return %c0_i32, %c0_i32_0, %c0_i32_1 : i32, i32, i32
  }
  func.func @transform_5(%arg0: i32, %arg1: i32) -> (i32, i32, i32, i32) {
    %c0_i32 = arith.constant 0 : i32
    %c0_i32_0 = arith.constant 0 : i32
    %c0_i32_1 = arith.constant 0 : i32
    return %arg0, %arg1, %c0_i32, %c0_i32_0 : i32, i32, i32, i32
  }
}

</mosaic_0001>

<bundles_post_ra>
// kernel: rfnet_forward.1
= control target key start
LH: loop header
LB: loop body
LE: loop exit
PB: predicated region body
PF: predicated region fallthrough
CT: control target
= control target key end

     0   :  { %s9416_s18 = smov 0   ;;  %s9418_s19 = smov 0   ;;  %s11326_s0 = inlined_call_operand.vmem [shape: bf16[2,16,16,128], index: 0, kind: input, shape index: {}, may-alias: {0,1,2}]   ;;  %s11327_s1 = inlined_call_operand.vmem [shape: bf16[2,16,16,128], index: 1, kind: input, shape index: {}, may-alias: {0,1,2}]   ;;  %s11328_s2 = inlined_call_operand.vmem [shape: bf16[2,16,16,128], index: 2, kind: input, shape index: {}, may-alias: {0,1,2}]   ;;  %s11329_s3 = inlined_call_operand.vmem [shape: f32[4,128], index: 3, kind: input, shape index: {}]   ;;  %s11330_s4 = inlined_call_operand.vmem [shape: bf16[3,768,128], index: 4, kind: input, shape index: {}]   ;;  %s11331_s5 = inlined_call_operand.vmem [shape: bf16[2,16,16,32], index: 5, kind: output, shape index: {}]  }
   0x1   :  { %s9420_s20 = smov 0  }
   0x2 LB: > { %s27_s21 = sadd.s32 1, %s9380_s19  ;;  %p6850_p0 = scmp.ge.s32.totalorder %s9384_s20, 1  ;;  %s9384_s20 = sphi %s9420_s20, %s15_s20   ;;  %s9380_s19 = sphi %s9418_s19, %s11595_s19   ;;  %s9376_s18 = sphi %s9416_s18, %s11594_s18  }
   0x3   : > { %p29_p1 = scmp.ge.s32.totalorder %s27_s21, 2  ;;  %p273_p2 = scmp.lt.s32.totalorder %s9384_s20, 3 }
   0x5   : > { %s11597_s21 = smov (%p29_p1, %s27_s21), 0  ;;  %p274_p3 = pnand %p6850_p0, %p273_p2 }
   0x7   : > { %277 = sbr.rel (%p274_p3) target bundleno = 1373 (0x55d), region = 40 }
   0xc   : > { %v8889_v0 = vld [vmem:[%s11330_s4 + $0x38] sm:$0xff]  ;;  %p338_p4 = scmp.lt.s32.totalorder %s9376_s18, 1  ;;  %v8888_v2 = vld [vmem:[%s11330_s4 + $0x30] sm:$0xff]  ;;  %v8887_v4 = vld [vmem:[%s11330_s4 + $0x28] sm:$0xff]  ;;  %vm1080_vm0 = vcmask 1040384   ;;  %vm1211_vm3 = vcmask 1047552  }
   0xd   : > { %v8897_v1 = vld [vmem:[%s11330_s4 + $0x78] sm:$0xff]  ;;  %9306 = vmatpush.bf16.msra.mxu2 %v8889_v0  ;;  %v8896_v3 = vld [vmem:[%s11330_s4 + $0x70] sm:$0xff]  ;;  %2862 = vmatpush.bf16.msra.mxu0 %v8889_v0  ;;  %v8895_v5 = vld [vmem:[%s11330_s4 + $0x68] sm:$0xff]  ;;  %vm1081_vm1 = vsmask.f32 256  ;;  %vm6675_vm6 = vcmask 257024  }
   0xe   : > { %9314 = vmatpush.bf16.msra.mxu3 %v8897_v1  ;;  %s11599_s18 = smov (!%p338_p4, %s9376_s18), 1  ;;  %2951 = vmatpush.bf16.msra.mxu1 %v8897_v1  ;;  %v9468_v9 = vld [vmem:[%s11329_s3] ss:$0 sm:$0xff]  ;;  %v9473_v10 = vld [vmem:[%s11329_s3 + $0x1] ss:$0 sm:$0xff]  ;;  %v8885_v36 = vld [vmem:[%s11330_s4 + $0x18] sm:$0xff] }
   0xf   : > { %s9449_s7 = sshll.u32 %s11599_s18, 7  ;;  %v9478_v11 = vld [vmem:[%s11329_s3 + $0x2] ss:$0 sm:$0xff]  ;;  %v9483_v12 = vld [vmem:[%s11329_s3 + $0x3] ss:$0 sm:$0xff]  ;;  %v8893_v37 = vld [vmem:[%s11330_s4 + $0x58] sm:$0xff] }
  0x10   : > { %s9458_s12 = scalar_lea.vmem %s11326_s0, %s9449_s7  ;;  %s360_s15 = scalar_lea.vmem %s11327_s1, %s9449_s7  ;;  %v8886_v19 = vld [vmem:[%s11330_s4 + $0x20] sm:$0xff]  ;;  %v8884_v54 = vld [vmem:[%s11330_s4 + $0x10] sm:$0xff]  ;;  %vm9560_vm2 = vmand %vm1080_vm0, %vm1081_vm1  ;;  %vm1212_vm4 = vsmask.f32 7424 }
  0x11   : > { %9307 = vmatpush.bf16.msra.mxu2 %v8888_v2  ;;  %v9297_v6 = vld [vmem:[%s9458_s12 + $0x38] sm:$0xff]   ;;  %2863 = vmatpush.bf16.msra.mxu0 %v8888_v2  ;;  %v9283_v13 = vld [vmem:[%s360_s15] sm:$0xff]   ;;  %v8892_v55 = vld [vmem:[%s11330_s4 + $0x50] sm:$0xff]  ;;  %s8784_s23 = sadd.s32 120, %s9449_s7  ;;  %s11178_s28 = scalar_lea.vmem %s11331_s5, %s9449_s7 }
  0x12   : > { %9315 = vmatpush.bf16.msra.mxu3 %v8896_v3  ;;  %2952 = vmatpush.bf16.msra.mxu1 %v8896_v3  ;;  %v9248_v7 = vunpack.c.l.bf16 %v9297_v6  ;;  %v9249_v8 = vunpack.c.h.bf16 %v9297_v6  ;;  %v9490_v18 = vld [vmem:[%s9458_s12 + $0x40] sm:$0xff]   ;;  %v9284_v21 = vunpack.c.l.bf16 %v9283_v13  ;;  %v9285_v22 = vunpack.c.h.bf16 %v9283_v13  ;;  %vm10137_vm5 = vmand %vm1211_vm3, %vm1212_vm4  ;;  %s377_s30 = scalar_lea.vmem %s11328_s2, %s8784_s23 }
  0x13   : > { %v8894_v20 = vld [vmem:[%s11330_s4 + $0x60] sm:$0xff]  ;;  %v9252_v23 = vunpack.c.l.bf16 %v9490_v18  ;;  %v9253_v27 = vunpack.c.h.bf16 %v9490_v18 }
  0x14   : > { %v483_v14 = vmul.f32 %v9468_v9, %v9248_v7  ;;  %v484_v15 = vmul.f32 %v9468_v9, %v9249_v8  ;;  %v581_v16 = vmul.f32 %v9478_v11, %v9248_v7  ;;  %v582_v17 = vmul.f32 %v9478_v11, %v9249_v8  ;;  %v9520_v49 = vld [vmem:[%s9458_s12] sm:$0xff]   ;;  %v8883_v7 = vld [vmem:[%s11330_s4 + $0x8] sm:$0xff] }
  0x15   : > { %9308 = vmatpush.bf16.msra.mxu2 %v8887_v4  ;;  %2864 = vmatpush.bf16.msra.mxu0 %v8887_v4  ;;  %v1731_v29 = vmul.f32 %v9468_v9, %v9284_v21  ;;  %v1732_v30 = vmul.f32 %v9468_v9, %v9285_v22  ;;  %v1737_v31 = vmul.f32 %v9478_v11, %v9284_v21  ;;  %v9220_v62 = vunpack.c.l.bf16 %v9520_v49  ;;  %v8891_v8 = vld [vmem:[%s11330_s4 + $0x48] sm:$0xff] }
  0x16   : > { %9316 = vmatpush.bf16.msra.mxu3 %v8895_v5  ;;  %2953 = vmatpush.bf16.msra.mxu1 %v8895_v5  ;;  %v516_v24 = vadd.f32 %v9473_v10, %v483_v14  ;;  %v517_v25 = vadd.f32 %v9473_v10, %v484_v15  ;;  %v614_v26 = vadd.f32 %v9483_v12, %v581_v16 }
  0x17   : > { %v615_v28 = vadd.f32 %v9483_v12, %v582_v17  ;;  %v1738_v35 = vmul.f32 %v9478_v11, %v9285_v22  ;;  %v1733_v39 = vadd.f32 %v9473_v10, %v1731_v29  ;;  %v1734_v40 = vadd.f32 %v9473_v10, %v1732_v30  ;;  %v8882_v30 = vld [vmem:[%s11330_s4] sm:$0xff] }
  0x18   : > { %v548_v32 = vmax.f32 %v516_v24, 0.0  ;;  %v549_v33 = vmax.f32 %v517_v25, 0.0  ;;  %v646_v34 = vmax.f32 %v614_v26, 0.0  ;;  %v1739_v41 = vadd.f32 %v9483_v12, %v1737_v31  ;;  %v8890_v31 = vld [vmem:[%s11330_s4 + $0x40] sm:$0xff] }
  0x19   : > { %9309 = vmatpush.bf16.msra.mxu2 %v8886_v19  ;;  %v647_v38 = vmax.f32 %v615_v28, 0.0  ;;  %2865 = vmatpush.bf16.msra.mxu0 %v8886_v19  ;;  %v1740_v43 = vadd.f32 %v9483_v12, %v1738_v35  ;;  %v485_v44 = vmul.f32 %v9468_v9, %v9252_v23  ;;  %v1735_v46 = vmax.f32 %v1733_v39, 0.0 }
  0x1a   : > { %9317 = vmatpush.bf16.msra.mxu3 %v8894_v20  ;;  %2954 = vmatpush.bf16.msra.mxu1 %v8894_v20  ;;  %v678_v42 = vpack.c.bf16 %v646_v34, %v548_v32  ;;  %v1736_v47 = vmax.f32 %v1734_v40, 0.0  ;;  %v1741_v48 = vmax.f32 %v1739_v41, 0.0  ;;  %v486_v53 = vmul.f32 %v9468_v9, %v9253_v27 }
  0x1b   : > { %v679_v45 = vpack.c.bf16 %v647_v38, %v549_v33  ;;  %v1742_v52 = vmax.f32 %v1740_v43, 0.0  ;;  %v1744_v58 = vmul.f32 0.0, %v1735_v46  ;;  %v9535_v1 = vadd.f32 %v9473_v10, %v485_v44  ;;  %v8913_v43 = vld [vmem:[%s11330_s4 + $0xf8] sm:$0xff] }
  0x1c   : > { %v756_v50 = vunpack.c.l.b16 %v678_v42  ;;  %v757_v51 = vunpack.c.h.b16 %v678_v42  ;;  %1674 = vst [vmem:[#allocation2 + $0x188] sm:$0xff] %v678_v42  ;;  %v1745_v59 = vmul.f32 0.0, %v1736_v47  ;;  %v1746_v60 = vmul.f32 0.0, %v1741_v48  ;;  %v8905_v42 = vld [vmem:[%s11330_s4 + $0xb8] sm:$0xff] }
  0x1d   : > { %9310 = vmatpush.bf16.msra.mxu2 %v8885_v36  ;;  %v758_v56 = vunpack.c.l.b16 %v679_v45  ;;  %v759_v57 = vunpack.c.h.b16 %v679_v45  ;;  %1677 = vst [vmem:[#allocation2 + $0x1a0] sm:$0xff] %v679_v45  ;;  %2866 = vmatpush.bf16.msra.mxu0 %v8885_v36  ;;  %v1747_v61 = vmul.f32 0.0, %v1742_v52  ;;  %v9538_v2 = vadd.f32 %v9473_v10, %v486_v53  ;;  %v8929_v52 = vld [vmem:[%s11330_s4 + $0x178] sm:$0xff]  ;;  %v9299_v53 = vld [vmem:[%s9458_s12 + $0x48] sm:$0xff]  }
  0x1e   : > { %9318 = vmatpush.bf16.msra.mxu3 %v8893_v37  ;;  %2955 = vmatpush.bf16.msra.mxu1 %v8893_v37  ;;  %v1748_v3 = vpack.c.bf16 %v1746_v60, %v1744_v58  ;;  %v583_v5 = vmul.f32 %v9478_v11, %v9252_v23  ;;  %v584_v6 = vmul.f32 %v9478_v11, %v9253_v27  ;;  %v550_v23 = vmax.f32 %v9535_v1, 0.0  ;;  %v8904_v1 = vld [vmem:[%s11330_s4 + $0xb0] sm:$0xff] }
  0x1f   : > { %v9530_v63 = vpack.c.b16 %v758_v56, %v756_v50  ;;  %v9532_v0 = vpack.c.b16 %v759_v57, %v757_v51  ;;  %v1749_v4 = vpack.c.bf16 %v1747_v61, %v1745_v59  ;;  %v9221_v24 = vunpack.c.h.bf16 %v9520_v49  ;;  %v8921_v51 = vld [vmem:[%s11330_s4 + $0x138] sm:$0xff] }
  0x20   : > { %v1752_v17 = vunpack.c.l.b16 %v1748_v3  ;;  %v1753_v18 = vunpack.c.h.b16 %v1748_v3  ;;  %1809 = vst [vmem:[#allocation2 + $0x8] sm:$0xff] %v1748_v3  ;;  %v11400_v25 = vmov 0  ;;  %v616_v28 = vadd.f32 %v9483_v12, %v583_v5 }
  0x21   : > { %9311 = vmatpush.bf16.msra.mxu2 %v8884_v54  ;;  %v11345_v13 = vshrl.u32 %v9530_v63, 16  ;;  %v11351_v14 = vshll.u32 %v9530_v63, 16  ;;  %v11344_v15 = vshrl.u32 %v9532_v0, 16  ;;  %v11346_v16 = vshll.u32 %v9532_v0, 16  ;;  %2867 = vmatpush.bf16.msra.mxu0 %v8884_v54  ;;  %1812 = vst [vmem:[#allocation2 + $0x20] sm:$0xff] %v1749_v4 }
  0x22   : > { %9319 = vmatpush.bf16.msra.mxu3 %v8892_v55  ;;  %2956 = vmatpush.bf16.msra.mxu1 %v8892_v55  ;;  %v1754_v19 = vunpack.c.l.b16 %v1749_v4  ;;  %v1755_v20 = vunpack.c.h.b16 %v1749_v4  ;;  %v11401_v25 = vsel %vm9560_vm2, 4294967295, %v11400_v25  ;;  %v617_v29 = vadd.f32 %v9483_v12, %v584_v6 }
  0x23   : > { %v925_v21 = vrot.slane %v11345_v13, 7  ;;  %v932_v22 = vrot.slane %v11344_v15, 7  ;;  %11402 = vst [vmem:[#allocation4_spill] sm:$0xff] %v11401_v25  ;;  %v551_v34 = vmax.f32 %v9538_v2, 0.0  ;;  %v469_v35 = vmul.f32 %v9468_v9, %v9220_v62 }
  0x24   : > { %v9564_v26 = vpack.c.b16 %v1754_v19, %v1752_v17  ;;  %v9566_v27 = vpack.c.b16 %v1755_v20, %v1753_v18  ;;  %v648_v44 = vmax.f32 %v616_v28, 0.0  ;;  %v649_v45 = vmax.f32 %v617_v29, 0.0 }
  0x25   : > { %9312 = vmatpush.bf16.msra.mxu2 %v8883_v7  ;;  %v928_v32 = vor.u32 %v11351_v14, %v925_v21  ;;  %v935_v33 = vor.u32 %v11346_v16, %v932_v22  ;;  %2868 = vmatpush.bf16.msra.mxu0 %v8883_v7  ;;  %v9256_v2 = vunpack.c.l.bf16 %v9299_v53  ;;  %v470_v5 = vmul.f32 %v9468_v9, %v9221_v24 }
  0x26   : > { %9320 = vmatpush.bf16.msra.mxu3 %v8891_v8  ;;  %2957 = vmatpush.bf16.msra.mxu1 %v8891_v8  ;;  %v1759_v36 = vshrl.u32 %v9564_v26, 16  ;;  %v1762_v37 = vshll.u32 %v9564_v26, 16  ;;  %v1766_v38 = vshrl.u32 %v9566_v27, 16  ;;  %v1769_v39 = vshll.u32 %v9566_v27, 16 }
  0x27   : > { %v1097_v40 = vsel %vm9560_vm2, 0, %v928_v32  ;;  %v1098_v41 = vsel %vm9560_vm2, 0, %v935_v33  ;;  %v680_v58 = vpack.c.bf16 %v648_v44, %v550_v23  ;;  %v681_v61 = vpack.c.bf16 %v649_v45, %v551_v34 }
  0x28   : > { %v1366_v46 = vunpack.c.l.b16 %v1097_v40  ;;  %v1367_v47 = vunpack.c.l.b16 %v1098_v41  ;;  %v1370_v48 = vunpack.c.h.b16 %v1097_v40  ;;  %v1371_v50 = vunpack.c.h.b16 %v1098_v41 }
  0x29   : > { %9313 = vmatpush.bf16.msra.mxu2 %v8882_v30  ;;  %v1761_v54 = vrot.slane %v1759_v36, 7  ;;  %v1768_v55 = vrot.slane %v1766_v38, 7  ;;  %2869 = vmatpush.bf16.msra.mxu0 %v8882_v30  ;;  %v760_v3 = vunpack.c.l.b16 %v680_v58  ;;  %v761_v4 = vunpack.c.h.b16 %v680_v58  ;;  %1680 = vst [vmem:[#allocation2 + $0x1b8] sm:$0xff] %v680_v58 }
  0x2a   : > { %9321 = vmatpush.bf16.msra.mxu3 %v8890_v31  ;;  %2958 = vmatpush.bf16.msra.mxu1 %v8890_v31  ;;  %v1480_v56 = vpack.c.b16 %v1367_v47, %v1366_v46  ;;  %v1483_v57 = vpack.c.b16 %v1371_v50, %v1370_v48  ;;  %v9620_v6 = vadd.f32 %v9473_v10, %v469_v35  ;;  %v762_v17 = vunpack.c.l.b16 %v681_v61 }
  0x2b   : > { %v1764_v59 = vor.u32 %v1762_v37, %v1761_v54  ;;  %v1771_v60 = vor.u32 %v1769_v39, %v1768_v55  ;;  %v763_v18 = vunpack.c.h.b16 %v681_v61  ;;  %1683 = vst [vmem:[#allocation2 + $0x1d0] sm:$0xff] %v681_v61  ;;  %v503_v29 = vadd.f32 %v9473_v10, %v470_v5  ;;  %v8920_v5 = vld [vmem:[%s11330_s4 + $0x130] sm:$0xff] }
  0x2c   : > { %1673 = vst [vmem:[#allocation2 + $0x180] sm:$0xff] %v1480_v56  ;;  %v9626_v23 = vpack.c.b16 %v762_v17, %v760_v3  ;;  %v9257_v30 = vunpack.c.h.bf16 %v9299_v53  ;;  %v567_v33 = vmul.f32 %v9478_v11, %v9220_v62  ;;  %v568_v34 = vmul.f32 %v9478_v11, %v9221_v24 }
  0x2d   : > { %3040 = vmatpush.bf16.msrb.mxu2 %v8905_v42  ;;  %3218 = vmatpush.bf16.msrb.mxu0 %v8921_v51  ;;  %1676 = vst [vmem:[#allocation2 + $0x198] sm:$0xff] %v1483_v57  ;;  %v1774_v7 = vsel %vm9560_vm2, 0, %v1764_v59  ;;  %v1775_v8 = vsel %vm9560_vm2, 0, %v1771_v60  ;;  %v9628_v28 = vpack.c.b16 %v763_v18, %v761_v4  ;;  %v534_v42 = vmax.f32 %v9620_v6, 0.0  ;;  %v8912_v4 = vld [vmem:[%s11330_s4 + $0xf0] sm:$0xff] }
  0x2e   : > { %3129 = vmatpush.bf16.msrb.mxu3 %v8913_v43  ;;  %3307 = vmatpush.bf16.msrb.mxu1 %v8929_v52  ;;  %v1788_v19 = vunpack.c.l.b16 %v1774_v7  ;;  %v1789_v20 = vunpack.c.l.b16 %v1775_v8  ;;  %v1792_v21 = vunpack.c.h.b16 %v1774_v7  ;;  %v1793_v22 = vunpack.c.h.b16 %v1775_v8  ;;  %v9642_v43 = vld [vmem:[%s9458_s12 + $0x8] sm:$0xff]   ;;  %v8928_v6 = vld [vmem:[%s11330_s4 + $0x170] sm:$0xff] }
  0x2f   : > { %v11341_v35 = vshrl.u32 %v9626_v23, 16  ;;  %v11343_v40 = vshll.u32 %v9626_v23, 16  ;;  %v11340_v41 = vshrl.u32 %v9628_v28, 16  ;;  %v11342_v44 = vshll.u32 %v9628_v28, 16 }
  0x30   : > { %v1796_v31 = vpack.c.b16 %v1789_v20, %v1788_v19  ;;  %v1799_v32 = vpack.c.b16 %v1793_v22, %v1792_v21  ;;  %v600_v45 = vadd.f32 %v9483_v12, %v567_v33  ;;  %v601_v62 = vadd.f32 %v9483_v12, %v568_v34 }
  0x31   : > { %3041 = vmatpush.bf16.msrb.mxu2 %v8904_v1  ;;  %v487_v49 = vmul.f32 %v9468_v9, %v9256_v2  ;;  %v939_v47 = vrot.slane %v11341_v35, 7  ;;  %v488_v48 = vmul.f32 %v9468_v9, %v9257_v30  ;;  %v585_v50 = vmul.f32 %v9478_v11, %v9256_v2  ;;  %3219 = vmatpush.bf16.msrb.mxu0 %v8920_v5 }
  0x32   : > { %1808 = vst [vmem:[#allocation2] sm:$0xff] %v1796_v31  ;;  %v586_v51 = vmul.f32 %v9478_v11, %v9257_v30  ;;  %v946_v54 = vrot.slane %v11340_v41, 7  ;;  %v535_v55 = vmax.f32 %v503_v29, 0.0  ;;  %v9224_v57 = vunpack.c.l.bf16 %v9642_v43  ;;  %3130 = vmatpush.bf16.msrb.mxu3 %v8912_v4  ;;  %3308 = vmatpush.bf16.msrb.mxu1 %v8928_v6  ;;  %v8903_v4 = vld [vmem:[%s11330_s4 + $0xa8] sm:$0xff] }
  0x33   : > { %v7053_v24 = vld [vmem:[#allocation2 + $0x180] sm:$0xf]  ;;  %v8834_v46 = vld [vmem:[#allocation2 + $0x184] sm:$0xf]  ;;  %1811 = vst [vmem:[#allocation2 + $0x18] sm:$0xff] %v1799_v32  ;;  %v520_v56 = vadd.f32 %v9473_v10, %v487_v49  ;;  %v942_v60 = vor.u32 %v11343_v40, %v939_v47  ;;  %v9225_v61 = vunpack.c.h.bf16 %v9642_v43  ;;  %v632_v2 = vmax.f32 %v600_v45, 0.0 }
  0x34   : > { %v8837_v52 = vld [vmem:[#allocation2 + $0x194] sm:$0xf0]  ;;  %v7055_v53 = vld [vmem:[#allocation2 + $0x198] sm:$0xf0]  ;;  %v949_v1 = vor.u32 %v11342_v44, %v946_v54  ;;  %v633_v3 = vmax.f32 %v601_v62, 0.0  ;;  %v521_v7 = vadd.f32 %v9473_v10, %v488_v48  ;;  %v618_v18 = vadd.f32 %v9483_v12, %v585_v50 }
  0x35   : > { %v7054_v58 = vor.u32 %v8837_v52, %v7053_v24  ;;  %v7058_v59 = vor.u32 %v8834_v46, %v7055_v53  ;;  %v1099_v8 = vsel %vm9560_vm2, 0, %v942_v60  ;;  %v552_v17 = vmax.f32 %v520_v56, 0.0  ;;  %3042 = vmatpush.bf16.msrb.mxu2 %v8903_v4  ;;  %v8919_v4 = vld [vmem:[%s11330_s4 + $0x128] sm:$0xff] }
  0x36   : > { %v619_v19 = vadd.f32 %v9483_v12, %v586_v51  ;;  %v1100_v20 = vsel %vm9560_vm2, 0, %v949_v1  ;;  %v1374_v21 = vunpack.c.l.b16 %v1099_v8  ;;  %v1378_v22 = vunpack.c.h.b16 %v1099_v8  ;;  %3220 = vmatpush.bf16.msrb.mxu0 %v8919_v4 }
  0x37   : > { %2910 = vmatmul.bf16.vlgmr.msra.gmra.mxu2 %v7054_v58  ;;  %2999 = vmatmul.bf16.vlgmr.msra.gmra.mxu3 %v7058_v59  ;;  %v664_v29 = vpack.c.bf16 %v632_v2, %v534_v42  ;;  %v1375_v32 = vunpack.c.l.b16 %v1100_v20  ;;  %v1379_v33 = vunpack.c.h.b16 %v1100_v20  ;;  %v665_v34 = vpack.c.bf16 %v633_v3, %v535_v55 }
  0x38   : > { %v553_v43 = vmax.f32 %v521_v7, 0.0  ;;  %v650_v46 = vmax.f32 %v618_v18, 0.0  ;;  %v471_v47 = vmul.f32 %v9468_v9, %v9224_v57  ;;  %v651_v54 = vmax.f32 %v619_v19, 0.0 }
  0x39   : > { %v6861_v30 = vld [vmem:[#allocation2] sm:$0xf]  ;;  %v8786_v31 = vld [vmem:[#allocation2 + $0x4] sm:$0xf]  ;;  %v728_v49 = vunpack.c.l.b16 %v664_v29  ;;  %v729_v24 = vunpack.c.h.b16 %v664_v29  ;;  %1632 = vst [vmem:[#allocation2 + $0x38] sm:$0xff] %v664_v29  ;;  %v1486_v42 = vpack.c.b16 %v1375_v32, %v1374_v21  ;;  %v1489_v51 = vpack.c.b16 %v1379_v33, %v1378_v22 }
  0x3a   : > { %v8789_v45 = vld [vmem:[#allocation2 + $0x14] sm:$0xf0]  ;;  %v6863_v62 = vld [vmem:[#allocation2 + $0x18] sm:$0xf0]  ;;  %1635 = vst [vmem:[#allocation2 + $0x50] sm:$0xff] %v665_v34  ;;  %v730_v52 = vunpack.c.l.b16 %v665_v34  ;;  %v731_v53 = vunpack.c.h.b16 %v665_v34  ;;  %v682_v56 = vpack.c.bf16 %v650_v46, %v552_v17  ;;  %v472_v55 = vmul.f32 %v9468_v9, %v9225_v61  ;;  %v9692_v17 = vld [vmem:[%s9458_s12 + $0x50] sm:$0xff]  }
  0x3b   : > { %v6862_v48 = vor.u32 %v8789_v45, %v6861_v30  ;;  %v6866_v50 = vor.u32 %v8786_v31, %v6863_v62  ;;  %1679 = vst [vmem:[#allocation2 + $0x1b0] sm:$0xff] %v1486_v42  ;;  %v504_v58 = vadd.f32 %v9473_v10, %v471_v47  ;;  %v569_v59 = vmul.f32 %v9478_v11, %v9224_v57 }
  0x3c   : > { %1682 = vst [vmem:[#allocation2 + $0x1c8] sm:$0xff] %v1489_v51  ;;  %v9682_v60 = vpack.c.b16 %v730_v52, %v728_v49  ;;  %v9684_v1 = vpack.c.b16 %v731_v53, %v729_v24  ;;  %v683_v2 = vpack.c.bf16 %v651_v54, %v553_v43  ;;  %v764_v3 = vunpack.c.l.b16 %v682_v56 }
  0x3d   : > { %2870 = vmatmul.bf16.vlgmr.msra.gmra.mxu0 %v6862_v48  ;;  %2959 = vmatmul.bf16.vlgmr.msra.gmra.mxu1 %v6866_v50  ;;  %v765_v5 = vunpack.c.h.b16 %v682_v56  ;;  %1686 = vst [vmem:[#allocation2 + $0x1e8] sm:$0xff] %v682_v56  ;;  %v505_v6 = vadd.f32 %v9473_v10, %v472_v55  ;;  %v536_v7 = vmax.f32 %v504_v58, 0.0  ;;  %v570_v8 = vmul.f32 %v9478_v11, %v9225_v61 }
  0x3e   : > { %v11373_v57 = vshrl.u32 %v9682_v60, 16  ;;  %v828_v18 = vshll.u32 %v9682_v60, 16  ;;  %v11372_v19 = vshrl.u32 %v9684_v1, 16  ;;  %v835_v20 = vshll.u32 %v9684_v1, 16  ;;  %1689 = vst [vmem:[#allocation2 + $0x200] sm:$0xff] %v683_v2 }
  0x3f   : > { %v766_v21 = vunpack.c.l.b16 %v683_v2  ;;  %v767_v22 = vunpack.c.h.b16 %v683_v2  ;;  %v537_v29 = vmax.f32 %v505_v6, 0.0  ;;  %v602_v30 = vadd.f32 %v9483_v12, %v569_v59 }
  0x40   : > { %v827_v61 = vrot.slane %v11373_v57, 7  ;;  %v834_v31 = vrot.slane %v11372_v19, 7  ;;  %v603_v32 = vadd.f32 %v9483_v12, %v570_v8  ;;  %v9260_v33 = vunpack.c.l.bf16 %v9692_v17 }
  0x41   : > { %v9705_v34 = vpack.c.b16 %v766_v21, %v764_v3  ;;  %v9707_v43 = vpack.c.b16 %v767_v22, %v765_v5  ;;  %v634_v45 = vmax.f32 %v602_v30, 0.0  ;;  %v9261_v62 = vunpack.c.h.bf16 %v9692_v17  ;;  %v8911_v3 = vld [vmem:[%s11330_s4 + $0xe8] sm:$0xff] }
  0x42   : > { %v7077_v49 = vld [vmem:[#allocation2 + $0x1b0] sm:$0xf]  ;;  %v8840_v24 = vld [vmem:[#allocation2 + $0x1b4] sm:$0xf]  ;;  %v830_v46 = vor.u32 %v828_v18, %v827_v61  ;;  %v837_v47 = vor.u32 %v835_v20, %v834_v31  ;;  %v635_v48 = vmax.f32 %v603_v32, 0.0  ;;  %v489_v50 = vmul.f32 %v9468_v9, %v9260_v33  ;;  %v8927_v5 = vld [vmem:[%s11330_s4 + $0x168] sm:$0xff]  ;;  %3131 = vmatpush.bf16.msrb.mxu3 %v8911_v3 }
  0x43   : > { %v8843_v42 = vld [vmem:[#allocation2 + $0x1c4] sm:$0xf0]  ;;  %v7079_v51 = vld [vmem:[#allocation2 + $0x1c8] sm:$0xf0]  ;;  %v11333_v52 = vshrl.u32 %v9705_v34, 16  ;;  %v11335_v53 = vshll.u32 %v9705_v34, 16  ;;  %v666_v54 = vpack.c.bf16 %v634_v45, %v536_v7  ;;  %v490_v56 = vmul.f32 %v9468_v9, %v9261_v62  ;;  %3309 = vmatpush.bf16.msrb.mxu1 %v8927_v5 }
  0x44   : > { %v7078_v55 = vor.u32 %v8843_v42, %v7077_v49  ;;  %v7082_v58 = vor.u32 %v8840_v24, %v7079_v51  ;;  %v1083_v59 = vsel %vm9560_vm2, 0, %v830_v46  ;;  %v1084_v2 = vsel %vm9560_vm2, 0, %v837_v47 }
  0x45   : > { %v1310_v6 = vunpack.c.l.b16 %v1083_v59  ;;  %v1311_v7 = vunpack.c.l.b16 %v1084_v2  ;;  %v1314_v8 = vunpack.c.h.b16 %v1083_v59  ;;  %v1315_v17 = vunpack.c.h.b16 %v1084_v2  ;;  %1638 = vst [vmem:[#allocation2 + $0x68] sm:$0xff] %v666_v54 }
  0x46   : > { %v953_v21 = vrot.slane %v11333_v52, 7  ;;  %v11332_v22 = vshrl.u32 %v9707_v43, 16  ;;  %v11334_v30 = vshll.u32 %v9707_v43, 16  ;;  %v667_v32 = vpack.c.bf16 %v635_v48, %v537_v29 }
  0x47   : > { %2915 = vmatmul.bf16.gmra.mxu2 %v7078_v55  ;;  %3004 = vmatmul.bf16.gmra.mxu3 %v7082_v58  ;;  %v1438_v61 = vpack.c.b16 %v1311_v7, %v1310_v6  ;;  %v1441_v31 = vpack.c.b16 %v1315_v17, %v1314_v8  ;;  %v732_v45 = vunpack.c.l.b16 %v666_v54  ;;  %v733_v46 = vunpack.c.h.b16 %v666_v54  ;;  %v9292_v7 = vld [vmem:[%s9458_s12 + $0x10] sm:$0xff]  }
  0x48   : > { %v956_v49 = vor.u32 %v11335_v53, %v953_v21  ;;  %v960_v24 = vrot.slane %v11332_v22, 7  ;;  %v734_v47 = vunpack.c.l.b16 %v667_v32  ;;  %v735_v42 = vunpack.c.h.b16 %v667_v32  ;;  %1641 = vst [vmem:[#allocation2 + $0x80] sm:$0xff] %v667_v32 }
  0x49   : > { %1631 = vst [vmem:[#allocation2 + $0x30] sm:$0xff] %v1438_v61  ;;  %v522_v51 = vadd.f32 %v9473_v10, %v489_v50  ;;  %v523_v55 = vadd.f32 %v9473_v10, %v490_v56  ;;  %v587_v58 = vmul.f32 %v9478_v11, %v9260_v33  ;;  %v588_v54 = vmul.f32 %v9478_v11, %v9261_v62 }
  0x4a   : > { %1634 = vst [vmem:[#allocation2 + $0x48] sm:$0xff] %v1441_v31  ;;  %v963_v29 = vor.u32 %v11334_v30, %v960_v24  ;;  %v1101_v48 = vsel %vm9560_vm2, 0, %v956_v49  ;;  %v9747_v3 = vpack.c.b16 %v734_v47, %v732_v45  ;;  %v9749_v50 = vpack.c.b16 %v735_v42, %v733_v46  ;;  %v9761_v45 = vld [vmem:[%s9458_s12 + $0x58] sm:$0xff]   ;;  %v8902_v47 = vld [vmem:[%s11330_s4 + $0xa0] sm:$0xff] }
  0x4b   : > { %v1382_v59 = vunpack.c.l.b16 %v1101_v48  ;;  %v1386_v2 = vunpack.c.h.b16 %v1101_v48  ;;  %v554_v4 = vmax.f32 %v522_v51, 0.0  ;;  %v555_v5 = vmax.f32 %v523_v55, 0.0  ;;  %3043 = vmatpush.bf16.msrb.mxu2 %v8902_v47  ;;  %v9791_v30 = vld [vmem:[%s9458_s12 + $0x18] sm:$0xff]  }
  0x4c   : > { %v1102_v56 = vsel %vm9560_vm2, 0, %v963_v29  ;;  %v620_v6 = vadd.f32 %v9483_v12, %v587_v58  ;;  %v11361_v62 = vshrl.u32 %v9747_v3, 16  ;;  %v11367_v17 = vshll.u32 %v9747_v3, 16 }
  0x4d   : > { %v1383_v8 = vunpack.c.l.b16 %v1102_v56  ;;  %v1387_v33 = vunpack.c.h.b16 %v1102_v56  ;;  %v11356_v21 = vshrl.u32 %v9749_v50, 16  ;;  %v11366_v61 = vshll.u32 %v9749_v50, 16 }
  0x4e   : > { %v621_v31 = vadd.f32 %v9483_v12, %v588_v54  ;;  %v652_v32 = vmax.f32 %v620_v6, 0.0  ;;  %v841_v46 = vrot.slane %v11361_v62, 7  ;;  %v9228_v42 = vunpack.c.l.bf16 %v9292_v7 }
  0x4f   : > { %v1492_v49 = vpack.c.b16 %v1383_v8, %v1382_v59  ;;  %v1495_v24 = vpack.c.b16 %v1387_v33, %v1386_v2  ;;  %v848_v29 = vrot.slane %v11356_v21, 7  ;;  %v9229_v54 = vunpack.c.h.bf16 %v9292_v7 }
  0x50   : > { %v6885_v51 = vld [vmem:[#allocation2 + $0x30] sm:$0xf]  ;;  %v8792_v55 = vld [vmem:[#allocation2 + $0x34] sm:$0xf]  ;;  %v653_v48 = vmax.f32 %v621_v31, 0.0  ;;  %v684_v58 = vpack.c.bf16 %v652_v32, %v554_v4  ;;  %v844_v59 = vor.u32 %v11367_v17, %v841_v46  ;;  %v473_v2 = vmul.f32 %v9468_v9, %v9228_v42 }
  0x51   : > { %v8795_v56 = vld [vmem:[#allocation2 + $0x44] sm:$0xf0]  ;;  %v6887_v6 = vld [vmem:[#allocation2 + $0x48] sm:$0xf0]  ;;  %1685 = vst [vmem:[#allocation2 + $0x1e0] sm:$0xff] %v1492_v49  ;;  %v571_v8 = vmul.f32 %v9478_v11, %v9228_v42  ;;  %v9264_v33 = vunpack.c.l.bf16 %v9761_v45  ;;  %v851_v4 = vor.u32 %v11366_v61, %v848_v29  ;;  %v474_v46 = vmul.f32 %v9468_v9, %v9229_v54 }
  0x52   : > { %v6886_v22 = vor.u32 %v8795_v56, %v6885_v51  ;;  %v6890_v52 = vor.u32 %v8792_v55, %v6887_v6  ;;  %1688 = vst [vmem:[#allocation2 + $0x1f8] sm:$0xff] %v1495_v24  ;;  %v685_v7 = vpack.c.bf16 %v653_v48, %v555_v5  ;;  %v1085_v31 = vsel %vm9560_vm2, 0, %v844_v59 }
  0x53   : > { %v768_v32 = vunpack.c.l.b16 %v684_v58  ;;  %v769_v49 = vunpack.c.h.b16 %v684_v58  ;;  %1692 = vst [vmem:[#allocation2 + $0x218] sm:$0xff] %v684_v58  ;;  %v1086_v47 = vsel %vm9560_vm2, 0, %v851_v4  ;;  %v1318_v42 = vunpack.c.l.b16 %v1085_v31 }
  0x54   : > { %2875 = vmatmul.bf16.gmra.mxu0 %v6886_v22  ;;  %2964 = vmatmul.bf16.gmra.mxu1 %v6890_v52  ;;  %v1322_v24 = vunpack.c.h.b16 %v1085_v31  ;;  %v770_v51 = vunpack.c.l.b16 %v685_v7  ;;  %1695 = vst [vmem:[#allocation2 + $0x230] sm:$0xff] %v685_v7  ;;  %v1319_v55 = vunpack.c.l.b16 %v1086_v47  ;;  %v1323_v5 = vunpack.c.h.b16 %v1086_v47 }
  0x55   : > { %v771_v29 = vunpack.c.h.b16 %v685_v7  ;;  %v506_v48 = vadd.f32 %v9473_v10, %v473_v2  ;;  %v507_v58 = vadd.f32 %v9473_v10, %v474_v46  ;;  %v572_v22 = vmul.f32 %v9478_v11, %v9229_v54 }
  0x56   : > { %v9783_v56 = vpack.c.b16 %v770_v51, %v768_v32  ;;  %v604_v52 = vadd.f32 %v9483_v12, %v571_v8  ;;  %v1444_v6 = vpack.c.b16 %v1319_v55, %v1318_v42  ;;  %v1447_v59 = vpack.c.b16 %v1323_v5, %v1322_v24 }
  0x57   : > { %v9788_v4 = vpack.c.b16 %v771_v29, %v769_v49  ;;  %v538_v31 = vmax.f32 %v506_v48, 0.0  ;;  %v605_v32 = vadd.f32 %v9483_v12, %v572_v22  ;;  %v9265_v46 = vunpack.c.h.bf16 %v9761_v45  ;;  %v8910_v22 = vld [vmem:[%s11330_s4 + $0xe0] sm:$0xff] }
  0x58   : > { %v7101_v53 = vld [vmem:[#allocation2 + $0x1e0] sm:$0xf]  ;;  %v8846_v47 = vld [vmem:[#allocation2 + $0x1e4] sm:$0xf]  ;;  %v11337_v7 = vshrl.u32 %v9783_v56, 16  ;;  %v11338_v2 = vshll.u32 %v9783_v56, 16  ;;  %v491_v49 = vmul.f32 %v9468_v9, %v9264_v33  ;;  %3132 = vmatpush.bf16.msrb.mxu3 %v8910_v22 }
  0x59   : > { %v8849_v54 = vld [vmem:[#allocation2 + $0x1f4] sm:$0xf0]  ;;  %v7103_v51 = vld [vmem:[#allocation2 + $0x1f8] sm:$0xf0]  ;;  %1637 = vst [vmem:[#allocation2 + $0x60] sm:$0xff] %v1444_v6  ;;  %v11336_v8 = vshrl.u32 %v9788_v4, 16  ;;  %v589_v6 = vmul.f32 %v9478_v11, %v9264_v33 }
  0x5a   : > { %v7102_v42 = vor.u32 %v8849_v54, %v7101_v53  ;;  %v7106_v24 = vor.u32 %v8846_v47, %v7103_v51  ;;  %1640 = vst [vmem:[#allocation2 + $0x78] sm:$0xff] %v1447_v59  ;;  %v967_v55 = vrot.slane %v11337_v7, 7  ;;  %v11339_v5 = vshll.u32 %v9788_v4, 16  ;;  %v8918_v53 = vld [vmem:[%s11330_s4 + $0x120] sm:$0xff] }
  0x5b   : > { %v974_v29 = vrot.slane %v11336_v8, 7  ;;  %v539_v48 = vmax.f32 %v507_v58, 0.0  ;;  %v636_v45 = vmax.f32 %v604_v52, 0.0  ;;  %v637_v47 = vmax.f32 %v605_v32, 0.0  ;;  %v8926_v58 = vld [vmem:[%s11330_s4 + $0x160] sm:$0xff]  ;;  %3221 = vmatpush.bf16.msrb.mxu0 %v8918_v53 }
  0x5c   : > { %2920 = vmatmul.bf16.gmra.mxu2 %v7102_v42  ;;  %3009 = vmatmul.bf16.gmra.mxu3 %v7106_v24  ;;  %v970_v59 = vor.u32 %v11338_v2, %v967_v55  ;;  %v492_v52 = vmul.f32 %v9468_v9, %v9265_v46  ;;  %v9232_v54 = vunpack.c.l.bf16 %v9791_v30  ;;  %v524_v33 = vadd.f32 %v9473_v10, %v491_v49 }
  0x5d   : > { %v977_v51 = vor.u32 %v11339_v5, %v974_v29  ;;  %v668_v8 = vpack.c.bf16 %v636_v45, %v538_v31  ;;  %v9233_v42 = vunpack.c.h.bf16 %v9791_v30  ;;  %v669_v24 = vpack.c.bf16 %v637_v47, %v539_v48  ;;  %3310 = vmatpush.bf16.msrb.mxu1 %v8926_v58 }
  0x5e   : > { %v1103_v32 = vsel %vm9560_vm2, 0, %v970_v59  ;;  %v525_v55 = vadd.f32 %v9473_v10, %v492_v52  ;;  %v590_v7 = vmul.f32 %v9478_v11, %v9265_v46  ;;  %v556_v58 = vmax.f32 %v524_v33, 0.0 }
  0x5f   : > { %v1104_v2 = vsel %vm9560_vm2, 0, %v977_v51  ;;  %v1390_v29 = vunpack.c.l.b16 %v1103_v32  ;;  %v1394_v31 = vunpack.c.h.b16 %v1103_v32  ;;  %v736_v45 = vunpack.c.l.b16 %v668_v8  ;;  %1644 = vst [vmem:[#allocation2 + $0x98] sm:$0xff] %v668_v8 }
  0x60   : > { %v6909_v22 = vld [vmem:[#allocation2 + $0x60] sm:$0xf]  ;;  %v8798_v49 = vld [vmem:[#allocation2 + $0x64] sm:$0xf]  ;;  %v1391_v53 = vunpack.c.l.b16 %v1104_v2  ;;  %v1395_v30 = vunpack.c.h.b16 %v1104_v2  ;;  %v737_v5 = vunpack.c.h.b16 %v668_v8  ;;  %v738_v41 = vunpack.c.l.b16 %v669_v24  ;;  %1647 = vst [vmem:[#allocation2 + $0xb0] sm:$0xff] %v669_v24 }
  0x61   : > { %v8801_v48 = vld [vmem:[#allocation2 + $0x74] sm:$0xf0]  ;;  %v6911_v59 = vld [vmem:[#allocation2 + $0x78] sm:$0xf0]  ;;  %v739_v47 = vunpack.c.h.b16 %v669_v24  ;;  %v557_v52 = vmax.f32 %v525_v55, 0.0  ;;  %v622_v46 = vadd.f32 %v9483_v12, %v589_v6  ;;  %v623_v2 = vadd.f32 %v9483_v12, %v590_v7 }
  0x62   : > { %v6910_v35 = vor.u32 %v8801_v48, %v6909_v22  ;;  %v6914_v51 = vor.u32 %v8798_v49, %v6911_v59  ;;  %v1498_v44 = vpack.c.b16 %v1391_v53, %v1390_v29  ;;  %v1501_v32 = vpack.c.b16 %v1395_v30, %v1394_v31  ;;  %v9853_v59 = vld [vmem:[%s9458_s12 + $0x60] sm:$0xff]  }
  0x63   : > { %v9829_v40 = vpack.c.b16 %v738_v41, %v736_v45  ;;  %v9831_v15 = vpack.c.b16 %v739_v47, %v737_v5  ;;  %v654_v8 = vmax.f32 %v622_v46, 0.0  ;;  %v475_v24 = vmul.f32 %v9468_v9, %v9232_v54 }
  0x64   : > { %2880 = vmatmul.bf16.gmra.mxu0 %v6910_v35  ;;  %2969 = vmatmul.bf16.gmra.mxu1 %v6914_v51  ;;  %1691 = vst [vmem:[#allocation2 + $0x210] sm:$0xff] %v1498_v44  ;;  %v476_v33 = vmul.f32 %v9468_v9, %v9233_v42  ;;  %v573_v6 = vmul.f32 %v9478_v11, %v9232_v54  ;;  %v8901_v35 = vld [vmem:[%s11330_s4 + $0x98] sm:$0xff]  ;;  %v655_v44 = vmax.f32 %v623_v2, 0.0 }
  0x65   : > { %1694 = vst [vmem:[#allocation2 + $0x228] sm:$0xff] %v1501_v32  ;;  %v11353_v55 = vshrl.u32 %v9829_v40, 16  ;;  %v11355_v41 = vshll.u32 %v9829_v40, 16  ;;  %v11352_v5 = vshrl.u32 %v9831_v15, 16  ;;  %v11354_v7 = vshll.u32 %v9831_v15, 16  ;;  %3044 = vmatpush.bf16.msrb.mxu2 %v8901_v35 }
  0x66   : > { %v686_v29 = vpack.c.bf16 %v654_v8, %v556_v58  ;;  %v508_v9 = vadd.f32 %v9473_v10, %v475_v24  ;;  %v509_v54 = vadd.f32 %v9473_v10, %v476_v33  ;;  %v574_v22 = vmul.f32 %v9478_v11, %v9233_v42 }
  0x67   : > { %v855_v31 = vrot.slane %v11353_v55, 7  ;;  %v862_v45 = vrot.slane %v11352_v5, 7  ;;  %v606_v49 = vadd.f32 %v9483_v12, %v573_v6  ;;  %v687_v53 = vpack.c.bf16 %v655_v44, %v557_v52 }
  0x68   : > { %v772_v30 = vunpack.c.l.b16 %v686_v29  ;;  %v773_v48 = vunpack.c.h.b16 %v686_v29  ;;  %1698 = vst [vmem:[#allocation2 + $0x248] sm:$0xff] %v686_v29  ;;  %v540_v58 = vmax.f32 %v508_v9, 0.0  ;;  %v541_v46 = vmax.f32 %v509_v54, 0.0 }
  0x69   : > { %v858_v10 = vor.u32 %v11355_v41, %v855_v31  ;;  %v865_v47 = vor.u32 %v11354_v7, %v862_v45  ;;  %v774_v51 = vunpack.c.l.b16 %v687_v53  ;;  %v775_v32 = vunpack.c.h.b16 %v687_v53  ;;  %1701 = vst [vmem:[#allocation2 + $0x260] sm:$0xff] %v687_v53  ;;  %v9871_v53 = vld [vmem:[%s9458_s12 + $0x20] sm:$0xff]  }
  0x6a   : > { %v607_v11 = vadd.f32 %v9483_v12, %v574_v22  ;;  %v638_v42 = vmax.f32 %v606_v49, 0.0  ;;  %v9268_v33 = vunpack.c.l.bf16 %v9853_v59  ;;  %v9269_v6 = vunpack.c.h.bf16 %v9853_v59  ;;  %v8909_v59 = vld [vmem:[%s11330_s4 + $0xd8] sm:$0xff] }
  0x6b   : > { %v7125_v52 = vld [vmem:[#allocation2 + $0x210] sm:$0xf]  ;;  %v8852_v2 = vld [vmem:[#allocation2 + $0x214] sm:$0xf]  ;;  %v1087_v8 = vsel %vm9560_vm2, 0, %v858_v10  ;;  %v1088_v24 = vsel %vm9560_vm2, 0, %v865_v47  ;;  %v9866_v22 = vpack.c.b16 %v774_v51, %v772_v30  ;;  %v9868_v49 = vpack.c.b16 %v775_v32, %v773_v48  ;;  %3133 = vmatpush.bf16.msrb.mxu3 %v8909_v59 }
  0x6c   : > { %v8855_v35 = vld [vmem:[#allocation2 + $0x224] sm:$0xf0]  ;;  %v7127_v44 = vld [vmem:[#allocation2 + $0x228] sm:$0xf0]  ;;  %v1326_v29 = vunpack.c.l.b16 %v1087_v8  ;;  %v1327_v9 = vunpack.c.l.b16 %v1088_v24  ;;  %v1330_v54 = vunpack.c.h.b16 %v1087_v8  ;;  %v1331_v12 = vunpack.c.h.b16 %v1088_v24  ;;  %v8917_v8 = vld [vmem:[%s11330_s4 + $0x118] sm:$0xff] }
  0x6d   : > { %v7126_v31 = vor.u32 %v8855_v35, %v7125_v52  ;;  %v7130_v45 = vor.u32 %v8852_v2, %v7127_v44  ;;  %v639_v13 = vmax.f32 %v607_v11, 0.0  ;;  %v670_v16 = vpack.c.bf16 %v638_v42, %v540_v58  ;;  %v8925_v30 = vld [vmem:[%s11330_s4 + $0x158] sm:$0xff]  ;;  %3222 = vmatpush.bf16.msrb.mxu0 %v8917_v8  ;;  %v9889_v2 = vld [vmem:[%s11329_s3] ss:$0 sm:$0xff] }
  0x6e   : > { %v1450_v10 = vpack.c.b16 %v1327_v9, %v1326_v29  ;;  %v1453_v47 = vpack.c.b16 %v1331_v12, %v1330_v54  ;;  %v11348_v48 = vshrl.u32 %v9866_v22, 16  ;;  %v11350_v51 = vshll.u32 %v9866_v22, 16  ;;  %3311 = vmatpush.bf16.msrb.mxu1 %v8925_v30  ;;  %v9901_v54 = vld [vmem:[%s11329_s3 + $0x1] ss:$0 sm:$0xff] }
  0x6f   : > { %2925 = vmatmul.bf16.gmra.mxu2 %v7126_v31  ;;  %3014 = vmatmul.bf16.gmra.mxu3 %v7130_v45  ;;  %v11347_v58 = vshrl.u32 %v9868_v49, 16  ;;  %v11349_v32 = vshll.u32 %v9868_v49, 16  ;;  %v671_v11 = vpack.c.bf16 %v639_v13, %v541_v46  ;;  %v740_v42 = vunpack.c.l.b16 %v670_v16  ;;  %1650 = vst [vmem:[#allocation2 + $0xc8] sm:$0xff] %v670_v16 }
  0x70   : > { %1643 = vst [vmem:[#allocation2 + $0x90] sm:$0xff] %v1450_v10  ;;  %v741_v52 = vunpack.c.h.b16 %v670_v16  ;;  %v493_v24 = vmul.f32 %v9889_v2, %v9268_v33  ;;  %v981_v35 = vrot.slane %v11348_v48, 7  ;;  %v9236_v13 = vunpack.c.l.bf16 %v9871_v53  ;;  %v9911_v16 = vld [vmem:[%s11329_s3 + $0x2] ss:$0 sm:$0xff] }
  0x71   : > { %1646 = vst [vmem:[#allocation2 + $0xa8] sm:$0xff] %v1453_v47  ;;  %v988_v44 = vrot.slane %v11347_v58, 7  ;;  %v742_v46 = vunpack.c.l.b16 %v671_v11  ;;  %v743_v29 = vunpack.c.h.b16 %v671_v11  ;;  %v494_v9 = vmul.f32 %v9889_v2, %v9269_v6 }
  0x72   : > { %v526_v12 = vadd.f32 %v9901_v54, %v493_v24  ;;  %v984_v31 = vor.u32 %v11350_v51, %v981_v35  ;;  %1653 = vst [vmem:[#allocation2 + $0xe0] sm:$0xff] %v671_v11  ;;  %v591_v10 = vmul.f32 %v9911_v16, %v9268_v33  ;;  %v592_v47 = vmul.f32 %v9911_v16, %v9269_v6 }
  0x73   : > { %v991_v45 = vor.u32 %v11349_v32, %v988_v44  ;;  %v9915_v59 = vpack.c.b16 %v742_v46, %v740_v42  ;;  %v9917_v8 = vpack.c.b16 %v743_v29, %v741_v52  ;;  %v527_v30 = vadd.f32 %v9901_v54, %v494_v9  ;;  %v9927_v44 = vld [vmem:[%s11329_s3 + $0x3] ss:$0 sm:$0xff]  ;;  %v9932_v9 = vld [vmem:[%s9458_s12 + $0x68] sm:$0xff]  }
  0x74   : > { %v558_v24 = vmax.f32 %v526_v12, 0.0  ;;  %v1105_v11 = vsel %vm9560_vm2, 0, %v984_v31  ;;  %v624_v33 = vadd.f32 %v9927_v44, %v591_v10  ;;  %v625_v6 = vadd.f32 %v9927_v44, %v592_v47 }
  0x75   : > { %v1106_v35 = vsel %vm9560_vm2, 0, %v991_v45  ;;  %v1398_v42 = vunpack.c.l.b16 %v1105_v11  ;;  %v1402_v46 = vunpack.c.h.b16 %v1105_v11  ;;  %v11358_v58 = vshrl.u32 %v9915_v59, 16 }
  0x76   : > { %v1399_v52 = vunpack.c.l.b16 %v1106_v35  ;;  %v1403_v29 = vunpack.c.h.b16 %v1106_v35  ;;  %v11360_v45 = vshll.u32 %v9915_v59, 16  ;;  %v9237_v48 = vunpack.c.h.bf16 %v9871_v53 }
  0x77   : > { %v6933_v12 = vld [vmem:[#allocation2 + $0x90] sm:$0xf]  ;;  %v8804_v31 = vld [vmem:[#allocation2 + $0x94] sm:$0xf]  ;;  %v477_v32 = vmul.f32 %v9889_v2, %v9236_v13  ;;  %v11357_v5 = vshrl.u32 %v9917_v8, 16  ;;  %v11359_v11 = vshll.u32 %v9917_v8, 16 }
  0x78   : > { %v8807_v51 = vld [vmem:[#allocation2 + $0xa4] sm:$0xf0]  ;;  %v6935_v10 = vld [vmem:[#allocation2 + $0xa8] sm:$0xf0]  ;;  %v1504_v14 = vpack.c.b16 %v1399_v52, %v1398_v42  ;;  %v1507_v47 = vpack.c.b16 %v1403_v29, %v1402_v46  ;;  %v869_v7 = vrot.slane %v11358_v58, 7  ;;  %v559_v53 = vmax.f32 %v527_v30, 0.0 }
  0x79   : > { %v6934_v35 = vor.u32 %v8807_v51, %v6933_v12  ;;  %v6938_v55 = vor.u32 %v8804_v31, %v6935_v10  ;;  %v876_v41 = vrot.slane %v11357_v5, 7  ;;  %v656_v21 = vmax.f32 %v624_v33, 0.0  ;;  %v8900_v42 = vld [vmem:[%s11330_s4 + $0x90] sm:$0xff] }
  0x7a   : > { %1697 = vst [vmem:[#allocation2 + $0x240] sm:$0xff] %v1504_v14  ;;  %v872_v51 = vor.u32 %v11360_v45, %v869_v7  ;;  %v657_v52 = vmax.f32 %v625_v6, 0.0  ;;  %v478_v46 = vmul.f32 %v9889_v2, %v9237_v48  ;;  %v9272_v14 = vunpack.c.l.bf16 %v9932_v9  ;;  %3045 = vmatpush.bf16.msrb.mxu2 %v8900_v42 }
  0x7b   : > { %2885 = vmatmul.bf16.gmra.mxu0 %v6934_v35  ;;  %2974 = vmatmul.bf16.gmra.mxu1 %v6938_v55  ;;  %1700 = vst [vmem:[#allocation2 + $0x258] sm:$0xff] %v1507_v47  ;;  %v879_v29 = vor.u32 %v11359_v11, %v876_v41  ;;  %v688_v30 = vpack.c.bf16 %v656_v21, %v558_v24 }
  0x7c   : > { %v510_v33 = vadd.f32 %v9901_v54, %v477_v32  ;;  %v575_v12 = vmul.f32 %v9911_v16, %v9236_v13  ;;  %v1089_v55 = vsel %vm9560_vm2, 0, %v872_v51  ;;  %v689_v31 = vpack.c.bf16 %v657_v52, %v559_v53 }
  0x7d   : > { %v511_v7 = vadd.f32 %v9901_v54, %v478_v46  ;;  %v576_v6 = vmul.f32 %v9911_v16, %v9237_v48  ;;  %v1090_v10 = vsel %vm9560_vm2, 0, %v879_v29  ;;  %v1334_v47 = vunpack.c.l.b16 %v1089_v55  ;;  %1704 = vst [vmem:[#allocation2 + $0x278] sm:$0xff] %v688_v30 }
  0x7e   : > { %v1338_v35 = vunpack.c.h.b16 %v1089_v55  ;;  %v776_v41 = vunpack.c.l.b16 %v688_v30  ;;  %v1335_v21 = vunpack.c.l.b16 %v1090_v10  ;;  %v1339_v24 = vunpack.c.h.b16 %v1090_v10  ;;  %1707 = vst [vmem:[#allocation2 + $0x290] sm:$0xff] %v689_v31 }
  0x7f   : > { %v777_v32 = vunpack.c.h.b16 %v688_v30  ;;  %v778_v42 = vunpack.c.l.b16 %v689_v31  ;;  %v779_v13 = vunpack.c.h.b16 %v689_v31  ;;  %v542_v5 = vmax.f32 %v510_v33, 0.0 }
  0x80   : > { %v543_v51 = vmax.f32 %v511_v7, 0.0  ;;  %v608_v53 = vadd.f32 %v9927_v44, %v575_v12  ;;  %v1456_v48 = vpack.c.b16 %v1335_v21, %v1334_v47  ;;  %v1459_v58 = vpack.c.b16 %v1339_v24, %v1338_v35  ;;  %v8916_v35 = vld [vmem:[%s11330_s4 + $0x110] sm:$0xff] }
  0x81   : > { %v7149_v52 = vld [vmem:[#allocation2 + $0x240] sm:$0xf]  ;;  %v8858_v46 = vld [vmem:[#allocation2 + $0x244] sm:$0xf]  ;;  %v9962_v11 = vpack.c.b16 %v778_v42, %v776_v41  ;;  %v609_v29 = vadd.f32 %v9927_v44, %v576_v6  ;;  %v9965_v62 = vpack.c.b16 %v779_v13, %v777_v32  ;;  %v9273_v10 = vunpack.c.h.bf16 %v9932_v9  ;;  %v8908_v6 = vld [vmem:[%s11330_s4 + $0xd0] sm:$0xff]  ;;  %3223 = vmatpush.bf16.msrb.mxu0 %v8916_v35 }
  0x82   : > { %v8861_v55 = vld [vmem:[#allocation2 + $0x254] sm:$0xf0]  ;;  %v7151_v45 = vld [vmem:[#allocation2 + $0x258] sm:$0xf0]  ;;  %v640_v30 = vmax.f32 %v608_v53, 0.0  ;;  %v495_v33 = vmul.f32 %v9889_v2, %v9272_v14  ;;  %1649 = vst [vmem:[#allocation2 + $0xc0] sm:$0xff] %v1456_v48  ;;  %3134 = vmatpush.bf16.msrb.mxu3 %v8908_v6 }
  0x83   : > { %v7150_v12 = vor.u32 %v8861_v55, %v7149_v52  ;;  %v7154_v31 = vor.u32 %v8858_v46, %v7151_v45  ;;  %v11363_v7 = vshrl.u32 %v9962_v11, 16  ;;  %v11365_v47 = vshll.u32 %v9962_v11, 16  ;;  %v8924_v41 = vld [vmem:[%s11330_s4 + $0x150] sm:$0xff]  ;;  %1652 = vst [vmem:[#allocation2 + $0xd8] sm:$0xff] %v1459_v58  ;;  %v9295_v48 = vld [vmem:[%s9458_s12 + $0x28] sm:$0xff]  }
  0x84   : > { %v11362_v45 = vshrl.u32 %v9965_v62, 16  ;;  %v11364_v21 = vshll.u32 %v9965_v62, 16  ;;  %v641_v24 = vmax.f32 %v609_v29, 0.0  ;;  %v672_v32 = vpack.c.bf16 %v640_v30, %v542_v5  ;;  %3312 = vmatpush.bf16.msrb.mxu1 %v8924_v41 }
  0x85   : > { %2930 = vmatmul.bf16.gmra.mxu2 %v7150_v12  ;;  %3019 = vmatmul.bf16.gmra.mxu3 %v7154_v31  ;;  %v995_v42 = vrot.slane %v11363_v7, 7  ;;  %v496_v13 = vmul.f32 %v9889_v2, %v9273_v10  ;;  %v528_v53 = vadd.f32 %v9901_v54, %v495_v33  ;;  %v594_v35 = vmul.f32 %v9911_v16, %v9273_v10 }
  0x86   : > { %v1002_v52 = vrot.slane %v11362_v45, 7  ;;  %v673_v58 = vpack.c.bf16 %v641_v24, %v543_v51  ;;  %v744_v46 = vunpack.c.l.b16 %v672_v32  ;;  %1656 = vst [vmem:[#allocation2 + $0xf8] sm:$0xff] %v672_v32  ;;  %v745_v29 = vunpack.c.h.b16 %v672_v32 }
  0x87   : > { %v998_v5 = vor.u32 %v11365_v47, %v995_v42  ;;  %v529_v55 = vadd.f32 %v9901_v54, %v496_v13  ;;  %v593_v51 = vmul.f32 %v9911_v16, %v9272_v14  ;;  %v560_v6 = vmax.f32 %v528_v53, 0.0 }
  0x88   : > { %v1005_v30 = vor.u32 %v11364_v21, %v1002_v52  ;;  %v746_v33 = vunpack.c.l.b16 %v673_v58  ;;  %v747_v12 = vunpack.c.h.b16 %v673_v58  ;;  %1659 = vst [vmem:[#allocation2 + $0x110] sm:$0xff] %v673_v58  ;;  %v9240_v24 = vunpack.c.l.bf16 %v9295_v48 }
  0x89   : > { %v1107_v31 = vsel %vm9560_vm2, 0, %v998_v5  ;;  %v6957_v41 = vld [vmem:[#allocation2 + $0xc0] sm:$0xf]  ;;  %v8810_v32 = vld [vmem:[#allocation2 + $0xc4] sm:$0xf]  ;;  %v626_v53 = vadd.f32 %v9927_v44, %v593_v51 }
  0x8a   : > { %v1108_v42 = vsel %vm9560_vm2, 0, %v1005_v30  ;;  %v1406_v13 = vunpack.c.l.b16 %v1107_v31  ;;  %v1410_v52 = vunpack.c.h.b16 %v1107_v31  ;;  %v10004_v45 = vpack.c.b16 %v746_v33, %v744_v46  ;;  %v8813_v58 = vld [vmem:[#allocation2 + $0xd4] sm:$0xf0]  ;;  %v6959_v9 = vld [vmem:[#allocation2 + $0xd8] sm:$0xf0] }
  0x8b   : > { %v1407_v7 = vunpack.c.l.b16 %v1108_v42  ;;  %v1411_v14 = vunpack.c.h.b16 %v1108_v42  ;;  %v10006_v21 = vpack.c.b16 %v747_v12, %v745_v29  ;;  %v6958_v5 = vor.u32 %v8813_v58, %v6957_v41 }
  0x8c   : > { %v6962_v10 = vor.u32 %v8810_v32, %v6959_v9  ;;  %v11369_v47 = vshrl.u32 %v10004_v45, 16  ;;  %v11371_v61 = vshll.u32 %v10004_v45, 16  ;;  %v561_v33 = vmax.f32 %v529_v55, 0.0 }
  0x8d   : > { %v1510_v17 = vpack.c.b16 %v1407_v7, %v1406_v13  ;;  %v1513_v30 = vpack.c.b16 %v1411_v14, %v1410_v52  ;;  %v11368_v31 = vshrl.u32 %v10006_v21, 16  ;;  %v11370_v46 = vshll.u32 %v10006_v21, 16  ;;  %2890 = vmatmul.bf16.gmra.mxu0 %v6958_v5  ;;  %v8899_v7 = vld [vmem:[%s11330_s4 + $0x88] sm:$0xff] }
  0x8e   : > { %2979 = vmatmul.bf16.gmra.mxu1 %v6962_v10  ;;  %v883_v29 = vrot.slane %v11369_v47, 7  ;;  %v627_v12 = vadd.f32 %v9927_v44, %v594_v35  ;;  %v658_v51 = vmax.f32 %v626_v53, 0.0  ;;  %v9241_v32 = vunpack.c.h.bf16 %v9295_v48  ;;  %3046 = vmatpush.bf16.msrb.mxu2 %v8899_v7 }
  0x8f   : > { %1703 = vst [vmem:[#allocation2 + $0x270] sm:$0xff] %v1510_v17  ;;  %v890_v41 = vrot.slane %v11368_v31, 7  ;;  %v479_v42 = vmul.f32 %v9889_v2, %v9240_v24  ;;  %v577_v35 = vmul.f32 %v9911_v16, %v9240_v24 }
  0x90   : > { %1706 = vst [vmem:[#allocation2 + $0x288] sm:$0xff] %v1513_v30  ;;  %v886_v13 = vor.u32 %v11371_v61, %v883_v29  ;;  %v659_v52 = vmax.f32 %v627_v12, 0.0  ;;  %v690_v55 = vpack.c.bf16 %v658_v51, %v560_v6  ;;  %v480_v58 = vmul.f32 %v9889_v2, %v9241_v32 }
  0x91   : > { %v893_v17 = vor.u32 %v11370_v46, %v890_v41  ;;  %v512_v9 = vadd.f32 %v9901_v54, %v479_v42  ;;  %v578_v48 = vmul.f32 %v9911_v16, %v9241_v32  ;;  %v9304_v32 = vld [vmem:[%s9458_s12 + $0x70] sm:$0xff]  }
  0x92   : > { %v1091_v14 = vsel %vm9560_vm2, 0, %v886_v13  ;;  %v691_v53 = vpack.c.bf16 %v659_v52, %v561_v33  ;;  %v780_v5 = vunpack.c.l.b16 %v690_v55  ;;  %v781_v10 = vunpack.c.h.b16 %v690_v55  ;;  %1710 = vst [vmem:[#allocation2 + $0x2a8] sm:$0xff] %v690_v55 }
  0x93   : > { %v1092_v6 = vsel %vm9560_vm2, 0, %v893_v17  ;;  %v1342_v24 = vunpack.c.l.b16 %v1091_v14  ;;  %v1346_v30 = vunpack.c.h.b16 %v1091_v14  ;;  %v513_v29 = vadd.f32 %v9901_v54, %v480_v58 }
  0x94   : > { %v1343_v12 = vunpack.c.l.b16 %v1092_v6  ;;  %v1347_v51 = vunpack.c.h.b16 %v1092_v6  ;;  %v782_v41 = vunpack.c.l.b16 %v691_v53  ;;  %v783_v7 = vunpack.c.h.b16 %v691_v53  ;;  %1713 = vst [vmem:[#allocation2 + $0x2c0] sm:$0xff] %v691_v53 }
  0x95   : > { %v544_v42 = vmax.f32 %v512_v9, 0.0  ;;  %v545_v31 = vmax.f32 %v513_v29, 0.0  ;;  %v610_v33 = vadd.f32 %v9927_v44, %v577_v35  ;;  %v611_v13 = vadd.f32 %v9927_v44, %v578_v48 }
  0x96   : > { %v7173_v52 = vld [vmem:[#allocation2 + $0x270] sm:$0xf]  ;;  %v8864_v55 = vld [vmem:[#allocation2 + $0x274] sm:$0xf]  ;;  %v1462_v47 = vpack.c.b16 %v1343_v12, %v1342_v24  ;;  %v1465_v17 = vpack.c.b16 %v1347_v51, %v1346_v30  ;;  %v10038_v46 = vpack.c.b16 %v782_v41, %v780_v5  ;;  %v10040_v14 = vpack.c.b16 %v783_v7, %v781_v10  ;;  %v8907_v5 = vld [vmem:[%s11330_s4 + $0xc8] sm:$0xff] }
  0x97   : > { %v8867_v58 = vld [vmem:[#allocation2 + $0x284] sm:$0xf0]  ;;  %v7175_v6 = vld [vmem:[#allocation2 + $0x288] sm:$0xf0]  ;;  %v642_v61 = vmax.f32 %v610_v33, 0.0  ;;  %v643_v19 = vmax.f32 %v611_v13, 0.0  ;;  %v9276_v53 = vunpack.c.l.bf16 %v9304_v32  ;;  %v9277_v57 = vunpack.c.h.bf16 %v9304_v32  ;;  %3135 = vmatpush.bf16.msrb.mxu3 %v8907_v5 }
  0x98   : > { %v7174_v9 = vor.u32 %v8867_v58, %v7173_v52  ;;  %v7178_v29 = vor.u32 %v8864_v55, %v7175_v6  ;;  %1655 = vst [vmem:[#allocation2 + $0xf0] sm:$0xff] %v1462_v47  ;;  %v11375_v35 = vshrl.u32 %v10038_v46, 16  ;;  %v11377_v48 = vshll.u32 %v10038_v46, 16  ;;  %v8915_v10 = vld [vmem:[%s11330_s4 + $0x108] sm:$0xff] }
  0x99   : > { %v8923_v24 = vld [vmem:[%s11330_s4 + $0x148] sm:$0xff]  ;;  %1658 = vst [vmem:[#allocation2 + $0x108] sm:$0xff] %v1465_v17  ;;  %v11374_v30 = vshrl.u32 %v10040_v14, 16  ;;  %v11376_v47 = vshll.u32 %v10040_v14, 16  ;;  %v674_v12 = vpack.c.bf16 %v642_v61, %v544_v42  ;;  %v675_v51 = vpack.c.bf16 %v643_v19, %v545_v31  ;;  %3224 = vmatpush.bf16.msrb.mxu0 %v8915_v10 }
  0x9a   : > { %2935 = vmatmul.bf16.gmra.mxu2 %v7174_v9  ;;  %3024 = vmatmul.bf16.gmra.mxu3 %v7178_v29  ;;  %v1009_v41 = vrot.slane %v11375_v35, 7  ;;  %v497_v7 = vmul.f32 %v9889_v2, %v9276_v53  ;;  %v498_v32 = vmul.f32 %v9889_v2, %v9277_v57  ;;  %v595_v29 = vmul.f32 %v9911_v16, %v9276_v53  ;;  %v9296_v35 = vld [vmem:[%s9458_s12 + $0x30] sm:$0xff]  }
  0x9b   : > { %v1016_v33 = vrot.slane %v11374_v30, 7  ;;  %v748_v13 = vunpack.c.l.b16 %v674_v12  ;;  %v749_v52 = vunpack.c.h.b16 %v674_v12  ;;  %1662 = vst [vmem:[#allocation2 + $0x128] sm:$0xff] %v674_v12  ;;  %v750_v61 = vunpack.c.l.b16 %v675_v51  ;;  %3313 = vmatpush.bf16.msrb.mxu1 %v8923_v24 }
  0x9c   : > { %v1012_v19 = vor.u32 %v11377_v48, %v1009_v41  ;;  %v751_v31 = vunpack.c.h.b16 %v675_v51  ;;  %1665 = vst [vmem:[#allocation2 + $0x140] sm:$0xff] %v675_v51  ;;  %v530_v55 = vadd.f32 %v9901_v54, %v497_v7  ;;  %v531_v17 = vadd.f32 %v9901_v54, %v498_v32 }
  0x9d   : > { %v1019_v42 = vor.u32 %v11376_v47, %v1016_v33  ;;  %v10069_v6 = vpack.c.b16 %v750_v61, %v748_v13  ;;  %v596_v41 = vmul.f32 %v9911_v16, %v9277_v57 }
  0x9e   : > { %v1109_v58 = vsel %vm9560_vm2, 0, %v1012_v19  ;;  %v10071_v9 = vpack.c.b16 %v751_v31, %v749_v52 }
  0x9f   : > { %v6981_v5 = vld [vmem:[#allocation2 + $0xf0] sm:$0xf]  ;;  %v8816_v10 = vld [vmem:[#allocation2 + $0xf4] sm:$0xf]  ;;  %v1110_v24 = vsel %vm9560_vm2, 0, %v1019_v42  ;;  %v1414_v12 = vunpack.c.l.b16 %v1109_v58  ;;  %v1418_v51 = vunpack.c.h.b16 %v1109_v58  ;;  %v11379_v13 = vshrl.u32 %v10069_v6, 16 }
  0xa0   : > { %v8819_v7 = vld [vmem:[#allocation2 + $0x104] sm:$0xf0]  ;;  %v6983_v32 = vld [vmem:[#allocation2 + $0x108] sm:$0xf0]  ;;  %v1415_v33 = vunpack.c.l.b16 %v1110_v24  ;;  %v1419_v19 = vunpack.c.h.b16 %v1110_v24  ;;  %v11381_v52 = vshll.u32 %v10069_v6, 16  ;;  %v11378_v31 = vshrl.u32 %v10071_v9, 16 }
  0xa1   : > { %v6982_v61 = vor.u32 %v8819_v7, %v6981_v5  ;;  %v6986_v53 = vor.u32 %v8816_v10, %v6983_v32  ;;  %v11380_v30 = vshll.u32 %v10071_v9, 16  ;;  %v1776_v42 = vrot.slane %v1762_v37, 1 }
  0xa2   : > { %v1516_v58 = vpack.c.b16 %v1415_v33, %v1414_v12  ;;  %v1519_v57 = vpack.c.b16 %v1419_v19, %v1418_v51  ;;  %v897_v47 = vrot.slane %v11379_v13, 7  ;;  %v904_v24 = vrot.slane %v11378_v31, 7  ;;  %v8898_v12 = vld [vmem:[%s11330_s4 + $0x80] sm:$0xff] }
  0xa3   : > { %2895 = vmatmul.bf16.gmra.mxu0 %v6982_v61  ;;  %2984 = vmatmul.bf16.gmra.mxu1 %v6986_v53  ;;  %v562_v5 = vmax.f32 %v530_v55, 0.0  ;;  %v628_v10 = vadd.f32 %v9927_v44, %v595_v29  ;;  %v629_v7 = vadd.f32 %v9927_v44, %v596_v41  ;;  %v563_v37 = vmax.f32 %v531_v17, 0.0 }
  0xa4   : > { %1709 = vst [vmem:[#allocation2 + $0x2a0] sm:$0xff] %v1516_v58  ;;  %v900_v32 = vor.u32 %v11381_v52, %v897_v47  ;;  %v9244_v51 = vunpack.c.l.bf16 %v9296_v35  ;;  %v9245_v33 = vunpack.c.h.bf16 %v9296_v35  ;;  %v1778_v19 = vrot.slane %v1769_v39, 1  ;;  %3047 = vmatpush.bf16.msrb.mxu2 %v8898_v12 }
  0xa5   : > { %1712 = vst [vmem:[#allocation2 + $0x2b8] sm:$0xff] %v1519_v57  ;;  %v907_v55 = vor.u32 %v11380_v30, %v904_v24  ;;  %v660_v29 = vmax.f32 %v628_v10, 0.0  ;;  %v661_v41 = vmax.f32 %v629_v7, 0.0 }
  0xa6   : > { %v1093_v61 = vsel %vm9560_vm2, 0, %v900_v32  ;;  %v481_v47 = vmul.f32 %v9889_v2, %v9244_v51  ;;  %v482_v17 = vmul.f32 %v9889_v2, %v9245_v33  ;;  %v579_v53 = vmul.f32 %v9911_v16, %v9244_v51 }
  0xa7   : > { %v1094_v35 = vsel %vm9560_vm2, 0, %v907_v55  ;;  %v1350_v39 = vunpack.c.l.b16 %v1093_v61  ;;  %v1354_v58 = vunpack.c.h.b16 %v1093_v61  ;;  %v692_v57 = vpack.c.bf16 %v660_v29, %v562_v5 }
  0xa8   : > { %v1351_v48 = vunpack.c.l.b16 %v1094_v35  ;;  %v1355_v24 = vunpack.c.h.b16 %v1094_v35  ;;  %v693_v10 = vpack.c.bf16 %v661_v41, %v563_v37  ;;  %v514_v7 = vadd.f32 %v9901_v54, %v481_v47 }
  0xa9   : > { %v784_v31 = vunpack.c.l.b16 %v692_v57  ;;  %v785_v32 = vunpack.c.h.b16 %v692_v57  ;;  %1716 = vst [vmem:[#allocation2 + $0x2d8] sm:$0xff] %v692_v57  ;;  %v515_v12 = vadd.f32 %v9901_v54, %v482_v17  ;;  %v580_v2 = vmul.f32 %v9911_v16, %v9245_v33 }
  0xaa   : > { %v1468_v13 = vpack.c.b16 %v1351_v48, %v1350_v39  ;;  %v1471_v51 = vpack.c.b16 %v1355_v24, %v1354_v58  ;;  %v786_v30 = vunpack.c.l.b16 %v693_v10  ;;  %v787_v52 = vunpack.c.h.b16 %v693_v10  ;;  %1719 = vst [vmem:[#allocation2 + $0x2f0] sm:$0xff] %v693_v10 }
  0xab   : > { %v7197_v55 = vld [vmem:[#allocation2 + $0x2a0] sm:$0xf]  ;;  %v8870_v61 = vld [vmem:[#allocation2 + $0x2a4] sm:$0xf]  ;;  %v546_v5 = vmax.f32 %v514_v7, 0.0  ;;  %v547_v29 = vmax.f32 %v515_v12, 0.0  ;;  %v612_v37 = vadd.f32 %v9927_v44, %v579_v53  ;;  %v613_v41 = vadd.f32 %v9927_v44, %v580_v2 }
  0xac   : > { %v8873_v47 = vld [vmem:[#allocation2 + $0x2b4] sm:$0xf0]  ;;  %v7199_v35 = vld [vmem:[#allocation2 + $0x2b8] sm:$0xf0]  ;;  %1661 = vst [vmem:[#allocation2 + $0x120] sm:$0xff] %v1468_v13  ;;  %v10111_v57 = vpack.c.b16 %v786_v30, %v784_v31  ;;  %v10113_v54 = vpack.c.b16 %v787_v52, %v785_v32  ;;  %v1777_v16 = vor.u32 %v1776_v42, %v1759_v36  ;;  %v8906_v44 = vld [vmem:[%s11330_s4 + $0xc0] sm:$0xff]  ;;  %v1779_v58 = vor.u32 %v1778_v19, %v1766_v38 }
  0xad   : > { %v7198_v48 = vor.u32 %v8873_v47, %v7197_v55  ;;  %v7202_v33 = vor.u32 %v8870_v61, %v7199_v35  ;;  %1664 = vst [vmem:[#allocation2 + $0x138] sm:$0xff] %v1471_v51  ;;  %v644_v17 = vmax.f32 %v612_v37, 0.0  ;;  %v645_v39 = vmax.f32 %v613_v41, 0.0  ;;  %v8914_v30 = vld [vmem:[%s11330_s4 + $0x100] sm:$0xff]  ;;  %3136 = vmatpush.bf16.msrb.mxu3 %v8906_v44 }
  0xae   : > { %v8922_v13 = vld [vmem:[%s11330_s4 + $0x140] sm:$0xff]  ;;  %v11383_v26 = vshrl.u32 %v10111_v57, 16  ;;  %v11385_v36 = vshll.u32 %v10111_v57, 16  ;;  %v11382_v52 = vshrl.u32 %v10113_v54, 16  ;;  %v11384_v31 = vshll.u32 %v10113_v54, 16  ;;  %3225 = vmatpush.bf16.msrb.mxu0 %v8914_v30 }
  0xaf   : > { %2940 = vmatmul.bf16.gmra.mxu2 %v7198_v48  ;;  %3029 = vmatmul.bf16.gmra.mxu3 %v7202_v33  ;;  %v676_v42 = vpack.c.bf16 %v644_v17, %v546_v5  ;;  %v677_v53 = vpack.c.bf16 %v645_v39, %v547_v29  ;;  %v1782_v19 = vsel %vm10137_vm5, %v1777_v16, 0  ;;  %v1783_v37 = vsel %vm10137_vm5, %v1779_v58, 0 }
  0xb0   : > { %v1023_v24 = vrot.slane %v11383_v26, 7  ;;  %v1030_v10 = vrot.slane %v11382_v52, 7  ;;  %3314 = vmatpush.bf16.msrb.mxu1 %v8922_v13  ;;  %v1790_v41 = vunpack.c.l.b16 %v1782_v19  ;;  %v1791_v17 = vunpack.c.l.b16 %v1783_v37 }
  0xb1   : > { %v752_v32 = vunpack.c.l.b16 %v676_v42  ;;  %v753_v12 = vunpack.c.h.b16 %v676_v42  ;;  %v754_v2 = vunpack.c.l.b16 %v677_v53  ;;  %v755_v51 = vunpack.c.h.b16 %v677_v53  ;;  %1668 = vst [vmem:[#allocation2 + $0x158] sm:$0xff] %v676_v42  ;;  %v9033_v42 = vld [vmem:[%s11330_s4 + $0x1b8] sm:$0xff] }
  0xb2   : > { %v1026_v27 = vor.u32 %v11385_v36, %v1023_v24  ;;  %v1033_v38 = vor.u32 %v11384_v31, %v1030_v10  ;;  %1671 = vst [vmem:[#allocation2 + $0x170] sm:$0xff] %v677_v53  ;;  %v1794_v16 = vunpack.c.h.b16 %v1782_v19  ;;  %4389 = vmatpush.bf16.msra.mxu2 %v9033_v42 }
  0xb3   : > { %v7005_v55 = vld [vmem:[#allocation2 + $0x120] sm:$0xf]  ;;  %v8822_v61 = vld [vmem:[#allocation2 + $0x124] sm:$0xf]  ;;  %v10147_v5 = vpack.c.b16 %v754_v2, %v752_v32  ;;  %v10149_v29 = vpack.c.b16 %v755_v51, %v753_v12 }
  0xb4   : > { %v8825_v47 = vld [vmem:[#allocation2 + $0x134] sm:$0xf0]  ;;  %v7007_v35 = vld [vmem:[#allocation2 + $0x138] sm:$0xf0]  ;;  %v1111_v48 = vsel %vm9560_vm2, 0, %v1026_v27  ;;  %v1112_v33 = vsel %vm9560_vm2, 0, %v1033_v38 }
  0xb5   : > { %v7006_v39 = vor.u32 %v8825_v47, %v7005_v55  ;;  %v7010_v44 = vor.u32 %v8822_v61, %v7007_v35  ;;  %v1422_v30 = vunpack.c.l.b16 %v1111_v48  ;;  %v1423_v13 = vunpack.c.l.b16 %v1112_v33 }
  0xb6   : > { %v1426_v53 = vunpack.c.h.b16 %v1111_v48  ;;  %v1427_v58 = vunpack.c.h.b16 %v1112_v33  ;;  %v11387_v24 = vshrl.u32 %v10147_v5, 16  ;;  %v11389_v10 = vshll.u32 %v10147_v5, 16 }
  0xb7   : > { %2900 = vmatmul.bf16.gmra.mxu0 %v7006_v39  ;;  %2989 = vmatmul.bf16.gmra.mxu1 %v7010_v44  ;;  %v1522_v32 = vpack.c.b16 %v1423_v13, %v1422_v30  ;;  %v11386_v12 = vshrl.u32 %v10149_v29, 16  ;;  %v11388_v2 = vshll.u32 %v10149_v29, 16  ;;  %v1795_v55 = vunpack.c.h.b16 %v1783_v37 }
  0xb8   : > { %v1525_v51 = vpack.c.b16 %v1427_v58, %v1426_v53  ;;  %v911_v27 = vrot.slane %v11387_v24, 7  ;;  %v1798_v35 = vpack.c.b16 %v1791_v17, %v1790_v41  ;;  %v1115_v39 = vrot.slane %v828_v18, 1 }
  0xb9   : > { %1715 = vst [vmem:[#allocation2 + $0x2d0] sm:$0xff] %v1522_v32  ;;  %v918_v61 = vrot.slane %v11386_v12, 7  ;;  %v1801_v33 = vpack.c.b16 %v1795_v55, %v1794_v16  ;;  %v1117_v44 = vrot.slane %v835_v20, 1  ;;  %v11405_v41 = vshrl.u32 %v9682_v60, 16  ;;  %v9041_v20 = vld [vmem:[%s11330_s4 + $0x1f8] sm:$0xff] }
  0xba   : > { %v2871_v38 = vpop.f32.mrf.mxu0  ;;  %v2960_v19 = vpop.f32.mrf.mxu1  ;;  %1718 = vst [vmem:[#allocation2 + $0x2e8] sm:$0xff] %v1525_v51  ;;  %v914_v48 = vor.u32 %v11389_v10, %v911_v27  ;;  %v11406_v13 = vshrl.u32 %v9684_v1, 16  ;;  %v9049_v51 = vld [vmem:[%s11330_s4 + $0x238] sm:$0xff]  ;;  %4478 = vmatpush.bf16.msra.mxu3 %v9041_v20 }
  0xbb   : > { %v10168_v47 = vadd.f32 %v2960_v19, %v2871_v38  ;;  %v921_v37 = vor.u32 %v11388_v2, %v918_v61  ;;  %1810 = vst [vmem:[#allocation2 + $0x10] sm:$0xff] %v1798_v35  ;;  %v1116_v17 = vor.u32 %v1115_v39, %v11405_v41  ;;  %v2911_v58 = vpop.f32.mrf.mxu2  ;;  %v3000_v32 = vpop.f32.mrf.mxu3  ;;  %v9057_v60 = vld [vmem:[%s11330_s4 + $0x278] sm:$0xff]  ;;  %4567 = vmatpush.bf16.msra.mxu0 %v9049_v51 }
  0xbc   : > { %v1095_v30 = vsel %vm9560_vm2, 0, %v914_v48  ;;  %1813 = vst [vmem:[#allocation2 + $0x28] sm:$0xff] %v1801_v33  ;;  %v1118_v16 = vor.u32 %v1117_v44, %v11406_v13  ;;  %v10195_v38 = vadd.f32 %v3000_v32, %v2911_v58  ;;  %4656 = vmatpush.bf16.msra.mxu1 %v9057_v60 }
  0xbd   : > { %v1096_v18 = vsel %vm9560_vm2, 0, %v921_v37  ;;  %v1358_v42 = vunpack.c.l.b16 %v1095_v30  ;;  %v1362_v53 = vunpack.c.h.b16 %v1095_v30  ;;  %v1214_v19 = vsel %vm10137_vm5, %v1116_v17, 0 }
  0xbe   : > { %v1359_v1 = vunpack.c.l.b16 %v1096_v18  ;;  %v1363_v27 = vunpack.c.h.b16 %v1096_v18  ;;  %v1215_v55 = vsel %vm10137_vm5, %v1118_v16, 0  ;;  %v1312_v61 = vunpack.c.l.b16 %v1214_v19 }
  0xbf   : > { %v1316_v35 = vunpack.c.h.b16 %v1214_v19  ;;  %v1313_v37 = vunpack.c.l.b16 %v1215_v55  ;;  %v1317_v30 = vunpack.c.h.b16 %v1215_v55  ;;  %v11407_v19 = vshll.u32 %v9747_v3, 16 }
  0xc0   : > { %v7221_v48 = vld [vmem:[#allocation2 + $0x2d0] sm:$0xf]  ;;  %v8876_v33 = vld [vmem:[#allocation2 + $0x2d4] sm:$0xf]  ;;  %v1474_v39 = vpack.c.b16 %v1359_v1, %v1358_v42  ;;  %v1477_v44 = vpack.c.b16 %v1363_v27, %v1362_v53 }
  0xc1   : > { %v8879_v41 = vld [vmem:[#allocation2 + $0x2e4] sm:$0xf0]  ;;  %v7223_v13 = vld [vmem:[#allocation2 + $0x2e8] sm:$0xf0]  ;;  %v1440_v17 = vpack.c.b16 %v1313_v37, %v1312_v61  ;;  %v1443_v20 = vpack.c.b16 %v1317_v30, %v1316_v35  ;;  %v1119_v55 = vrot.slane %v11407_v19, 1  ;;  %v11408_v61 = vshll.u32 %v9749_v50, 16 }
  0xc2   : > { %v7222_v18 = vor.u32 %v8879_v41, %v7221_v48  ;;  %v7226_v58 = vor.u32 %v8876_v33, %v7223_v13  ;;  %1667 = vst [vmem:[#allocation2 + $0x150] sm:$0xff] %v1474_v39  ;;  %v10205_v42 = vpop.f32.mrf.mxu0  ;;  %v10207_v53 = vpop.f32.mrf.mxu1  ;;  %v6869_v39 = vld [vmem:[#allocation2 + $0x8] sm:$0xf]  ;;  %v11410_v30 = vshrl.u32 %v9749_v50, 16  ;;  %v8790_v13 = vld [vmem:[#allocation2 + $0x1c] sm:$0xf0] }
  0xc3   : > { %1670 = vst [vmem:[#allocation2 + $0x168] sm:$0xff] %v1477_v44  ;;  %v10201_v16 = vpop.f32.mrf.mxu2  ;;  %v10203_v32 = vpop.f32.mrf.mxu3  ;;  %v1121_v35 = vrot.slane %v11408_v61, 1  ;;  %v11409_v44 = vshrl.u32 %v9747_v3, 16 }
  0xc4   : > { %2945 = vmatmul.bf16.gmra.mxu2 %v7222_v18  ;;  %3034 = vmatmul.bf16.gmra.mxu3 %v7226_v58  ;;  %1633 = vst [vmem:[#allocation2 + $0x40] sm:$0xff] %v1440_v17  ;;  %v8787_v18 = vld [vmem:[#allocation2 + $0xc] sm:$0xf]  ;;  %v6871_v58 = vld [vmem:[#allocation2 + $0x20] sm:$0xf0] }
  0xc5   : > { %1636 = vst [vmem:[#allocation2 + $0x58] sm:$0xff] %v1443_v20  ;;  %v1120_v37 = vor.u32 %v1119_v55, %v11409_v44  ;;  %v1122_v41 = vor.u32 %v1121_v35, %v11410_v30  ;;  %v6870_v55 = vor.u32 %v8790_v13, %v6869_v39  ;;  %v6874_v61 = vor.u32 %v8787_v18, %v6871_v58  ;;  %v8791_v39 = vld [vmem:[#allocation2 + $0x24] sm:$0xf0]  ;;  %v8788_v13 = vld [vmem:[#allocation2 + $0x14] sm:$0xf] }
  0xc6   : > { %v6879_v18 = vld [vmem:[#allocation2 + $0x28] sm:$0xf0] }
  0xc9   : > { %v7029_v51 = vld [vmem:[#allocation2 + $0x150] sm:$0xf]  ;;  %v8828_v60 = vld [vmem:[#allocation2 + $0x154] sm:$0xf] }
  0xca   : > { %v8831_v1 = vld [vmem:[#allocation2 + $0x164] sm:$0xf0]  ;;  %v7031_v27 = vld [vmem:[#allocation2 + $0x168] sm:$0xf0] }
  0xcb   : > { %v7030_v48 = vor.u32 %v8831_v1, %v7029_v51  ;;  %v7034_v33 = vor.u32 %v8828_v60, %v7031_v27  ;;  %v2916_v17 = vpop.f32.mrf.mxu2  ;;  %v3005_v20 = vpop.f32.mrf.mxu3  ;;  %v1216_v51 = vsel %vm10137_vm5, %v1120_v37, 0  ;;  %v1217_v60 = vsel %vm10137_vm5, %v1122_v41, 0  ;;  %v9032_v37 = vld [vmem:[%s11330_s4 + $0x1b0] sm:$0xff] }
  0xcc   : > { %v10217_v19 = vadd.f32 %v3005_v20, %v2916_v17  ;;  %v1320_v3 = vunpack.c.l.b16 %v1216_v51  ;;  %v1321_v1 = vunpack.c.l.b16 %v1217_v60  ;;  %v1324_v27 = vunpack.c.h.b16 %v1216_v51  ;;  %v6877_v41 = vld [vmem:[#allocation2 + $0x10] sm:$0xf]  ;;  %4390 = vmatpush.bf16.msra.mxu2 %v9032_v37 }
  0xcd   : > { %2905 = vmatmul.bf16.gmra.mxu0 %v7030_v48  ;;  %2994 = vmatmul.bf16.gmra.mxu1 %v7034_v33  ;;  %v1325_v50 = vunpack.c.h.b16 %v1217_v60  ;;  %v6878_v58 = vor.u32 %v8791_v39, %v6877_v41  ;;  %v6882_v51 = vor.u32 %v8788_v13, %v6879_v18  ;;  %v11414_v37 = vshrl.u32 %v9831_v15, 16  ;;  %v9040_v39 = vld [vmem:[%s11330_s4 + $0x1f0] sm:$0xff] }
  0xce   : > { %v1446_v33 = vpack.c.b16 %v1321_v1, %v1320_v3  ;;  %v11411_v1 = vshll.u32 %v9829_v40, 16  ;;  %v9048_v13 = vld [vmem:[%s11330_s4 + $0x230] sm:$0xff]  ;;  %4479 = vmatpush.bf16.msra.mxu3 %v9040_v39  ;;  %v8797_v39 = vld [vmem:[#allocation2 + $0x54] sm:$0xf0] }
  0xcf   : > { %v1449_v44 = vpack.c.b16 %v1325_v50, %v1324_v27  ;;  %v11412_v50 = vshll.u32 %v9831_v15, 16  ;;  %v9056_v18 = vld [vmem:[%s11330_s4 + $0x270] sm:$0xff]  ;;  %4568 = vmatpush.bf16.msra.mxu0 %v9048_v13  ;;  %v8794_v13 = vld [vmem:[#allocation2 + $0x44] sm:$0xf] }
  0xd0   : > { %1639 = vst [vmem:[#allocation2 + $0x70] sm:$0xff] %v1446_v33  ;;  %v1123_v27 = vrot.slane %v11411_v1, 1  ;;  %v6895_v33 = vld [vmem:[#allocation2 + $0x50] sm:$0xf0]  ;;  %4657 = vmatpush.bf16.msra.mxu1 %v9056_v18 }
  0xd1   : > { %v2876_v35 = vpop.f32.mrf.mxu0  ;;  %v2965_v48 = vpop.f32.mrf.mxu1  ;;  %1642 = vst [vmem:[#allocation2 + $0x88] sm:$0xff] %v1449_v44  ;;  %v11413_v44 = vshrl.u32 %v9829_v40, 16 }
  0xd2   : > { %v10223_v30 = vadd.f32 %v2965_v48, %v2876_v35  ;;  %v8796_v35 = vld [vmem:[#allocation2 + $0x4c] sm:$0xf0]  ;;  %v8793_v48 = vld [vmem:[#allocation2 + $0x3c] sm:$0xf] }
  0xd3   : > { %v10228_v17 = vpop.f32.mrf.mxu2  ;;  %v10230_v20 = vpop.f32.mrf.mxu3  ;;  %v1124_v52 = vor.u32 %v1123_v27, %v11413_v44  ;;  %v6898_v44 = vor.u32 %v8793_v48, %v6895_v33  ;;  %v11416_v48 = vshll.u32 %v9917_v8, 16 }
  0xd4   : > { %3048 = vmatmul.bf16.vlgmr.msrb.gmra.mxu2 %v6870_v55  ;;  %3137 = vmatmul.bf16.vlgmr.msrb.gmra.mxu3 %v6874_v61  ;;  %v1125_v55 = vrot.slane %v11412_v50, 1  ;;  %v6893_v61 = vld [vmem:[#allocation2 + $0x38] sm:$0xf] }
  0xd5   : > { %v1218_v40 = vsel %vm10137_vm5, %v1124_v52, 0  ;;  %v1129_v33 = vrot.slane %v11416_v48, 1 }
  0xd6   : > { %v1126_v41 = vor.u32 %v1125_v55, %v11414_v37  ;;  %v1328_v1 = vunpack.c.l.b16 %v1218_v40  ;;  %v1332_v50 = vunpack.c.h.b16 %v1218_v40  ;;  %v6894_v55 = vor.u32 %v8796_v35, %v6893_v61  ;;  %v6903_v40 = vld [vmem:[#allocation2 + $0x58] sm:$0xf0] }
  0xd7   : > { %v11415_v61 = vshll.u32 %v9915_v59, 16 }
  0xd8   : > { %v1219_v15 = vsel %vm10137_vm5, %v1126_v41, 0  ;;  %v6901_v41 = vld [vmem:[#allocation2 + $0x40] sm:$0xf] }
  0xd9   : > { %v10232_v60 = vpop.f32.mrf.mxu0  ;;  %v10234_v3 = vpop.f32.mrf.mxu1  ;;  %v1329_v27 = vunpack.c.l.b16 %v1219_v15  ;;  %v1333_v26 = vunpack.c.h.b16 %v1219_v15  ;;  %v1127_v35 = vrot.slane %v11415_v61, 1 }
  0xdb   : > { %v1452_v12 = vpack.c.b16 %v1329_v27, %v1328_v1  ;;  %v1455_v24 = vpack.c.b16 %v1333_v26, %v1332_v50  ;;  %v6906_v26 = vor.u32 %v8794_v13, %v6903_v40  ;;  %v8802_v1 = vld [vmem:[#allocation2 + $0x7c] sm:$0xf0]  ;;  %v8799_v27 = vld [vmem:[#allocation2 + $0x6c] sm:$0xf]  ;;  %v6919_v50 = vld [vmem:[#allocation2 + $0x80] sm:$0xf0] }
  0xdd   : > { %3226 = vmatmul.bf16.vlgmr.msrb.gmra.mxu0 %v6878_v58  ;;  %3315 = vmatmul.bf16.vlgmr.msrb.gmra.mxu1 %v6882_v51  ;;  %1645 = vst [vmem:[#allocation2 + $0xa0] sm:$0xff] %v1452_v12  ;;  %v11418_v12 = vshrl.u32 %v9915_v59, 16 }
  0xde   : > { %1648 = vst [vmem:[#allocation2 + $0xb8] sm:$0xff] %v1455_v24 }
  0xdf   : > { %v2921_v58 = vpop.f32.mrf.mxu2  ;;  %v3010_v51 = vpop.f32.mrf.mxu3  ;;  %v1128_v24 = vor.u32 %v1127_v35, %v11418_v12  ;;  %v6922_v35 = vor.u32 %v8799_v27, %v6919_v50  ;;  %v11422_v27 = vshll.u32 %v10006_v21, 16 }
  0xe0   : > { %v10257_v37 = vadd.f32 %v3010_v51, %v2921_v58  ;;  %v11419_v58 = vshrl.u32 %v9917_v8, 16 }
  0xe1   : > { %v2881_v31 = vpop.f32.mrf.mxu0  ;;  %v2970_v36 = vpop.f32.mrf.mxu1  ;;  %v1133_v50 = vrot.slane %v11422_v27, 1 }
  0xe2   : > { %v10259_v52 = vadd.f32 %v2970_v36, %v2881_v31  ;;  %v6902_v36 = vor.u32 %v8797_v39, %v6901_v41  ;;  %v6917_v31 = vld [vmem:[#allocation2 + $0x68] sm:$0xf]  ;;  %v1130_v51 = vor.u32 %v1129_v33, %v11419_v58  ;;  %v1220_v41 = vsel %vm10137_vm5, %v1128_v24, 0  ;;  %v6925_v58 = vld [vmem:[#allocation2 + $0x70] sm:$0xf] }
  0xe3   : > { %v1336_v59 = vunpack.c.l.b16 %v1220_v41  ;;  %v1340_v40 = vunpack.c.h.b16 %v1220_v41  ;;  %v6918_v61 = vor.u32 %v8802_v1, %v6917_v31  ;;  %v9031_v24 = vld [vmem:[%s11330_s4 + $0x1a8] sm:$0xff]  ;;  %v8800_v41 = vld [vmem:[#allocation2 + $0x74] sm:$0xf]  ;;  %v11421_v31 = vshll.u32 %v10004_v45, 16 }
  0xe4   : > { %3053 = vmatmul.bf16.gmra.mxu2 %v6894_v55  ;;  %3142 = vmatmul.bf16.gmra.mxu3 %v6898_v44  ;;  %v1221_v39 = vsel %vm10137_vm5, %v1130_v51, 0  ;;  %v8803_v51 = vld [vmem:[#allocation2 + $0x84] sm:$0xf0] }
  0xe5   : > { %v1337_v13 = vunpack.c.l.b16 %v1221_v39  ;;  %v1341_v8 = vunpack.c.h.b16 %v1221_v39  ;;  %v6927_v39 = vld [vmem:[#allocation2 + $0x88] sm:$0xf0]  ;;  %4391 = vmatpush.bf16.msra.mxu2 %v9031_v24  ;;  %v1131_v1 = vrot.slane %v11421_v31, 1  ;;  %v11424_v24 = vshrl.u32 %v10006_v21, 16 }
  0xe6   : > { %v9039_v31 = vld [vmem:[%s11330_s4 + $0x1e8] sm:$0xff] }
  0xe7   : > { %v10265_v18 = vpop.f32.mrf.mxu2  ;;  %v10267_v15 = vpop.f32.mrf.mxu3  ;;  %v1458_v48 = vpack.c.b16 %v1337_v13, %v1336_v59  ;;  %v1461_v33 = vpack.c.b16 %v1341_v8, %v1340_v40  ;;  %v6926_v40 = vor.u32 %v8803_v51, %v6925_v58  ;;  %v6930_v8 = vor.u32 %v8800_v41, %v6927_v39  ;;  %v9047_v58 = vld [vmem:[%s11330_s4 + $0x228] sm:$0xff]  ;;  %4480 = vmatpush.bf16.msra.mxu3 %v9039_v31  ;;  %v8806_v31 = vld [vmem:[#allocation2 + $0xa4] sm:$0xf] }
  0xe8   : > { %11417 = vst [vmem:[#allocation5_spill] sm:$0xff] %v10267_v15  ;;  %v1134_v10 = vor.u32 %v1133_v50, %v11424_v24  ;;  %v9055_v51 = vld [vmem:[%s11330_s4 + $0x268] sm:$0xff]  ;;  %4569 = vmatpush.bf16.msra.mxu0 %v9047_v58  ;;  %v6951_v58 = vld [vmem:[#allocation2 + $0xb8] sm:$0xf0] }
  0xe9   : > { %v10273_v55 = vpop.f32.mrf.mxu0  ;;  %v10275_v44 = vpop.f32.mrf.mxu1  ;;  %1651 = vst [vmem:[#allocation2 + $0xd0] sm:$0xff] %v1458_v48  ;;  %v8808_v48 = vld [vmem:[#allocation2 + $0xac] sm:$0xf0]  ;;  %4658 = vmatpush.bf16.msra.mxu1 %v9055_v51 }
  0xea   : > { %1654 = vst [vmem:[#allocation2 + $0xe8] sm:$0xff] %v1461_v33  ;;  %v8805_v33 = vld [vmem:[#allocation2 + $0x9c] sm:$0xf]  ;;  %v1223_v39 = vsel %vm10137_vm5, %v1134_v10, 0  ;;  %v6949_v10 = vld [vmem:[#allocation2 + $0xa0] sm:$0xf] }
  0xeb   : > { %v1345_v27 = vunpack.c.l.b16 %v1223_v39 }
  0xed   : > { %3231 = vmatmul.bf16.gmra.mxu0 %v6902_v36  ;;  %3320 = vmatmul.bf16.gmra.mxu1 %v6906_v26 }
  0xf2   : > { %v2926_v36 = vpop.f32.mrf.mxu2  ;;  %v3015_v26 = vpop.f32.mrf.mxu3 }
  0xf3   : > { %v10281_v12 = vadd.f32 %v3015_v26, %v2926_v36  ;;  %v6943_v36 = vld [vmem:[#allocation2 + $0xb0] sm:$0xf0]  ;;  %v11423_v26 = vshrl.u32 %v10004_v45, 16 }
  0xf4   : > { %3058 = vmatmul.bf16.gmra.mxu2 %v6918_v61  ;;  %3147 = vmatmul.bf16.gmra.mxu3 %v6922_v35  ;;  %v6941_v35 = vld [vmem:[#allocation2 + $0x98] sm:$0xf] }
  0xf5   : > { %11420 = vst [vmem:[#allocation6_spill] sm:$0xff] %v10281_v12  ;;  %v1132_v2 = vor.u32 %v1131_v1, %v11423_v26  ;;  %v11431_v12 = vshrl.u32 %v10071_v9, 16 }
  0xf7   : > { %v1222_v21 = vsel %vm10137_vm5, %v1132_v2, 0  ;;  %v8809_v2 = vld [vmem:[#allocation2 + $0xb4] sm:$0xf0] }
  0xf8   : > { %v2886_v59 = vpop.f32.mrf.mxu0  ;;  %v2975_v13 = vpop.f32.mrf.mxu1  ;;  %v1344_v1 = vunpack.c.l.b16 %v1222_v21  ;;  %v1348_v50 = vunpack.c.h.b16 %v1222_v21  ;;  %v11427_v21 = vshll.u32 %v10069_v6, 16  ;;  %v6950_v51 = vor.u32 %v8809_v2, %v6949_v10 }
  0xf9   : > { %v10290_v61 = vadd.f32 %v2975_v13, %v2886_v59  ;;  %v1349_v59 = vunpack.c.h.b16 %v1223_v39  ;;  %v6942_v13 = vor.u32 %v8808_v48, %v6941_v35 }
  0xfa   : > { %v10305_v41 = vpop.f32.mrf.mxu2  ;;  %v10307_v45 = vpop.f32.mrf.mxu3  ;;  %v1464_v24 = vpack.c.b16 %v1345_v27, %v1344_v1  ;;  %v1135_v39 = vrot.slane %v11427_v21, 1  ;;  %v8811_v21 = vld [vmem:[#allocation2 + $0xcc] sm:$0xf] }
  0xfb   : > { %11425 = vst [vmem:[#allocation7_spill] sm:$0xff] %v10305_v41  ;;  %v1467_v25 = vpack.c.b16 %v1349_v59, %v1348_v50  ;;  %v6967_v41 = vld [vmem:[#allocation2 + $0xe0] sm:$0xf0] }
  0xfc   : > { %11426 = vst [vmem:[#allocation8_spill] sm:$0xff] %v10307_v45  ;;  %v6954_v45 = vor.u32 %v8806_v31, %v6951_v58 }
  0xfd   : > { %3236 = vmatmul.bf16.gmra.mxu0 %v6926_v40  ;;  %3325 = vmatmul.bf16.gmra.mxu1 %v6930_v8  ;;  %v6946_v40 = vor.u32 %v8805_v33, %v6943_v36  ;;  %1657 = vst [vmem:[#allocation2 + $0x100] sm:$0xff] %v1464_v24  ;;  %v11428_v33 = vshll.u32 %v10071_v9, 16  ;;  %v8814_v24 = vld [vmem:[#allocation2 + $0xdc] sm:$0xf0]  ;;  %v6973_v9 = vld [vmem:[#allocation2 + $0xd0] sm:$0xf] }
  0xfe   : > { %1660 = vst [vmem:[#allocation2 + $0x118] sm:$0xff] %v1467_v25  ;;  %v6965_v25 = vld [vmem:[#allocation2 + $0xc8] sm:$0xf] }
  0xff   : > { %v1137_v36 = vrot.slane %v11428_v33, 1 }
 0x100   : > { %v10313_v8 = vpop.f32.mrf.mxu0  ;;  %v10315_v26 = vpop.f32.mrf.mxu1 }
 0x101   : > { %v1138_v33 = vor.u32 %v1137_v36, %v11431_v12  ;;  %v8812_v12 = vld [vmem:[#allocation2 + $0xd4] sm:$0xf]  ;;  %v8815_v36 = vld [vmem:[#allocation2 + $0xe4] sm:$0xf0] }
 0x103   : > { %v1225_v2 = vsel %vm10137_vm5, %v1138_v33, 0 }
 0x104   : > { %3063 = vmatmul.bf16.gmra.mxu2 %v6942_v13  ;;  %3152 = vmatmul.bf16.gmra.mxu3 %v6946_v40  ;;  %v11430_v13 = vshrl.u32 %v10069_v6, 16  ;;  %v1353_v6 = vunpack.c.l.b16 %v1225_v2 }
 0x105   : > { %v6999_v15 = vld [vmem:[#allocation2 + $0x118] sm:$0xf0] }
 0x106   : > { %v1136_v40 = vor.u32 %v1135_v39, %v11430_v13  ;;  %v1357_v39 = vunpack.c.h.b16 %v1225_v2  ;;  %v6975_v13 = vld [vmem:[#allocation2 + $0xe8] sm:$0xf0]  ;;  %v6974_v2 = vor.u32 %v8815_v36, %v6973_v9 }
 0x108   : > { %v2931_v35 = vpop.f32.mrf.mxu2  ;;  %v3020_v48 = vpop.f32.mrf.mxu3  ;;  %v1224_v10 = vsel %vm10137_vm5, %v1136_v40, 0 }
 0x109   : > { %v10321_v1 = vadd.f32 %v3020_v48, %v2931_v35  ;;  %v1352_v31 = vunpack.c.l.b16 %v1224_v10  ;;  %v1356_v58 = vunpack.c.h.b16 %v1224_v10  ;;  %v6966_v35 = vor.u32 %v8814_v24, %v6965_v25 }
 0x10a   : > { %v2891_v27 = vpop.f32.mrf.mxu0  ;;  %v6970_v48 = vor.u32 %v8811_v21, %v6967_v41  ;;  %v9030_v41 = vld [vmem:[%s11330_s4 + $0x1a0] sm:$0xff]  ;;  %v11434_v25 = vshll.u32 %v10147_v5, 16  ;;  %v11435_v21 = vshll.u32 %v10149_v29, 16 }
 0x10b   : > { %11429 = vst [vmem:[#allocation9_spill] sm:$0xff] %v10321_v1  ;;  %v2980_v50 = vpop.f32.mrf.mxu1  ;;  %4392 = vmatpush.bf16.msra.mxu2 %v9030_v41  ;;  %v9038_v41 = vld [vmem:[%s11330_s4 + $0x1e0] sm:$0xff] }
 0x10c   : > { %v10323_v59 = vadd.f32 %v2980_v50, %v2891_v27  ;;  %v1139_v24 = vrot.slane %v11434_v25, 1  ;;  %v1141_v10 = vrot.slane %v11435_v21, 1  ;;  %4481 = vmatpush.bf16.msra.mxu3 %v9038_v41  ;;  %v8818_v1 = vld [vmem:[#allocation2 + $0x104] sm:$0xf] }
 0x10d   : > { %3241 = vmatmul.bf16.gmra.mxu0 %v6950_v51  ;;  %3330 = vmatmul.bf16.gmra.mxu1 %v6954_v45  ;;  %v1470_v51 = vpack.c.b16 %v1353_v6, %v1352_v31  ;;  %v1473_v45 = vpack.c.b16 %v1357_v39, %v1356_v58  ;;  %v6978_v31 = vor.u32 %v8812_v12, %v6975_v13  ;;  %v6989_v58 = vld [vmem:[#allocation2 + $0xf8] sm:$0xf]  ;;  %v11437_v39 = vshrl.u32 %v10149_v29, 16  ;;  %v9054_v29 = vld [vmem:[%s11330_s4 + $0x260] sm:$0xff] }
 0x10e   : > { %4659 = vmatpush.bf16.msra.mxu1 %v9054_v29 }
 0x10f   : > { %1663 = vst [vmem:[#allocation2 + $0x130] sm:$0xff] %v1470_v51  ;;  %v1142_v51 = vor.u32 %v1141_v10, %v11437_v39 }
 0x110   : > { %v10333_v27 = vpop.f32.mrf.mxu2  ;;  %v10335_v50 = vpop.f32.mrf.mxu3  ;;  %1666 = vst [vmem:[#allocation2 + $0x148] sm:$0xff] %v1473_v45  ;;  %v8817_v45 = vld [vmem:[#allocation2 + $0xfc] sm:$0xf] }
 0x111   : > { %11432 = vst [vmem:[#allocation10_spill] sm:$0xff] %v10333_v27  ;;  %v1227_v36 = vsel %vm10137_vm5, %v1142_v51, 0 }
 0x112   : > { %11433 = vst [vmem:[#allocation11_spill] sm:$0xff] %v10335_v50  ;;  %v10337_v40 = vpop.f32.mrf.mxu0  ;;  %v6991_v50 = vld [vmem:[#allocation2 + $0x110] sm:$0xf0] }
 0x113   : > { %v10339_v33 = vpop.f32.mrf.mxu1 }
 0x114   : > { %3068 = vmatmul.bf16.gmra.mxu2 %v6966_v35  ;;  %3157 = vmatmul.bf16.gmra.mxu3 %v6970_v48  ;;  %v8820_v35 = vld [vmem:[#allocation2 + $0x10c] sm:$0xf0]  ;;  %v11436_v48 = vshrl.u32 %v10147_v5, 16  ;;  %v9046_v5 = vld [vmem:[%s11330_s4 + $0x220] sm:$0xff] }
 0x115   : > { %v6990_v10 = vor.u32 %v8820_v35, %v6989_v58  ;;  %4570 = vmatpush.bf16.msra.mxu0 %v9046_v5 }
 0x116   : > { %v1140_v6 = vor.u32 %v1139_v24, %v11436_v48  ;;  %v1365_v48 = vunpack.c.h.b16 %v1227_v36 }
 0x118   : > { %v1226_v12 = vsel %vm10137_vm5, %v1140_v6, 0  ;;  %v6997_v6 = vld [vmem:[#allocation2 + $0x100] sm:$0xf] }
 0x119   : > { %v1360_v13 = vunpack.c.l.b16 %v1226_v12  ;;  %v1364_v24 = vunpack.c.h.b16 %v1226_v12  ;;  %v8821_v12 = vld [vmem:[#allocation2 + $0x114] sm:$0xf0] }
 0x11a   : > { %v6998_v29 = vor.u32 %v8821_v12, %v6997_v6 }
 0x11d   : > { %3246 = vmatmul.bf16.gmra.mxu0 %v6974_v2  ;;  %3335 = vmatmul.bf16.gmra.mxu1 %v6978_v31  ;;  %v2936_v27 = vpop.f32.mrf.mxu2  ;;  %v3025_v25 = vpop.f32.mrf.mxu3  ;;  %v6994_v2 = vor.u32 %v8817_v45, %v6991_v50  ;;  %v1361_v31 = vunpack.c.l.b16 %v1227_v36  ;;  %v11440_v50 = vshll.u32 %v9530_v63, 16  ;;  %v11441_v45 = vshll.u32 %v9532_v0, 16 }
 0x11e   : > { %v10355_v9 = vadd.f32 %v3025_v25, %v2936_v27  ;;  %v7002_v36 = vor.u32 %v8818_v1, %v6999_v15 }
 0x11f   : > { %v1476_v25 = vpack.c.b16 %v1361_v31, %v1360_v13  ;;  %v1143_v35 = vrot.slane %v11440_v50, 1  ;;  %v1145_v5 = vrot.slane %v11441_v45, 1  ;;  %v8826_v31 = vld [vmem:[#allocation2 + $0x13c] sm:$0xf0] }
 0x120   : > { %11438 = vst [vmem:[#allocation12_spill] sm:$0xff] %v10355_v9  ;;  %v2896_v21 = vpop.f32.mrf.mxu0  ;;  %v2985_v27 = vpop.f32.mrf.mxu1  ;;  %v1479_v9 = vpack.c.b16 %v1365_v48, %v1364_v24  ;;  %v8823_v48 = vld [vmem:[#allocation2 + $0x12c] sm:$0xf] }
 0x121   : > { %v10367_v39 = vadd.f32 %v2985_v27, %v2896_v21  ;;  %1669 = vst [vmem:[#allocation2 + $0x160] sm:$0xff] %v1476_v25  ;;  %v7013_v21 = vld [vmem:[#allocation2 + $0x128] sm:$0xf]  ;;  %v7015_v25 = vld [vmem:[#allocation2 + $0x140] sm:$0xf0] }
 0x122   : > { %1672 = vst [vmem:[#allocation2 + $0x178] sm:$0xff] %v1479_v9  ;;  %v11442_v9 = vshrl.u32 %v9530_v63, 16  ;;  %v7014_v63 = vor.u32 %v8826_v31, %v7013_v21  ;;  %v7018_v50 = vor.u32 %v8823_v48, %v7015_v25  ;;  %v11445_v21 = vshll.u32 %v9626_v23, 16 }
 0x123   : > { %v11446_v48 = vshll.u32 %v9628_v28, 16 }
 0x124   : > { %3073 = vmatmul.bf16.gmra.mxu2 %v6990_v10  ;;  %3162 = vmatmul.bf16.gmra.mxu3 %v6994_v2  ;;  %v1144_v27 = vor.u32 %v1143_v35, %v11442_v9  ;;  %v11443_v10 = vshrl.u32 %v9532_v0, 16  ;;  %v1147_v31 = vrot.slane %v11445_v21, 1  ;;  %v11449_v21 = vshrl.u32 %v9628_v28, 16 }
 0x125   : > { %v2938_v41 = vpop.f32.mrf.mxu2  ;;  %v3027_v51 = vpop.f32.mrf.mxu3  ;;  %v1149_v25 = vrot.slane %v11446_v48, 1  ;;  %v9037_v48 = vld [vmem:[%s11330_s4 + $0x1d8] sm:$0xff] }
 0x126   : > { %v10369_v58 = vadd.f32 %v3027_v51, %v2938_v41  ;;  %v1146_v2 = vor.u32 %v1145_v5, %v11443_v10  ;;  %v1228_v6 = vsel %vm10137_vm5, %v1144_v27, 0  ;;  %v7021_v10 = vld [vmem:[#allocation2 + $0x130] sm:$0xf]  ;;  %4482 = vmatpush.bf16.msra.mxu3 %v9037_v48 }
 0x127   : > { %v1368_v1 = vunpack.c.l.b16 %v1228_v6  ;;  %v1372_v51 = vunpack.c.h.b16 %v1228_v6  ;;  %v8824_v6 = vld [vmem:[#allocation2 + $0x134] sm:$0xf] }
 0x128   : > { %11439 = vst [vmem:[#allocation13_spill] sm:$0xff] %v10369_v58  ;;  %v10375_v13 = vpop.f32.mrf.mxu0  ;;  %v10377_v24 = vpop.f32.mrf.mxu1  ;;  %v1229_v15 = vsel %vm10137_vm5, %v1146_v2, 0  ;;  %v8827_v2 = vld [vmem:[#allocation2 + $0x144] sm:$0xf0] }
 0x129   : > { %v1369_v41 = vunpack.c.l.b16 %v1229_v15  ;;  %v1373_v12 = vunpack.c.h.b16 %v1229_v15  ;;  %v7023_v15 = vld [vmem:[#allocation2 + $0x148] sm:$0xf0] }
 0x12b   : > { %v1482_v35 = vpack.c.b16 %v1369_v41, %v1368_v1  ;;  %v1485_v0 = vpack.c.b16 %v1373_v12, %v1372_v51  ;;  %v7022_v1 = vor.u32 %v8827_v2, %v7021_v10  ;;  %v7026_v41 = vor.u32 %v8824_v6, %v7023_v15  ;;  %v8829_v6 = vld [vmem:[#allocation2 + $0x15c] sm:$0xf]  ;;  %v7039_v15 = vld [vmem:[#allocation2 + $0x170] sm:$0xf0] }
 0x12c   : > { %v1150_v10 = vor.u32 %v1149_v25, %v11449_v21  ;;  %v8833_v21 = vld [vmem:[#allocation2 + $0x174] sm:$0xf0] }
 0x12d   : > { %3251 = vmatmul.bf16.gmra.mxu0 %v6998_v29  ;;  %3340 = vmatmul.bf16.gmra.mxu1 %v7002_v36  ;;  %1675 = vst [vmem:[#allocation2 + $0x190] sm:$0xff] %v1482_v35 }
 0x12e   : > { %1678 = vst [vmem:[#allocation2 + $0x1a8] sm:$0xff] %v1485_v0 }
 0x132   : > { %v2941_v45 = vpop.f32.mrf.mxu2  ;;  %v3030_v5 = vpop.f32.mrf.mxu3 }
 0x133   : > { %v10387_v29 = vadd.f32 %v3030_v5, %v2941_v45  ;;  %v7037_v45 = vld [vmem:[#allocation2 + $0x158] sm:$0xf]  ;;  %v8832_v5 = vld [vmem:[#allocation2 + $0x16c] sm:$0xf0] }
 0x134   : > { %v2901_v36 = vpop.f32.mrf.mxu0  ;;  %v2990_v9 = vpop.f32.mrf.mxu1  ;;  %3078 = vmatmul.bf16.gmra.mxu2 %v7014_v63  ;;  %3167 = vmatmul.bf16.gmra.mxu3 %v7018_v50  ;;  %v9029_v63 = vld [vmem:[%s11330_s4 + $0x198] sm:$0xff] }
 0x135   : > { %11444 = vst [vmem:[#allocation14_spill] sm:$0xff] %v10387_v29  ;;  %v10389_v27 = vadd.f32 %v2990_v9, %v2901_v36  ;;  %4393 = vmatpush.bf16.msra.mxu2 %v9029_v63  ;;  %v11448_v36 = vshrl.u32 %v9626_v23, 16  ;;  %v1231_v23 = vsel %vm10137_vm5, %v1150_v10, 0  ;;  %v8830_v10 = vld [vmem:[#allocation2 + $0x164] sm:$0xf] }
 0x136   : > { %v1377_v28 = vunpack.c.l.b16 %v1231_v23  ;;  %v8835_v29 = vld [vmem:[#allocation2 + $0x18c] sm:$0xf] }
 0x137   : > { %v1148_v9 = vor.u32 %v1147_v31, %v11448_v36  ;;  %v9053_v36 = vld [vmem:[%s11330_s4 + $0x258] sm:$0xff]  ;;  %v7071_v58 = vld [vmem:[#allocation2 + $0x1a8] sm:$0xf0] }
 0x138   : > { %4660 = vmatpush.bf16.msra.mxu1 %v9053_v36  ;;  %v11454_v36 = vshrl.u32 %v9707_v43, 16 }
 0x13a   : > { %v2943_v51 = vpop.f32.mrf.mxu2  ;;  %v3032_v12 = vpop.f32.mrf.mxu3 }
 0x13b   : > { %v10398_v50 = vadd.f32 %v3032_v12, %v2943_v51  ;;  %v1230_v51 = vsel %vm10137_vm5, %v1148_v9, 0  ;;  %v7042_v12 = vor.u32 %v8829_v6, %v7039_v15  ;;  %v7045_v9 = vld [vmem:[#allocation2 + $0x160] sm:$0xf]  ;;  %v11450_v15 = vshll.u32 %v9705_v34, 16 }
 0x13c   : > { %v2903_v35 = vpop.f32.mrf.mxu0  ;;  %v2992_v0 = vpop.f32.mrf.mxu1  ;;  %v1376_v31 = vunpack.c.l.b16 %v1230_v51  ;;  %v1380_v25 = vunpack.c.h.b16 %v1230_v51  ;;  %v11451_v51 = vshll.u32 %v9707_v43, 16 }
 0x13d   : > { %11447 = vst [vmem:[#allocation15_spill] sm:$0xff] %v10398_v50  ;;  %3256 = vmatmul.bf16.gmra.mxu0 %v7022_v1  ;;  %3345 = vmatmul.bf16.gmra.mxu1 %v7026_v41  ;;  %v10404_v2 = vadd.f32 %v2992_v0, %v2903_v35  ;;  %v1381_v1 = vunpack.c.h.b16 %v1231_v23  ;;  %v7038_v41 = vor.u32 %v8832_v5, %v7037_v45  ;;  %v9045_v0 = vld [vmem:[%s11330_s4 + $0x218] sm:$0xff]  ;;  %v1151_v48 = vrot.slane %v11450_v15, 1  ;;  %v8838_v15 = vld [vmem:[#allocation2 + $0x19c] sm:$0xf0] }
 0x13e   : > { %v1488_v63 = vpack.c.b16 %v1377_v28, %v1376_v31  ;;  %4571 = vmatpush.bf16.msra.mxu0 %v9045_v0  ;;  %v7047_v45 = vld [vmem:[#allocation2 + $0x178] sm:$0xf0]  ;;  %v1153_v23 = vrot.slane %v11451_v51, 1  ;;  %v7046_v28 = vor.u32 %v8833_v21, %v7045_v9  ;;  %v7063_v51 = vld [vmem:[#allocation2 + $0x1a0] sm:$0xf0] }
 0x13f   : > { %v1491_v35 = vpack.c.b16 %v1381_v1, %v1380_v25  ;;  %v7050_v25 = vor.u32 %v8830_v10, %v7047_v45 }
 0x140   : > { %1681 = vst [vmem:[#allocation2 + $0x1c0] sm:$0xff] %v1488_v63  ;;  %v7061_v63 = vld [vmem:[#allocation2 + $0x188] sm:$0xf]  ;;  %v1154_v50 = vor.u32 %v1153_v23, %v11454_v36  ;;  %v7066_v23 = vor.u32 %v8835_v29, %v7063_v51 }
 0x141   : > { %1684 = vst [vmem:[#allocation2 + $0x1d8] sm:$0xff] %v1491_v35  ;;  %v11453_v35 = vshrl.u32 %v9705_v34, 16  ;;  %v7062_v43 = vor.u32 %v8838_v15, %v7061_v63  ;;  %v11456_v15 = vshll.u32 %v9788_v4, 16 }
 0x142   : > { %v1233_v21 = vsel %vm10137_vm5, %v1154_v50, 0  ;;  %v7069_v50 = vld [vmem:[#allocation2 + $0x190] sm:$0xf] }
 0x143   : > { %v1152_v0 = vor.u32 %v1151_v48, %v11453_v35  ;;  %v1389_v48 = vunpack.c.h.b16 %v1233_v21  ;;  %v1157_v51 = vrot.slane %v11456_v15, 1 }
 0x144   : > { %3083 = vmatmul.bf16.gmra.mxu2 %v7038_v41  ;;  %3172 = vmatmul.bf16.gmra.mxu3 %v7042_v12 }
 0x145   : > { %v1232_v9 = vsel %vm10137_vm5, %v1152_v0, 0  ;;  %v8839_v0 = vld [vmem:[#allocation2 + $0x1a4] sm:$0xf0] }
 0x146   : > { %v1388_v34 = vunpack.c.h.b16 %v1232_v9 }
 0x147   : > { %v2946_v5 = vpop.f32.mrf.mxu2  ;;  %v3035_v6 = vpop.f32.mrf.mxu3 }
 0x148   : > { %v10423_v31 = vadd.f32 %v3035_v6, %v2946_v5  ;;  %v1384_v5 = vunpack.c.l.b16 %v1232_v9  ;;  %v1385_v6 = vunpack.c.l.b16 %v1233_v21 }
 0x14a   : > { %11452 = vst [vmem:[#allocation16_spill] sm:$0xff] %v10423_v31  ;;  %v2906_v1 = vpop.f32.mrf.mxu0  ;;  %v2995_v41 = vpop.f32.mrf.mxu1  ;;  %v8836_v31 = vld [vmem:[#allocation2 + $0x194] sm:$0xf] }
 0x14b   : > { %v10425_v12 = vadd.f32 %v2995_v41, %v2906_v1 }
 0x14d   : > { %3261 = vmatmul.bf16.gmra.mxu0 %v7046_v28  ;;  %3350 = vmatmul.bf16.gmra.mxu1 %v7050_v25  ;;  %v1494_v28 = vpack.c.b16 %v1385_v6, %v1384_v5  ;;  %v1497_v25 = vpack.c.b16 %v1389_v48, %v1388_v34  ;;  %v7074_v5 = vor.u32 %v8836_v31, %v7071_v58  ;;  %v9036_v58 = vld [vmem:[%s11330_s4 + $0x1d0] sm:$0xff]  ;;  %v11458_v31 = vshrl.u32 %v9788_v4, 16 }
 0x14e   : > { %4483 = vmatpush.bf16.msra.mxu3 %v9036_v58  ;;  %v7095_v58 = vld [vmem:[#allocation2 + $0x1d8] sm:$0xf0] }
 0x14f   : > { %v2948_v10 = vpop.f32.mrf.mxu2  ;;  %v3037_v45 = vpop.f32.mrf.mxu3  ;;  %1687 = vst [vmem:[#allocation2 + $0x1f0] sm:$0xff] %v1494_v28  ;;  %v7085_v28 = vld [vmem:[#allocation2 + $0x1b8] sm:$0xf] }
 0x150   : > { %v10435_v1 = vadd.f32 %v3037_v45, %v2948_v10  ;;  %1690 = vst [vmem:[#allocation2 + $0x208] sm:$0xff] %v1497_v25  ;;  %v11455_v10 = vshll.u32 %v9783_v56, 16  ;;  %v7070_v45 = vor.u32 %v8839_v0, %v7069_v50  ;;  %v8844_v25 = vld [vmem:[#allocation2 + $0x1cc] sm:$0xf0]  ;;  %v1158_v50 = vor.u32 %v1157_v51, %v11458_v31 }
 0x151   : > { %v2963_v0 = vadd.f32 %v10207_v53, %v10205_v42 }
 0x152   : > { %v2908_v41 = vpop.f32.mrf.mxu0  ;;  %v2997_v35 = vpop.f32.mrf.mxu1  ;;  %v1155_v63 = vrot.slane %v11455_v10, 1  ;;  %v1235_v15 = vsel %vm10137_vm5, %v1158_v50, 0 }
 0x153   : > { %v10437_v36 = vadd.f32 %v2997_v35, %v2908_v41  ;;  %v11457_v41 = vshrl.u32 %v9783_v56, 16  ;;  %v1393_v51 = vunpack.c.l.b16 %v1235_v15 }
 0x154   : > { %3088 = vmatmul.bf16.gmra.mxu2 %v7062_v43  ;;  %3177 = vmatmul.bf16.gmra.mxu3 %v7066_v23  ;;  %v9028_v43 = vld [vmem:[%s11330_s4 + $0x190] sm:$0xff] }
 0x155   : > { %4394 = vmatpush.bf16.msra.mxu2 %v9028_v43  ;;  %v1156_v35 = vor.u32 %v1155_v63, %v11457_v41 }
 0x157   : > { %v3049_v9 = vpop.f32.mrf.mxu2  ;;  %v3138_v21 = vpop.f32.mrf.mxu3 }
 0x158   : > { %v3050_v29 = vadd.f32 %v3049_v9, %v10168_v47  ;;  %v8841_v47 = vld [vmem:[#allocation2 + $0x1bc] sm:$0xf]  ;;  %v7087_v9 = vld [vmem:[#allocation2 + $0x1d0] sm:$0xf0] }
 0x159   : > { %v7090_v4 = vor.u32 %v8841_v47, %v7087_v9  ;;  %v8845_v47 = vld [vmem:[#allocation2 + $0x1d4] sm:$0xf0]  ;;  %v8842_v9 = vld [vmem:[#allocation2 + $0x1c4] sm:$0xf] }
 0x15a   : > { %v3227_v6 = vpop.f32.mrf.mxu0  ;;  %v3316_v34 = vpop.f32.mrf.mxu1  ;;  %v3139_v48 = vadd.f32 %v3138_v21, %v3050_v29  ;;  %v1234_v21 = vsel %vm10137_vm5, %v1156_v35, 0  ;;  %v7086_v29 = vor.u32 %v8844_v25, %v7085_v28  ;;  %v9052_v25 = vld [vmem:[%s11330_s4 + $0x250] sm:$0xff]  ;;  %v7093_v35 = vld [vmem:[#allocation2 + $0x1c0] sm:$0xf] }
 0x15b   : > { %4661 = vmatpush.bf16.msra.mxu1 %v9052_v25  ;;  %v7111_v25 = vld [vmem:[#allocation2 + $0x200] sm:$0xf0] }
 0x15c   : > { %v3228_v23 = vadd.f32 %v3227_v6, %v3139_v48  ;;  %v1397_v48 = vunpack.c.h.b16 %v1235_v15 }
 0x15d   : > { %3266 = vmatmul.bf16.gmra.mxu0 %v7070_v45  ;;  %3355 = vmatmul.bf16.gmra.mxu1 %v7074_v5  ;;  %v1392_v45 = vunpack.c.l.b16 %v1234_v21  ;;  %v1396_v5 = vunpack.c.h.b16 %v1234_v21  ;;  %v11459_v21 = vshll.u32 %v9866_v22, 16 }
 0x15e   : > { %v10458_v10 = vadd.f32 %v3316_v34, %v3228_v23  ;;  %v9044_v34 = vld [vmem:[%s11330_s4 + $0x210] sm:$0xff] }
 0x15f   : > { %v3051_v56 = vpop.f32.mrf.mxu2  ;;  %v3140_v63 = vpop.f32.mrf.mxu3  ;;  %v1500_v23 = vpack.c.b16 %v1393_v51, %v1392_v45  ;;  %v1503_v41 = vpack.c.b16 %v1397_v48, %v1396_v5  ;;  %4572 = vmatpush.bf16.msra.mxu0 %v9044_v34  ;;  %v7094_v45 = vor.u32 %v8845_v47, %v7093_v35  ;;  %v7098_v5 = vor.u32 %v8842_v9, %v7095_v58 }
 0x160   : > { %v3052_v6 = vadd.f32 %v3051_v56, %v2963_v0  ;;  %v1159_v56 = vrot.slane %v11459_v21, 1  ;;  %v11462_v34 = vshrl.u32 %v9868_v49, 16 }
 0x161   : > { %1693 = vst [vmem:[#allocation2 + $0x220] sm:$0xff] %v1500_v23 }
 0x162   : > { %v3229_v43 = vpop.f32.mrf.mxu0  ;;  %v3318_v42 = vpop.f32.mrf.mxu1  ;;  %v3141_v53 = vadd.f32 %v3140_v63, %v3052_v6  ;;  %1696 = vst [vmem:[#allocation2 + $0x238] sm:$0xff] %v1503_v41  ;;  %v11460_v63 = vshll.u32 %v9868_v49, 16  ;;  %v8850_v41 = vld [vmem:[#allocation2 + $0x1fc] sm:$0xf0] }
 0x164   : > { %v3230_v28 = vadd.f32 %v3229_v43, %v3141_v53  ;;  %3093 = vmatmul.bf16.gmra.mxu2 %v7086_v29  ;;  %3182 = vmatmul.bf16.gmra.mxu3 %v7090_v4  ;;  %v1161_v29 = vrot.slane %v11460_v63, 1  ;;  %v7109_v43 = vld [vmem:[#allocation2 + $0x1e8] sm:$0xf] }
 0x165   : > { %v7110_v63 = vor.u32 %v8850_v41, %v7109_v43  ;;  %v11463_v43 = vshll.u32 %v9962_v11, 16 }
 0x166   : > { %v10468_v31 = vadd.f32 %v3318_v42, %v3230_v28  ;;  %v11461_v42 = vshrl.u32 %v9866_v22, 16  ;;  %v1162_v23 = vor.u32 %v1161_v29, %v11462_v34  ;;  %v8847_v28 = vld [vmem:[#allocation2 + $0x1ec] sm:$0xf] }
 0x167   : > { %v3054_v50 = vpop.f32.mrf.mxu2  ;;  %v3143_v0 = vpop.f32.mrf.mxu3  ;;  %v7114_v29 = vor.u32 %v8847_v28, %v7111_v25  ;;  %v1163_v41 = vrot.slane %v11463_v43, 1  ;;  %v11464_v25 = vshll.u32 %v9965_v62, 16 }
 0x168   : > { %v3055_v15 = vadd.f32 %v3054_v50, %v10223_v30  ;;  %v1160_v53 = vor.u32 %v1159_v56, %v11461_v42  ;;  %v2968_v30 = vadd.f32 %v10234_v3, %v10232_v60  ;;  %v1237_v47 = vsel %vm10137_vm5, %v1162_v23, 0  ;;  %v7119_v42 = vld [vmem:[#allocation2 + $0x208] sm:$0xf0] }
 0x169   : > { %v1401_v50 = vunpack.c.l.b16 %v1237_v47  ;;  %v1405_v21 = vunpack.c.h.b16 %v1237_v47 }
 0x16a   : > { %v3232_v6 = vpop.f32.mrf.mxu0  ;;  %v3321_v4 = vpop.f32.mrf.mxu1  ;;  %v3144_v51 = vadd.f32 %v3143_v0, %v3055_v15  ;;  %v1236_v35 = vsel %vm10137_vm5, %v1160_v53, 0 }
 0x16b   : > { %v1400_v49 = vunpack.c.l.b16 %v1236_v35  ;;  %v1404_v0 = vunpack.c.h.b16 %v1236_v35 }
 0x16c   : > { %v3233_v48 = vadd.f32 %v3232_v6, %v3144_v51  ;;  %v8851_v51 = vld [vmem:[#allocation2 + $0x204] sm:$0xf0] }
 0x16d   : > { %3271 = vmatmul.bf16.gmra.mxu0 %v7094_v45  ;;  %3360 = vmatmul.bf16.gmra.mxu1 %v7098_v5  ;;  %v1506_v15 = vpack.c.b16 %v1401_v50, %v1400_v49  ;;  %v1509_v45 = vpack.c.b16 %v1405_v21, %v1404_v0  ;;  %v9027_v50 = vld [vmem:[%s11330_s4 + $0x188] sm:$0xff]  ;;  %v7133_v21 = vld [vmem:[#allocation2 + $0x218] sm:$0xf] }
 0x16e   : > { %v10485_v9 = vadd.f32 %v3321_v4, %v3233_v48  ;;  %v7117_v4 = vld [vmem:[#allocation2 + $0x1f0] sm:$0xf]  ;;  %v8848_v48 = vld [vmem:[#allocation2 + $0x1f4] sm:$0xf]  ;;  %4395 = vmatpush.bf16.msra.mxu2 %v9027_v50  ;;  %v8857_v50 = vld [vmem:[#allocation2 + $0x234] sm:$0xf0] }
 0x16f   : > { %v3056_v22 = vpop.f32.mrf.mxu2  ;;  %v3145_v58 = vpop.f32.mrf.mxu3  ;;  %1699 = vst [vmem:[#allocation2 + $0x250] sm:$0xff] %v1506_v15  ;;  %v7118_v35 = vor.u32 %v8851_v51, %v7117_v4  ;;  %v7122_v47 = vor.u32 %v8848_v48, %v7119_v42  ;;  %v7135_v15 = vld [vmem:[#allocation2 + $0x230] sm:$0xf0] }
 0x170   : > { %v3057_v56 = vadd.f32 %v3056_v22, %v2968_v30  ;;  %1702 = vst [vmem:[#allocation2 + $0x268] sm:$0xff] %v1509_v45  ;;  %v1165_v30 = vrot.slane %v11464_v25, 1  ;;  %v9035_v45 = vld [vmem:[%s11330_s4 + $0x1c8] sm:$0xff] }
 0x171   : > { %4484 = vmatpush.bf16.msra.mxu3 %v9035_v45  ;;  %v11468_v45 = vshll.u32 %v10040_v14, 16 }
 0x172   : > { %v3234_v60 = vpop.f32.mrf.mxu0  ;;  %v3323_v3 = vpop.f32.mrf.mxu1  ;;  %v3146_v5 = vadd.f32 %v3145_v58, %v3057_v56  ;;  %v8856_v56 = vld [vmem:[#allocation2 + $0x22c] sm:$0xf0] }
 0x173   : > { %v7134_v48 = vor.u32 %v8856_v56, %v7133_v21  ;;  %v7143_v21 = vld [vmem:[#allocation2 + $0x238] sm:$0xf0] }
 0x174   : > { %v3235_v6 = vadd.f32 %v3234_v60, %v3146_v5  ;;  %3098 = vmatmul.bf16.gmra.mxu2 %v7110_v63  ;;  %3187 = vmatmul.bf16.gmra.mxu3 %v7114_v29  ;;  %v11465_v63 = vshrl.u32 %v9962_v11, 16  ;;  %v11466_v60 = vshrl.u32 %v9965_v62, 16  ;;  %v2973_v5 = vadd.f32 %v10275_v44, %v10273_v55 }
 0x176   : > { %v10487_v53 = vadd.f32 %v3323_v3, %v3235_v6  ;;  %v1164_v29 = vor.u32 %v1163_v41, %v11465_v63  ;;  %v1166_v3 = vor.u32 %v1165_v30, %v11466_v60  ;;  %v9043_v30 = vld [vmem:[%s11330_s4 + $0x208] sm:$0xff]  ;;  %v1169_v60 = vrot.slane %v11468_v45, 1  ;;  %v7165_v45 = vld [vmem:[#allocation2 + $0x250] sm:$0xf] }
 0x177   : > { %v3059_v34 = vpop.f32.mrf.mxu2  ;;  %v3148_v23 = vpop.f32.mrf.mxu3  ;;  %4573 = vmatpush.bf16.msra.mxu0 %v9043_v30 }
 0x178   : > { %v3060_v28 = vadd.f32 %v3059_v34, %v10259_v52  ;;  %v8853_v52 = vld [vmem:[#allocation2 + $0x21c] sm:$0xf]  ;;  %v1238_v6 = vsel %vm10137_vm5, %v1164_v29, 0  ;;  %v1239_v42 = vsel %vm10137_vm5, %v1166_v3, 0 }
 0x179   : > { %v1408_v34 = vunpack.c.l.b16 %v1238_v6  ;;  %v7138_v62 = vor.u32 %v8853_v52, %v7135_v15  ;;  %v1409_v41 = vunpack.c.l.b16 %v1239_v42  ;;  %v11467_v52 = vshll.u32 %v10038_v46, 16 }
 0x17a   : > { %v3237_v22 = vpop.f32.mrf.mxu0  ;;  %v3326_v58 = vpop.f32.mrf.mxu1  ;;  %v3149_v49 = vadd.f32 %v3148_v23, %v3060_v28  ;;  %v1412_v23 = vunpack.c.h.b16 %v1238_v6  ;;  %v1413_v28 = vunpack.c.h.b16 %v1239_v42 }
 0x17b   : > { %v1167_v15 = vrot.slane %v11467_v52, 1 }
 0x17c   : > { %v3238_v0 = vadd.f32 %v3237_v22, %v3149_v49  ;;  %v7141_v49 = vld [vmem:[#allocation2 + $0x220] sm:$0xf] }
 0x17d   : > { %3276 = vmatmul.bf16.gmra.mxu0 %v7118_v35  ;;  %3365 = vmatmul.bf16.gmra.mxu1 %v7122_v47  ;;  %v1512_v35 = vpack.c.b16 %v1409_v41, %v1408_v34  ;;  %v1515_v47 = vpack.c.b16 %v1413_v28, %v1412_v23  ;;  %v7157_v34 = vld [vmem:[#allocation2 + $0x248] sm:$0xf]  ;;  %v11469_v23 = vshrl.u32 %v10038_v46, 16  ;;  %v8862_v28 = vld [vmem:[#allocation2 + $0x25c] sm:$0xf0] }
 0x17e   : > { %v10508_v4 = vadd.f32 %v3326_v58, %v3238_v0  ;;  %v9051_v58 = vld [vmem:[%s11330_s4 + $0x248] sm:$0xff]  ;;  %v8854_v0 = vld [vmem:[#allocation2 + $0x224] sm:$0xf] }
 0x17f   : > { %v3061_v11 = vpop.f32.mrf.mxu2  ;;  %v3150_v51 = vpop.f32.mrf.mxu3  ;;  %1705 = vst [vmem:[#allocation2 + $0x280] sm:$0xff] %v1512_v35  ;;  %4662 = vmatpush.bf16.msra.mxu1 %v9051_v58  ;;  %v7146_v6 = vor.u32 %v8854_v0, %v7143_v21  ;;  %v7158_v0 = vor.u32 %v8862_v28, %v7157_v34 }
 0x180   : > { %v3062_v43 = vadd.f32 %v3061_v11, %v2973_v5  ;;  %1708 = vst [vmem:[#allocation2 + $0x298] sm:$0xff] %v1515_v47  ;;  %v7142_v5 = vor.u32 %v8857_v50, %v7141_v49 }
 0x182   : > { %v3239_v25 = vpop.f32.mrf.mxu0  ;;  %v3328_v55 = vpop.f32.mrf.mxu1  ;;  %v3151_v44 = vadd.f32 %v3150_v51, %v3062_v43  ;;  %v1168_v43 = vor.u32 %v1167_v15, %v11469_v23  ;;  %v11472_v23 = vshll.u32 %v10113_v54, 16 }
 0x184   : > { %v3240_v22 = vadd.f32 %v3239_v25, %v3151_v44  ;;  %3103 = vmatmul.bf16.gmra.mxu2 %v7134_v48  ;;  %3192 = vmatmul.bf16.gmra.mxu3 %v7138_v62  ;;  %v11470_v62 = vshrl.u32 %v10040_v14, 16  ;;  %v8859_v25 = vld [vmem:[#allocation2 + $0x24c] sm:$0xf]  ;;  %v1240_v44 = vsel %vm10137_vm5, %v1168_v43, 0  ;;  %v1173_v43 = vrot.slane %v11472_v23, 1 }
 0x185   : > { %v1416_v14 = vunpack.c.l.b16 %v1240_v44  ;;  %v1420_v58 = vunpack.c.h.b16 %v1240_v44 }
 0x186   : > { %v10518_v56 = vadd.f32 %v3328_v55, %v3240_v22  ;;  %v1170_v41 = vor.u32 %v1169_v60, %v11470_v62  ;;  %v7159_v55 = vld [vmem:[#allocation2 + $0x260] sm:$0xf0]  ;;  %v8863_v60 = vld [vmem:[#allocation2 + $0x264] sm:$0xf0]  ;;  %v7189_v23 = vld [vmem:[#allocation2 + $0x280] sm:$0xf] }
 0x187   : > { %v3064_v63 = vpop.f32.mrf.mxu2  ;;  %v3153_v29 = vpop.f32.mrf.mxu3  ;;  %v7162_v21 = vor.u32 %v8859_v25, %v7159_v55  ;;  %v7166_v62 = vor.u32 %v8863_v60, %v7165_v45 }
 0x188   : > { %v3065_v3 = vadd.f32 %v3064_v63, %v10290_v61  ;;  %v2978_v61 = vadd.f32 %v10315_v26, %v10313_v8  ;;  %v1241_v30 = vsel %vm10137_vm5, %v1170_v41, 0 }
 0x189   : > { %v1417_v22 = vunpack.c.l.b16 %v1241_v30  ;;  %v1421_v49 = vunpack.c.h.b16 %v1241_v30  ;;  %v7181_v30 = vld [vmem:[#allocation2 + $0x278] sm:$0xf] }
 0x18a   : > { %v3242_v11 = vpop.f32.mrf.mxu0  ;;  %v3331_v51 = vpop.f32.mrf.mxu1  ;;  %v3154_v48 = vadd.f32 %v3153_v29, %v3065_v3  ;;  %v8860_v3 = vld [vmem:[#allocation2 + $0x254] sm:$0xf] }
 0x18b   : > { %v1518_v63 = vpack.c.b16 %v1417_v22, %v1416_v14  ;;  %v1521_v29 = vpack.c.b16 %v1421_v49, %v1420_v58  ;;  %v7183_v22 = vld [vmem:[#allocation2 + $0x290] sm:$0xf0]  ;;  %v9034_v58 = vld [vmem:[%s11330_s4 + $0x1c0] sm:$0xff]  ;;  %v11474_v49 = vshrl.u32 %v10113_v54, 16 }
 0x18c   : > { %v3243_v42 = vadd.f32 %v3242_v11, %v3154_v48  ;;  %v11471_v48 = vshll.u32 %v10111_v57, 16  ;;  %4485 = vmatpush.bf16.msra.mxu3 %v9034_v58  ;;  %v8874_v58 = vld [vmem:[#allocation2 + $0x2bc] sm:$0xf0] }
 0x18d   : > { %3281 = vmatmul.bf16.gmra.mxu0 %v7142_v5  ;;  %3370 = vmatmul.bf16.gmra.mxu1 %v7146_v6  ;;  %1711 = vst [vmem:[#allocation2 + $0x2b0] sm:$0xff] %v1518_v63  ;;  %v7167_v5 = vld [vmem:[#allocation2 + $0x268] sm:$0xf0] }
 0x18e   : > { %v10535_v35 = vadd.f32 %v3331_v51, %v3243_v42  ;;  %1714 = vst [vmem:[#allocation2 + $0x2c8] sm:$0xff] %v1521_v29  ;;  %v1171_v42 = vrot.slane %v11471_v48, 1  ;;  %v7170_v41 = vor.u32 %v8860_v3, %v7167_v5 }
 0x18f   : > { %v3066_v46 = vpop.f32.mrf.mxu2  ;;  %v3155_v47 = vpop.f32.mrf.mxu3 }
 0x190   : > { %v3067_v50 = vadd.f32 %v3066_v46, %v2978_v61  ;;  %v9026_v61 = vld [vmem:[%s11330_s4 + $0x180] sm:$0xff]  ;;  %v8868_v46 = vld [vmem:[#allocation2 + $0x28c] sm:$0xf0] }
 0x191   : > { %4396 = vmatpush.bf16.msra.mxu2 %v9026_v61 }
 0x192   : > { %v3244_v8 = vpop.f32.mrf.mxu0  ;;  %v3333_v26 = vpop.f32.mrf.mxu1  ;;  %v3156_v52 = vadd.f32 %v3155_v47, %v3067_v50  ;;  %v11473_v47 = vshrl.u32 %v10111_v57, 16  ;;  %v1174_v50 = vor.u32 %v1173_v43, %v11474_v49  ;;  %v8869_v43 = vld [vmem:[#allocation2 + $0x294] sm:$0xf0]  ;;  %v8871_v49 = vld [vmem:[#allocation2 + $0x2ac] sm:$0xf] }
 0x194   : > { %v3245_v15 = vadd.f32 %v3244_v8, %v3156_v52  ;;  %3108 = vmatmul.bf16.gmra.mxu2 %v7158_v0  ;;  %3197 = vmatmul.bf16.gmra.mxu3 %v7162_v21  ;;  %v1172_v14 = vor.u32 %v1171_v42, %v11473_v47  ;;  %v2983_v0 = vadd.f32 %v10339_v33, %v10337_v40 }
 0x195   : > { %v7182_v8 = vor.u32 %v8868_v46, %v7181_v30 }
 0x196   : > { %v10537_v6 = vadd.f32 %v3333_v26, %v3245_v15  ;;  %v1242_v21 = vsel %vm10137_vm5, %v1172_v14, 0  ;;  %v1243_v26 = vsel %vm10137_vm5, %v1174_v50, 0  ;;  %v7207_v50 = vld [vmem:[#allocation2 + $0x2c0] sm:$0xf0] }
 0x197   : > { %v3069_v11 = vpop.f32.mrf.mxu2  ;;  %v3158_v51 = vpop.f32.mrf.mxu3  ;;  %v1424_v52 = vunpack.c.l.b16 %v1242_v21  ;;  %v1428_v15 = vunpack.c.h.b16 %v1242_v21  ;;  %v1425_v60 = vunpack.c.l.b16 %v1243_v26  ;;  %v1429_v3 = vunpack.c.h.b16 %v1243_v26 }
 0x198   : > { %v3070_v34 = vadd.f32 %v3069_v11, %v10323_v59  ;;  %v8865_v59 = vld [vmem:[#allocation2 + $0x27c] sm:$0xf]  ;;  %v9042_v11 = vld [vmem:[%s11330_s4 + $0x200] sm:$0xff]  ;;  %v7210_v26 = vor.u32 %v8871_v49, %v7207_v50 }
 0x199   : > { %v7186_v54 = vor.u32 %v8865_v59, %v7183_v22  ;;  %v1527_v48 = vpack.c.b16 %v1429_v3, %v1428_v15  ;;  %4574 = vmatpush.bf16.msra.mxu0 %v9042_v11  ;;  %v7205_v22 = vld [vmem:[#allocation2 + $0x2a8] sm:$0xf]  ;;  %v9177_v50 = vld [vmem:[%s11330_s4 + $0x338] sm:$0xff] }
 0x19a   : > { %v3247_v28 = vpop.f32.mrf.mxu0  ;;  %v3336_v25 = vpop.f32.mrf.mxu1  ;;  %v3159_v55 = vadd.f32 %v3158_v51, %v3070_v34  ;;  %v1524_v51 = vpack.c.b16 %v1425_v60, %v1424_v52  ;;  %v9050_v34 = vld [vmem:[%s11330_s4 + $0x240] sm:$0xff]  ;;  %v7213_v60 = vld [vmem:[#allocation2 + $0x2b0] sm:$0xf]  ;;  %v8875_v3 = vld [vmem:[#allocation2 + $0x2c4] sm:$0xf0] }
 0x19b   : > { %1720 = vst [vmem:[#allocation2 + $0x2f8] sm:$0xff] %v1527_v48  ;;  %4663 = vmatpush.bf16.msra.mxu1 %v9050_v34 }
 0x19c   : > { %v3248_v44 = vadd.f32 %v3247_v28, %v3159_v55  ;;  %1717 = vst [vmem:[#allocation2 + $0x2e0] sm:$0xff] %v1524_v51  ;;  %v7214_v51 = vor.u32 %v8875_v3, %v7213_v60 }
 0x19d   : > { %3286 = vmatmul.bf16.gmra.mxu0 %v7166_v62  ;;  %3375 = vmatmul.bf16.gmra.mxu1 %v7170_v41  ;;  %v8866_v62 = vld [vmem:[#allocation2 + $0x284] sm:$0xf]  ;;  %v7191_v41 = vld [vmem:[#allocation2 + $0x298] sm:$0xf0] }
 0x19e   : > { %v10558_v63 = vadd.f32 %v3336_v25, %v3248_v44  ;;  %v7190_v44 = vor.u32 %v8869_v43, %v7189_v23  ;;  %v7194_v30 = vor.u32 %v8866_v62, %v7191_v41  ;;  %v9065_v43 = vld [vmem:[%s11330_s4 + $0x2b8] sm:$0xff]  ;;  %5981 = vmatpush.bf16.msrb.mxu0 %v9177_v50 }
 0x19f   : > { %v3071_v57 = vpop.f32.mrf.mxu2  ;;  %v3160_v29 = vpop.f32.mrf.mxu3  ;;  %v7229_v41 = vld [vmem:[#allocation2 + $0x2d8] sm:$0xf]  ;;  %4745 = vmatpush.bf16.msrb.mxu2 %v9065_v43 }
 0x1a0   : > { %v3072_v45 = vadd.f32 %v3071_v57, %v2983_v0  ;;  %v2988_v0 = vadd.f32 %v10377_v24, %v10375_v13 }
 0x1a2   : > { %v3249_v5 = vpop.f32.mrf.mxu0  ;;  %v3338_v40 = vpop.f32.mrf.mxu1  ;;  %v3161_v33 = vadd.f32 %v3160_v29, %v3072_v45 }
 0x1a3   : > { %v8533_v7 = vld [vmem:[#allocation2 + $0x2e0] sm:$0xf] }
 0x1a4   : > { %v3250_v42 = vadd.f32 %v3249_v5, %v3161_v33  ;;  %3113 = vmatmul.bf16.gmra.mxu2 %v7182_v8  ;;  %3202 = vmatmul.bf16.gmra.mxu3 %v7186_v54  ;;  %v7206_v8 = vor.u32 %v8874_v58, %v7205_v22  ;;  %v8872_v5 = vld [vmem:[#allocation2 + $0x2b4] sm:$0xf] }
 0x1a6   : > { %v10568_v28 = vadd.f32 %v3338_v40, %v3250_v42  ;;  %v7215_v40 = vld [vmem:[#allocation2 + $0x2c8] sm:$0xf0] }
 0x1a7   : > { %v3074_v25 = vpop.f32.mrf.mxu2  ;;  %v3163_v55 = vpop.f32.mrf.mxu3  ;;  %v7218_v48 = vor.u32 %v8872_v5, %v7215_v40 }
 0x1a8   : > { %v3075_v61 = vadd.f32 %v3074_v25, %v10367_v39  ;;  %v8880_v25 = vld [vmem:[#allocation2 + $0x2ec] sm:$0xf0] }
 0x1aa   : > { %v3252_v46 = vpop.f32.mrf.mxu0  ;;  %v3341_v47 = vpop.f32.mrf.mxu1  ;;  %v3164_v14 = vadd.f32 %v3163_v55, %v3075_v61  ;;  %v8877_v55 = vld [vmem:[#allocation2 + $0x2dc] sm:$0xf]  ;;  %v7231_v61 = vld [vmem:[#allocation2 + $0x2f0] sm:$0xf0] }
 0x1ac   : > { %v3253_v59 = vadd.f32 %v3252_v46, %v3164_v14  ;;  %v7230_v14 = vor.u32 %v8880_v25, %v7229_v41 }
 0x1ad   : > { %3291 = vmatmul.bf16.gmra.mxu0 %v7190_v44  ;;  %3380 = vmatmul.bf16.gmra.mxu1 %v7194_v30 }
 0x1ae   : > { %v10573_v21 = vadd.f32 %v3341_v47, %v3253_v59  ;;  %v7234_v59 = vor.u32 %v8877_v55, %v7231_v61 }
 0x1af   : > { %v3076_v57 = vpop.f32.mrf.mxu2  ;;  %v3165_v29 = vpop.f32.mrf.mxu3 }
 0x1b0   : > { %v3077_v39 = vadd.f32 %v3076_v57, %v2988_v0  ;;  %v9185_v57 = vld [vmem:[%s11330_s4 + $0x378] sm:$0xff] }
 0x1b1   : > { %6070 = vmatpush.bf16.msrb.mxu1 %v9185_v57 }
 0x1b2   : > { %v3254_v52 = vpop.f32.mrf.mxu0  ;;  %v3343_v15 = vpop.f32.mrf.mxu1  ;;  %v3166_v45 = vadd.f32 %v3165_v29, %v3077_v39  ;;  %v7237_v29 = vld [vmem:[#allocation2 + $0x2e0] sm:$0xf]  ;;  %v8881_v39 = vld [vmem:[#allocation2 + $0x2f4] sm:$0xf0] }
 0x1b4   : > { %v3255_v54 = vadd.f32 %v3254_v52, %v3166_v45  ;;  %3118 = vmatmul.bf16.gmra.mxu2 %v7206_v8  ;;  %3207 = vmatmul.bf16.gmra.mxu3 %v7210_v26  ;;  %v7239_v8 = vld [vmem:[#allocation2 + $0x2f8] sm:$0xf0] }
 0x1b6   : > { %v10575_v33 = vadd.f32 %v3343_v15, %v3255_v54  ;;  %v7238_v54 = vor.u32 %v8881_v39, %v7237_v29  ;;  %v9064_v29 = vld [vmem:[%s11330_s4 + $0x2b0] sm:$0xff] }
 0x1b7   : > { %v3079_v13 = vpop.f32.mrf.mxu2  ;;  %v3168_v24 = vpop.f32.mrf.mxu3  ;;  %4746 = vmatpush.bf16.msrb.mxu2 %v9064_v29 }
 0x1b8   : > { %v3080_v11 = vadd.f32 %v3079_v13, %v10389_v27  ;;  %v9073_v27 = vld [vmem:[%s11330_s4 + $0x2f8] sm:$0xff] }
 0x1b9   : > { %4834 = vmatpush.bf16.msrb.mxu3 %v9073_v27  ;;  %v7541_v27 = vld [vmem:[#allocation2 + $0x38] sm:$0xf] }
 0x1ba   : > { %v3257_v42 = vpop.f32.mrf.mxu0  ;;  %v3346_v34 = vpop.f32.mrf.mxu1  ;;  %v3169_v23 = vadd.f32 %v3168_v24, %v3080_v11  ;;  %v7533_v24 = vld [vmem:[#allocation2 + $0x30] sm:$0xf]  ;;  %v8933_v11 = vld [vmem:[#allocation2 + $0x44] sm:$0xf0] }
 0x1bc   : > { %v3258_v62 = vadd.f32 %v3257_v42, %v3169_v23 }
 0x1bd   : > { %3296 = vmatmul.bf16.gmra.mxu0 %v7214_v51  ;;  %3385 = vmatmul.bf16.gmra.mxu1 %v7218_v48  ;;  %v8930_v51 = vld [vmem:[#allocation2 + $0x34] sm:$0xf]  ;;  %v7535_v48 = vld [vmem:[#allocation2 + $0x48] sm:$0xf0] }
 0x1be   : > { %v10584_v44 = vadd.f32 %v3346_v34, %v3258_v62  ;;  %v7534_v62 = vor.u32 %v8933_v11, %v7533_v24 }
 0x1bf   : > { %v3081_v30 = vpop.f32.mrf.mxu2  ;;  %v3170_v46 = vpop.f32.mrf.mxu3 }
 0x1c0   : > { %v3082_v47 = vadd.f32 %v3081_v30, %v10404_v2  ;;  %v8878_v2 = vld [vmem:[#allocation2 + $0x2e4] sm:$0xf]  ;;  %v8934_v30 = vld [vmem:[#allocation2 + $0x4c] sm:$0xf0] }
 0x1c1   : > { %v7242_v60 = vor.u32 %v8878_v2, %v7239_v8  ;;  %v7557_v2 = vld [vmem:[#allocation2 + $0x60] sm:$0xf]  ;;  %v8939_v8 = vld [vmem:[#allocation2 + $0x74] sm:$0xf0] }
 0x1c2   : > { %v3259_v22 = vpop.f32.mrf.mxu0  ;;  %v3348_v58 = vpop.f32.mrf.mxu1  ;;  %v3171_v49 = vadd.f32 %v3170_v46, %v3082_v47  ;;  %v8931_v46 = vld [vmem:[#allocation2 + $0x3c] sm:$0xf]  ;;  %v7543_v47 = vld [vmem:[#allocation2 + $0x50] sm:$0xf0] }
 0x1c4   : > { %v3260_v0 = vadd.f32 %v3259_v22, %v3171_v49  ;;  %3123 = vmatmul.bf16.gmra.mxu2 %v7230_v14  ;;  %3212 = vmatmul.bf16.gmra.mxu3 %v7234_v59  ;;  %v7542_v49 = vor.u32 %v8934_v30, %v7541_v27 }
 0x1c6   : > { %v10593_v26 = vadd.f32 %v3348_v58, %v3260_v0 }
 0x1c7   : > { %v3084_v52 = vpop.f32.mrf.mxu2  ;;  %v3173_v15 = vpop.f32.mrf.mxu3 }
 0x1c8   : > { %v3085_v45 = vadd.f32 %v3084_v52, %v10425_v12  ;;  %v7538_v12 = vor.u32 %v8930_v51, %v7535_v48  ;;  %v8936_v52 = vld [vmem:[#allocation2 + $0x64] sm:$0xf]  ;;  %v9176_v48 = vld [vmem:[%s11330_s4 + $0x330] sm:$0xff] }
 0x1c9   : > { %5982 = vmatpush.bf16.msrb.mxu0 %v9176_v48 }
 0x1ca   : > { %v3262_v3 = vpop.f32.mrf.mxu0  ;;  %v3351_v5 = vpop.f32.mrf.mxu1  ;;  %v3174_v40 = vadd.f32 %v3173_v15, %v3085_v45  ;;  %v7559_v15 = vld [vmem:[#allocation2 + $0x78] sm:$0xf0]  ;;  %v3003_v45 = vadd.f32 %v10203_v32, %v10201_v16  ;;  %v9184_v16 = vld [vmem:[%s11330_s4 + $0x370] sm:$0xff]  ;;  %v7565_v32 = vld [vmem:[#allocation2 + $0x68] sm:$0xf] }
 0x1cb   : > { %6071 = vmatpush.bf16.msrb.mxu1 %v9184_v16  ;;  %v9063_v16 = vld [vmem:[%s11330_s4 + $0x2a8] sm:$0xff] }
 0x1cc   : > { %v3263_v13 = vadd.f32 %v3262_v3, %v3174_v40  ;;  %v7558_v40 = vor.u32 %v8939_v8, %v7557_v2  ;;  %4747 = vmatpush.bf16.msrb.mxu2 %v9063_v16 }
 0x1cd   : > { %3301 = vmatmul.bf16.gmra.mxu0 %v7238_v54  ;;  %3390 = vmatmul.bf16.gmra.mxu1 %v7242_v60 }
 0x1ce   : > { %v10596_v42 = vadd.f32 %v3351_v5, %v3263_v13  ;;  %v7562_v13 = vor.u32 %v8936_v52, %v7559_v15 }
 0x1cf   : > { %v3086_v34 = vpop.f32.mrf.mxu2  ;;  %v3175_v23 = vpop.f32.mrf.mxu3 }
 0x1d0   : > { %v3087_v43 = vadd.f32 %v3086_v34, %v10437_v36  ;;  %v7546_v36 = vor.u32 %v8931_v46, %v7543_v47 }
 0x1d2   : > { %v3264_v41 = vpop.f32.mrf.mxu0  ;;  %v3353_v25 = vpop.f32.mrf.mxu1  ;;  %v3176_v55 = vadd.f32 %v3175_v23, %v3087_v43  ;;  %v8940_v23 = vld [vmem:[#allocation2 + $0x7c] sm:$0xf0]  ;;  %v8937_v43 = vld [vmem:[#allocation2 + $0x6c] sm:$0xf] }
 0x1d4   : > { %v3265_v61 = vadd.f32 %v3264_v41, %v3176_v55  ;;  %4397 = vmatmul.bf16.vlgmr.msra.gmra.mxu2 %v7534_v62  ;;  %4486 = vmatmul.bf16.vlgmr.msra.gmra.mxu3 %v7538_v12  ;;  %v7567_v62 = vld [vmem:[#allocation2 + $0x80] sm:$0xf0] }
 0x1d5   : > { %v7570_v27 = vor.u32 %v8937_v43, %v7567_v62  ;;  %v8951_v43 = vld [vmem:[#allocation2 + $0xd4] sm:$0xf0]  ;;  %v8948_v62 = vld [vmem:[#allocation2 + $0xc4] sm:$0xf] }
 0x1d6   : > { %v10599_v14 = vadd.f32 %v3353_v25, %v3265_v61  ;;  %v7566_v61 = vor.u32 %v8940_v23, %v7565_v32  ;;  %v7605_v23 = vld [vmem:[#allocation2 + $0xc0] sm:$0xf] }
 0x1d7   : > { %v3089_v59 = vpop.f32.mrf.mxu2  ;;  %v3178_v22 = vpop.f32.mrf.mxu3 }
 0x1d8   : > { %v3090_v58 = vadd.f32 %v3089_v59, %v10195_v38  ;;  %v9072_v38 = vld [vmem:[%s11330_s4 + $0x2f0] sm:$0xff] }
 0x1d9   : > { %4835 = vmatpush.bf16.msrb.mxu3 %v9072_v38 }
 0x1da   : > { %v3267_v50 = vpop.f32.mrf.mxu0  ;;  %v3356_v0 = vpop.f32.mrf.mxu1  ;;  %v3179_v57 = vadd.f32 %v3178_v22, %v3090_v58  ;;  %v7581_v22 = vld [vmem:[#allocation2 + $0x90] sm:$0xf]  ;;  %v8945_v58 = vld [vmem:[#allocation2 + $0xa4] sm:$0xf0] }
 0x1dc   : > { %v3268_v39 = vadd.f32 %v3267_v50, %v3179_v57  ;;  %v3008_v50 = vadd.f32 %v10230_v20, %v10228_v17 }
 0x1dd   : > { %4575 = vmatmul.bf16.vlgmr.msra.gmra.mxu0 %v7542_v49  ;;  %4664 = vmatmul.bf16.vlgmr.msra.gmra.mxu1 %v7546_v36  ;;  %v8942_v49 = vld [vmem:[#allocation2 + $0x94] sm:$0xf]  ;;  %v7583_v36 = vld [vmem:[#allocation2 + $0xa8] sm:$0xf0] }
 0x1de   : > { %v10610_v54 = vadd.f32 %v3356_v0, %v3268_v39  ;;  %v7582_v39 = vor.u32 %v8945_v58, %v7581_v22  ;;  %v7586_v2 = vor.u32 %v8942_v49, %v7583_v36  ;;  %v9175_v36 = vld [vmem:[%s11330_s4 + $0x328] sm:$0xff] }
 0x1df   : > { %v3091_v60 = vpop.f32.mrf.mxu2  ;;  %v3180_v3 = vpop.f32.mrf.mxu3  ;;  %5983 = vmatpush.bf16.msrb.mxu0 %v9175_v36 }
 0x1e0   : > { %v3092_v5 = vadd.f32 %v3091_v60, %v3003_v45  ;;  %v7589_v45 = vld [vmem:[#allocation2 + $0x98] sm:$0xf]  ;;  %v8946_v60 = vld [vmem:[#allocation2 + $0xac] sm:$0xf0] }
 0x1e2   : > { %v3269_v24 = vpop.f32.mrf.mxu0  ;;  %v3358_v11 = vpop.f32.mrf.mxu1  ;;  %v3181_v51 = vadd.f32 %v3180_v3, %v3092_v5  ;;  %v8943_v3 = vld [vmem:[#allocation2 + $0x9c] sm:$0xf]  ;;  %v7591_v5 = vld [vmem:[#allocation2 + $0xb0] sm:$0xf0] }
 0x1e4   : > { %v3270_v34 = vadd.f32 %v3269_v24, %v3181_v51  ;;  %4402 = vmatmul.bf16.gmra.mxu2 %v7558_v40  ;;  %4491 = vmatmul.bf16.gmra.mxu3 %v7562_v13  ;;  %v7590_v24 = vor.u32 %v8946_v60, %v7589_v45 }
 0x1e6   : > { %v10618_v12 = vadd.f32 %v3358_v11, %v3270_v34  ;;  %v7594_v11 = vor.u32 %v8943_v3, %v7591_v5 }
 0x1e7   : > { %v3094_v41 = vpop.f32.mrf.mxu2  ;;  %v3183_v25 = vpop.f32.mrf.mxu3 }
 0x1e8   : > { %v3095_v55 = vadd.f32 %v3094_v41, %v10217_v19  ;;  %v7607_v41 = vld [vmem:[#allocation2 + $0xd8] sm:$0xf0] }
 0x1ea   : > { %v3272_v30 = vpop.f32.mrf.mxu0  ;;  %v3361_v46 = vpop.f32.mrf.mxu1  ;;  %v3184_v47 = vadd.f32 %v3183_v25, %v3095_v55  ;;  %v11477_v25 = vld [vmem:[#allocation5_spill] sm:$0xff] }
 0x1eb   : > { %v3013_v55 = vadd.f32 %v11477_v25, %v10265_v18  ;;  %v9183_v18 = vld [vmem:[%s11330_s4 + $0x368] sm:$0xff] }
 0x1ec   : > { %v3273_v59 = vadd.f32 %v3272_v30, %v3184_v47  ;;  %v7606_v47 = vor.u32 %v8951_v43, %v7605_v23  ;;  %6072 = vmatpush.bf16.msrb.mxu1 %v9183_v18 }
 0x1ed   : > { %4580 = vmatmul.bf16.gmra.mxu0 %v7566_v61  ;;  %4669 = vmatmul.bf16.gmra.mxu1 %v7570_v27 }
 0x1ee   : > { %v10623_v0 = vadd.f32 %v3361_v46, %v3273_v59  ;;  %v7610_v59 = vor.u32 %v8948_v62, %v7607_v41 }
 0x1ef   : > { %v3096_v57 = vpop.f32.mrf.mxu2  ;;  %v3185_v29 = vpop.f32.mrf.mxu3 }
 0x1f0   : > { %11475 = vst [vmem:[#allocation17_spill] sm:$0xff] %v10623_v0  ;;  %v3097_v19 = vadd.f32 %v3096_v57, %v3008_v50  ;;  %v7613_v57 = vld [vmem:[#allocation2 + $0xc8] sm:$0xf] }
 0x1f2   : > { %v3274_v8 = vpop.f32.mrf.mxu0  ;;  %v3363_v52 = vpop.f32.mrf.mxu1  ;;  %v3186_v15 = vadd.f32 %v3185_v29, %v3097_v19  ;;  %v8952_v29 = vld [vmem:[#allocation2 + $0xdc] sm:$0xf0]  ;;  %v8949_v19 = vld [vmem:[#allocation2 + $0xcc] sm:$0xf] }
 0x1f3   : > { %v7614_v45 = vor.u32 %v8952_v29, %v7613_v57 }
 0x1f4   : > { %v3275_v38 = vadd.f32 %v3274_v8, %v3186_v15  ;;  %4407 = vmatmul.bf16.gmra.mxu2 %v7582_v39  ;;  %4496 = vmatmul.bf16.gmra.mxu3 %v7586_v2  ;;  %v7615_v39 = vld [vmem:[#allocation2 + $0xe0] sm:$0xf0]  ;;  %v11480_v15 = vld [vmem:[#allocation6_spill] sm:$0xff] }
 0x1f5   : > { %v7618_v60 = vor.u32 %v8949_v19, %v7615_v39 }
 0x1f6   : > { %v10625_v40 = vadd.f32 %v3363_v52, %v3275_v38 }
 0x1f7   : > { %v3099_v17 = vpop.f32.mrf.mxu2  ;;  %v3188_v20 = vpop.f32.mrf.mxu3 }
 0x1f8   : > { %11476 = vst [vmem:[#allocation18_spill] sm:$0xff] %v10625_v40  ;;  %v3100_v13 = vadd.f32 %v3099_v17, %v10257_v37  ;;  %v9071_v37 = vld [vmem:[%s11330_s4 + $0x2e8] sm:$0xff] }
 0x1f9   : > { %4836 = vmatpush.bf16.msrb.mxu3 %v9071_v37 }
 0x1fa   : > { %v3277_v51 = vpop.f32.mrf.mxu0  ;;  %v3366_v48 = vpop.f32.mrf.mxu1  ;;  %v3189_v34 = vadd.f32 %v3188_v20, %v3100_v13  ;;  %v7629_v13 = vld [vmem:[#allocation2 + $0xf0] sm:$0xf] }
 0x1fc   : > { %v3278_v32 = vadd.f32 %v3277_v51, %v3189_v34  ;;  %v7631_v51 = vld [vmem:[#allocation2 + $0x108] sm:$0xf0]  ;;  %v11482_v34 = vld [vmem:[#allocation8_spill] sm:$0xff] }
 0x1fd   : > { %4585 = vmatmul.bf16.gmra.mxu0 %v7590_v24  ;;  %4674 = vmatmul.bf16.gmra.mxu1 %v7594_v11  ;;  %v8957_v24 = vld [vmem:[#allocation2 + $0x104] sm:$0xf0]  ;;  %v8954_v11 = vld [vmem:[#allocation2 + $0xf4] sm:$0xf] }
 0x1fe   : > { %v10636_v61 = vadd.f32 %v3366_v48, %v3278_v32  ;;  %v11481_v48 = vld [vmem:[#allocation7_spill] sm:$0xff]  ;;  %v7630_v41 = vor.u32 %v8957_v24, %v7629_v13  ;;  %v7634_v37 = vor.u32 %v8954_v11, %v7631_v51 }
 0x1ff   : > { %v3101_v27 = vpop.f32.mrf.mxu2  ;;  %v3190_v30 = vpop.f32.mrf.mxu3  ;;  %v3018_v16 = vadd.f32 %v11482_v34, %v11481_v48 }
 0x200   : > { %11478 = vst [vmem:[#allocation5_spill] sm:$0xff] %v10636_v61  ;;  %v3102_v46 = vadd.f32 %v3101_v27, %v3013_v55 }
 0x202   : > { %v3279_v22 = vpop.f32.mrf.mxu0  ;;  %v3368_v58 = vpop.f32.mrf.mxu1  ;;  %v3191_v49 = vadd.f32 %v3190_v30, %v3102_v46  ;;  %v7637_v46 = vld [vmem:[#allocation2 + $0xf8] sm:$0xf] }
 0x204   : > { %v3280_v50 = vadd.f32 %v3279_v22, %v3191_v49  ;;  %4412 = vmatmul.bf16.gmra.mxu2 %v7606_v47  ;;  %4501 = vmatmul.bf16.gmra.mxu3 %v7610_v59  ;;  %v8958_v47 = vld [vmem:[#allocation2 + $0x10c] sm:$0xf0]  ;;  %v8955_v59 = vld [vmem:[#allocation2 + $0xfc] sm:$0xf]  ;;  %v7639_v22 = vld [vmem:[#allocation2 + $0x110] sm:$0xf0] }
 0x205   : > { %v7638_v57 = vor.u32 %v8958_v47, %v7637_v46  ;;  %v7642_v29 = vor.u32 %v8955_v59, %v7639_v22  ;;  %v7663_v46 = vld [vmem:[#allocation2 + $0x140] sm:$0xf0] }
 0x206   : > { %v10644_v2 = vadd.f32 %v3368_v58, %v3280_v50  ;;  %v11485_v50 = vld [vmem:[#allocation9_spill] sm:$0xff] }
 0x207   : > { %v3104_v8 = vpop.f32.mrf.mxu2  ;;  %v3193_v52 = vpop.f32.mrf.mxu3 }
 0x208   : > { %11479 = vst [vmem:[#allocation19_spill] sm:$0xff] %v10644_v2  ;;  %v3105_v38 = vadd.f32 %v3104_v8, %v11480_v15 }
 0x20a   : > { %v3282_v3 = vpop.f32.mrf.mxu0  ;;  %v3371_v5 = vpop.f32.mrf.mxu1  ;;  %v3194_v17 = vadd.f32 %v3193_v52, %v3105_v38  ;;  %v9062_v52 = vld [vmem:[%s11330_s4 + $0x2a0] sm:$0xff] }
 0x20b   : > { %v7653_v38 = vld [vmem:[#allocation2 + $0x120] sm:$0xf]  ;;  %4748 = vmatpush.bf16.msrb.mxu2 %v9062_v52  ;;  %v8969_v52 = vld [vmem:[#allocation2 + $0x164] sm:$0xf0] }
 0x20c   : > { %v3283_v20 = vadd.f32 %v3282_v3, %v3194_v17  ;;  %v7655_v3 = vld [vmem:[#allocation2 + $0x138] sm:$0xf0]  ;;  %v11486_v17 = vld [vmem:[#allocation10_spill] sm:$0xff] }
 0x20d   : > { %4590 = vmatmul.bf16.gmra.mxu0 %v7614_v45  ;;  %4679 = vmatmul.bf16.gmra.mxu1 %v7618_v60  ;;  %v8963_v45 = vld [vmem:[#allocation2 + $0x134] sm:$0xf0]  ;;  %v8960_v60 = vld [vmem:[#allocation2 + $0x124] sm:$0xf] }
 0x20e   : > { %v10649_v32 = vadd.f32 %v3371_v5, %v3283_v20  ;;  %v9070_v5 = vld [vmem:[%s11330_s4 + $0x2e0] sm:$0xff]  ;;  %v11487_v20 = vld [vmem:[#allocation11_spill] sm:$0xff]  ;;  %v7654_v34 = vor.u32 %v8963_v45, %v7653_v38  ;;  %v7679_v38 = vld [vmem:[#allocation2 + $0x168] sm:$0xf0] }
 0x20f   : > { %v3106_v23 = vpop.f32.mrf.mxu2  ;;  %v3195_v43 = vpop.f32.mrf.mxu3  ;;  %v3023_v13 = vadd.f32 %v11487_v20, %v11486_v17  ;;  %4837 = vmatpush.bf16.msrb.mxu3 %v9070_v5  ;;  %v11492_v5 = vld [vmem:[#allocation13_spill] sm:$0xff] }
 0x210   : > { %11483 = vst [vmem:[#allocation6_spill] sm:$0xff] %v10649_v32  ;;  %v3107_v62 = vadd.f32 %v3106_v23, %v3018_v16  ;;  %v7658_v16 = vor.u32 %v8960_v60, %v7655_v3 }
 0x212   : > { %v3284_v25 = vpop.f32.mrf.mxu0  ;;  %v3373_v55 = vpop.f32.mrf.mxu1  ;;  %v3196_v27 = vadd.f32 %v3195_v43, %v3107_v62 }
 0x214   : > { %v3285_v30 = vadd.f32 %v3284_v25, %v3196_v27  ;;  %4417 = vmatmul.bf16.gmra.mxu2 %v7630_v41  ;;  %4506 = vmatmul.bf16.gmra.mxu3 %v7634_v37  ;;  %v9174_v41 = vld [vmem:[%s11330_s4 + $0x320] sm:$0xff] }
 0x215   : > { %v9182_v25 = vld [vmem:[%s11330_s4 + $0x360] sm:$0xff]  ;;  %5984 = vmatpush.bf16.msrb.mxu0 %v9174_v41 }
 0x216   : > { %v10651_v58 = vadd.f32 %v3373_v55, %v3285_v30  ;;  %v7661_v55 = vld [vmem:[#allocation2 + $0x128] sm:$0xf]  ;;  %v8964_v27 = vld [vmem:[#allocation2 + $0x13c] sm:$0xf0]  ;;  %v8961_v30 = vld [vmem:[#allocation2 + $0x12c] sm:$0xf]  ;;  %6073 = vmatpush.bf16.msrb.mxu1 %v9182_v25 }
 0x217   : > { %v3109_v49 = vpop.f32.mrf.mxu2  ;;  %v3198_v36 = vpop.f32.mrf.mxu3 }
 0x218   : > { %11484 = vst [vmem:[#allocation7_spill] sm:$0xff] %v10651_v58  ;;  %v3110_v18 = vadd.f32 %v3109_v49, %v11485_v50  ;;  %v11490_v49 = vld [vmem:[#allocation12_spill] sm:$0xff]  ;;  %v7662_v50 = vor.u32 %v8964_v27, %v7661_v55  ;;  %v11494_v55 = vld [vmem:[#allocation14_spill] sm:$0xff] }
 0x21a   : > { %v3287_v19 = vpop.f32.mrf.mxu0  ;;  %v3376_v39 = vpop.f32.mrf.mxu1  ;;  %v3199_v8 = vadd.f32 %v3198_v36, %v3110_v18  ;;  %v7666_v18 = vor.u32 %v8961_v30, %v7663_v46 }
 0x21c   : > { %v3288_v15 = vadd.f32 %v3287_v19, %v3199_v8  ;;  %v7677_v8 = vld [vmem:[#allocation2 + $0x150] sm:$0xf] }
 0x21d   : > { %4595 = vmatmul.bf16.gmra.mxu0 %v7638_v57  ;;  %4684 = vmatmul.bf16.gmra.mxu1 %v7642_v29  ;;  %v7678_v20 = vor.u32 %v8969_v52, %v7677_v8 }
 0x21e   : > { %v10662_v24 = vadd.f32 %v3376_v39, %v3288_v15  ;;  %v8966_v15 = vld [vmem:[#allocation2 + $0x154] sm:$0xf] }
 0x21f   : > { %v3111_v11 = vpop.f32.mrf.mxu2  ;;  %v3200_v51 = vpop.f32.mrf.mxu3 }
 0x220   : > { %11488 = vst [vmem:[#allocation8_spill] sm:$0xff] %v10662_v24  ;;  %v3112_v48 = vadd.f32 %v3111_v11, %v3023_v13  ;;  %v7682_v13 = vor.u32 %v8966_v15, %v7679_v38  ;;  %v11496_v38 = vld [vmem:[#allocation15_spill] sm:$0xff] }
 0x222   : > { %v3289_v23 = vpop.f32.mrf.mxu0  ;;  %v3378_v43 = vpop.f32.mrf.mxu1  ;;  %v3201_v62 = vadd.f32 %v3200_v51, %v3112_v48 }
 0x224   : > { %v3290_v37 = vadd.f32 %v3289_v23, %v3201_v62  ;;  %4422 = vmatmul.bf16.gmra.mxu2 %v7654_v34  ;;  %4511 = vmatmul.bf16.gmra.mxu3 %v7658_v16  ;;  %v7685_v16 = vld [vmem:[#allocation2 + $0x158] sm:$0xf]  ;;  %v8970_v23 = vld [vmem:[#allocation2 + $0x16c] sm:$0xf0]  ;;  %v7687_v62 = vld [vmem:[#allocation2 + $0x170] sm:$0xf0] }
 0x225   : > { %v7686_v30 = vor.u32 %v8970_v23, %v7685_v16  ;;  %v8976_v16 = vld [vmem:[#allocation2 + $0x19c] sm:$0xf0]  ;;  %v8973_v23 = vld [vmem:[#allocation2 + $0x18c] sm:$0xf] }
 0x226   : > { %v10670_v47 = vadd.f32 %v3378_v43, %v3290_v37  ;;  %v8967_v43 = vld [vmem:[#allocation2 + $0x15c] sm:$0xf] }
 0x227   : > { %v3114_v59 = vpop.f32.mrf.mxu2  ;;  %v3203_v22 = vpop.f32.mrf.mxu3  ;;  %v7690_v46 = vor.u32 %v8967_v43, %v7687_v62  ;;  %v7711_v43 = vld [vmem:[#allocation2 + $0x1a0] sm:$0xf0] }
 0x228   : > { %11489 = vst [vmem:[#allocation9_spill] sm:$0xff] %v10670_v47  ;;  %v3115_v36 = vadd.f32 %v3114_v59, %v11490_v49 }
 0x22a   : > { %v3292_v57 = vpop.f32.mrf.mxu0  ;;  %v3381_v29 = vpop.f32.mrf.mxu1  ;;  %v3204_v19 = vadd.f32 %v3203_v22, %v3115_v36  ;;  %v9061_v36 = vld [vmem:[%s11330_s4 + $0x298] sm:$0xff] }
 0x22b   : > { %4749 = vmatpush.bf16.msrb.mxu2 %v9061_v36 }
 0x22c   : > { %v3293_v39 = vadd.f32 %v3292_v57, %v3204_v19  ;;  %v8975_v57 = vld [vmem:[#allocation2 + $0x194] sm:$0xf0]  ;;  %v7703_v19 = vld [vmem:[#allocation2 + $0x198] sm:$0xf0] }
 0x22d   : > { %4600 = vmatmul.bf16.gmra.mxu0 %v7662_v50  ;;  %4689 = vmatmul.bf16.gmra.mxu1 %v7666_v18  ;;  %v7701_v18 = vld [vmem:[#allocation2 + $0x180] sm:$0xf] }
 0x22e   : > { %v10673_v45 = vadd.f32 %v3381_v29, %v3293_v39  ;;  %v8972_v29 = vld [vmem:[#allocation2 + $0x184] sm:$0xf]  ;;  %v9069_v39 = vld [vmem:[%s11330_s4 + $0x2d8] sm:$0xff] }
 0x22f   : > { %v3116_v60 = vpop.f32.mrf.mxu2  ;;  %v3205_v3 = vpop.f32.mrf.mxu3  ;;  %4838 = vmatpush.bf16.msrb.mxu3 %v9069_v39 }
 0x230   : > { %11491 = vst [vmem:[#allocation10_spill] sm:$0xff] %v10673_v45  ;;  %v3117_v17 = vadd.f32 %v3116_v60, %v11492_v5  ;;  %v7706_v5 = vor.u32 %v8972_v29, %v7703_v19  ;;  %v7727_v29 = vld [vmem:[#allocation2 + $0x1c8] sm:$0xf0] }
 0x232   : > { %v3294_v11 = vpop.f32.mrf.mxu0  ;;  %v3383_v51 = vpop.f32.mrf.mxu1  ;;  %v3206_v48 = vadd.f32 %v3205_v3, %v3117_v17  ;;  %v7702_v3 = vor.u32 %v8975_v57, %v7701_v18  ;;  %v8981_v18 = vld [vmem:[#allocation2 + $0x1c4] sm:$0xf0]  ;;  %v8978_v57 = vld [vmem:[#allocation2 + $0x1b4] sm:$0xf] }
 0x234   : > { %v3295_v34 = vadd.f32 %v3294_v11, %v3206_v48  ;;  %4427 = vmatmul.bf16.gmra.mxu2 %v7678_v20  ;;  %4516 = vmatmul.bf16.gmra.mxu3 %v7682_v13  ;;  %v9173_v11 = vld [vmem:[%s11330_s4 + $0x318] sm:$0xff] }
 0x235   : > { %5985 = vmatpush.bf16.msrb.mxu0 %v9173_v11  ;;  %v8982_v11 = vld [vmem:[#allocation2 + $0x1cc] sm:$0xf0] }
 0x236   : > { %v10676_v41 = vadd.f32 %v3383_v51, %v3295_v34  ;;  %v9181_v51 = vld [vmem:[%s11330_s4 + $0x358] sm:$0xff]  ;;  %v7709_v34 = vld [vmem:[#allocation2 + $0x188] sm:$0xf] }
 0x237   : > { %v3119_v37 = vpop.f32.mrf.mxu2  ;;  %v3208_v25 = vpop.f32.mrf.mxu3  ;;  %6074 = vmatpush.bf16.msrb.mxu1 %v9181_v51  ;;  %v8979_v51 = vld [vmem:[#allocation2 + $0x1bc] sm:$0xf] }
 0x238   : > { %11493 = vst [vmem:[#allocation11_spill] sm:$0xff] %v10676_v41  ;;  %v3120_v27 = vadd.f32 %v3119_v37, %v11494_v55  ;;  %v11498_v55 = vld [vmem:[#allocation16_spill] sm:$0xff] }
 0x23a   : > { %v3297_v59 = vpop.f32.mrf.mxu0  ;;  %v3386_v22 = vpop.f32.mrf.mxu1  ;;  %v3209_v49 = vadd.f32 %v3208_v25, %v3120_v27 }
 0x23c   : > { %v3298_v50 = vadd.f32 %v3297_v59, %v3209_v49 }
 0x23d   : > { %4605 = vmatmul.bf16.gmra.mxu0 %v7686_v30  ;;  %4694 = vmatmul.bf16.gmra.mxu1 %v7690_v46  ;;  %v7710_v30 = vor.u32 %v8976_v16, %v7709_v34  ;;  %v7714_v46 = vor.u32 %v8973_v23, %v7711_v43 }
 0x23e   : > { %v10685_v8 = vadd.f32 %v3386_v22, %v3298_v50  ;;  %v7725_v50 = vld [vmem:[#allocation2 + $0x1b0] sm:$0xf] }
 0x23f   : > { %v3121_v52 = vpop.f32.mrf.mxu2  ;;  %v3210_v15 = vpop.f32.mrf.mxu3 }
 0x240   : > { %11495 = vst [vmem:[#allocation12_spill] sm:$0xff] %v10685_v8  ;;  %v3122_v60 = vadd.f32 %v3121_v52, %v11496_v38  ;;  %v7726_v38 = vor.u32 %v8981_v18, %v7725_v50 }
 0x242   : > { %v3299_v17 = vpop.f32.mrf.mxu0  ;;  %v3388_v20 = vpop.f32.mrf.mxu1  ;;  %v3211_v13 = vadd.f32 %v3210_v15, %v3122_v60  ;;  %v7730_v60 = vor.u32 %v8978_v57, %v7727_v29 }
 0x244   : > { %v3300_v48 = vadd.f32 %v3299_v17, %v3211_v13  ;;  %4432 = vmatmul.bf16.gmra.mxu2 %v7702_v3  ;;  %4521 = vmatmul.bf16.gmra.mxu3 %v7706_v5  ;;  %v7733_v13 = vld [vmem:[#allocation2 + $0x1b8] sm:$0xf] }
 0x246   : > { %v10694_v62 = vadd.f32 %v3388_v20, %v3300_v48  ;;  %v7735_v48 = vld [vmem:[#allocation2 + $0x1d0] sm:$0xf0] }
 0x247   : > { %v3124_v37 = vpop.f32.mrf.mxu2  ;;  %v3213_v25 = vpop.f32.mrf.mxu3 }
 0x248   : > { %11497 = vst [vmem:[#allocation13_spill] sm:$0xff] %v10694_v62  ;;  %v3125_v27 = vadd.f32 %v3124_v37, %v11498_v55  ;;  %v7734_v37 = vor.u32 %v8982_v11, %v7733_v13  ;;  %v8988_v13 = vld [vmem:[#allocation2 + $0x1fc] sm:$0xf0]  ;;  %v8985_v11 = vld [vmem:[#allocation2 + $0x1ec] sm:$0xf] }
 0x24a   : > { %v3302_v59 = vpop.f32.mrf.mxu0  ;;  %v3391_v22 = vpop.f32.mrf.mxu1  ;;  %v3214_v49 = vadd.f32 %v3213_v25, %v3125_v27  ;;  %v7738_v25 = vor.u32 %v8979_v51, %v7735_v48  ;;  %v9060_v27 = vld [vmem:[%s11330_s4 + $0x290] sm:$0xff]  ;;  %v7759_v51 = vld [vmem:[#allocation2 + $0x200] sm:$0xf0] }
 0x24b   : > { %4750 = vmatpush.bf16.msrb.mxu2 %v9060_v27  ;;  %v7773_v27 = vld [vmem:[#allocation2 + $0x210] sm:$0xf] }
 0x24c   : > { %v3303_v36 = vadd.f32 %v3302_v59, %v3214_v49  ;;  %v8987_v59 = vld [vmem:[#allocation2 + $0x1f4] sm:$0xf0]  ;;  %v7751_v49 = vld [vmem:[#allocation2 + $0x1f8] sm:$0xf0] }
 0x24d   : > { %4610 = vmatmul.bf16.gmra.mxu0 %v7710_v30  ;;  %4699 = vmatmul.bf16.gmra.mxu1 %v7714_v46  ;;  %v7749_v46 = vld [vmem:[#allocation2 + $0x1e0] sm:$0xf] }
 0x24e   : > { %v10697_v19 = vadd.f32 %v3391_v22, %v3303_v36  ;;  %v8984_v22 = vld [vmem:[#allocation2 + $0x1e4] sm:$0xf]  ;;  %v9068_v36 = vld [vmem:[%s11330_s4 + $0x2d0] sm:$0xff] }
 0x24f   : > { %v3126_v39 = vpop.f32.mrf.mxu2  ;;  %v3215_v52 = vpop.f32.mrf.mxu3  ;;  %4839 = vmatpush.bf16.msrb.mxu3 %v9068_v36 }
 0x250   : > { %11499 = vst [vmem:[#allocation14_spill] sm:$0xff] %v10697_v19  ;;  %v3127_v15 = vadd.f32 %v3126_v39, %v10435_v1  ;;  %v7750_v39 = vor.u32 %v8987_v59, %v7749_v46  ;;  %v8990_v46 = vld [vmem:[#allocation2 + $0x214] sm:$0xf]  ;;  %v7775_v59 = vld [vmem:[#allocation2 + $0x228] sm:$0xf0] }
 0x252   : > { %v3304_v3 = vpop.f32.mrf.mxu0  ;;  %v3393_v5 = vpop.f32.mrf.mxu1  ;;  %v3216_v17 = vadd.f32 %v3215_v52, %v3127_v15  ;;  %v7754_v52 = vor.u32 %v8984_v22, %v7751_v49 }
 0x254   : > { %v3305_v20 = vadd.f32 %v3304_v3, %v3216_v17  ;;  %4437 = vmatmul.bf16.gmra.mxu2 %v7726_v38  ;;  %4526 = vmatmul.bf16.gmra.mxu3 %v7730_v60  ;;  %v9172_v60 = vld [vmem:[%s11330_s4 + $0x310] sm:$0xff]  ;;  %v7757_v17 = vld [vmem:[#allocation2 + $0x1e8] sm:$0xf] }
 0x255   : > { %5986 = vmatpush.bf16.msrb.mxu0 %v9172_v60 }
 0x256   : > { %v10700_v34 = vadd.f32 %v3393_v5, %v3305_v20  ;;  %v9180_v5 = vld [vmem:[%s11330_s4 + $0x350] sm:$0xff] }
 0x257   : > { %v4398_v16 = vpop.f32.mrf.mxu2  ;;  %v4487_v23 = vpop.f32.mrf.mxu3  ;;  %6075 = vmatpush.bf16.msrb.mxu1 %v9180_v5  ;;  %v8991_v5 = vld [vmem:[#allocation2 + $0x21c] sm:$0xf] }
 0x258   : > { %11500 = vst [vmem:[#allocation15_spill] sm:$0xff] %v10700_v34  ;;  %v4488_v43 = vadd.f32 %v4487_v23, %v4398_v16 }
 0x25a   : > { %v4576_v1 = vpop.f32.mrf.mxu0  ;;  %v4665_v55 = vpop.f32.mrf.mxu1 }
 0x25b   : > { %v4577_v30 = vadd.f32 %v4576_v1, %v4488_v43  ;;  %v7758_v43 = vor.u32 %v8988_v13, %v7757_v17  ;;  %v7783_v17 = vld [vmem:[#allocation2 + $0x230] sm:$0xf0] }
 0x25d   : > { %4615 = vmatmul.bf16.gmra.mxu0 %v7734_v37  ;;  %4704 = vmatmul.bf16.gmra.mxu1 %v7738_v25  ;;  %v10708_v50 = vadd.f32 %v4665_v55, %v4577_v30  ;;  %v7762_v37 = vor.u32 %v8985_v11, %v7759_v51  ;;  %v8993_v30 = vld [vmem:[#allocation2 + $0x224] sm:$0xf0] }
 0x25f   : > { %v4400_v18 = vpop.f32.mrf.mxu2  ;;  %v4489_v57 = vpop.f32.mrf.mxu3 }
 0x260   : > { %v4490_v29 = vadd.f32 %v4489_v57, %v4400_v18  ;;  %v7774_v57 = vor.u32 %v8993_v30, %v7773_v27  ;;  %v8996_v27 = vld [vmem:[#allocation2 + $0x244] sm:$0xf]  ;;  %v7799_v30 = vld [vmem:[#allocation2 + $0x258] sm:$0xf0] }
 0x262   : > { %v4578_v15 = vpop.f32.mrf.mxu0  ;;  %v4667_v38 = vpop.f32.mrf.mxu1 }
 0x263   : > { %v4579_v3 = vadd.f32 %v4578_v15, %v4490_v29  ;;  %v7778_v29 = vor.u32 %v8990_v46, %v7775_v59  ;;  %v9067_v46 = vld [vmem:[%s11330_s4 + $0x2c8] sm:$0xff] }
 0x264   : > { %4442 = vmatmul.bf16.gmra.mxu2 %v7750_v39  ;;  %4531 = vmatmul.bf16.gmra.mxu3 %v7754_v52 }
 0x265   : > { %v10716_v20 = vadd.f32 %v4667_v38, %v4579_v3  ;;  %v7781_v38 = vld [vmem:[#allocation2 + $0x218] sm:$0xf]  ;;  %v8994_v3 = vld [vmem:[#allocation2 + $0x22c] sm:$0xf0]  ;;  %4840 = vmatpush.bf16.msrb.mxu3 %v9067_v46  ;;  %v9354_v46 = vld [vmem:[%s11329_s3] ss:$0 sm:$0xff] }
 0x267   : > { %v4403_v48 = vpop.f32.mrf.mxu2  ;;  %v4492_v16 = vpop.f32.mrf.mxu3 }
 0x268   : > { %v4493_v23 = vadd.f32 %v4492_v16, %v4403_v48  ;;  %v7782_v48 = vor.u32 %v8994_v3, %v7781_v38  ;;  %v7786_v16 = vor.u32 %v8991_v5, %v7783_v17  ;;  %v9179_v3 = vld [vmem:[%s11330_s4 + $0x348] sm:$0xff] }
 0x269   : > { %v7805_v5 = vld [vmem:[#allocation2 + $0x248] sm:$0xf]  ;;  %6076 = vmatpush.bf16.msrb.mxu1 %v9179_v3 }
 0x26a   : > { %v4581_v25 = vpop.f32.mrf.mxu0  ;;  %v4670_v1 = vpop.f32.mrf.mxu1 }
 0x26b   : > { %v4582_v55 = vadd.f32 %v4581_v25, %v4493_v23 }
 0x26d   : > { %4620 = vmatmul.bf16.gmra.mxu0 %v7758_v43  ;;  %4709 = vmatmul.bf16.gmra.mxu1 %v7762_v37  ;;  %v10718_v22 = vadd.f32 %v4670_v1, %v4582_v55  ;;  %v9059_v37 = vld [vmem:[%s11330_s4 + $0x288] sm:$0xff]  ;;  %v7797_v1 = vld [vmem:[#allocation2 + $0x240] sm:$0xf]  ;;  %v8999_v55 = vld [vmem:[#allocation2 + $0x254] sm:$0xf0] }
 0x26e   : > { %4751 = vmatpush.bf16.msrb.mxu2 %v9059_v37 }
 0x26f   : > { %v4405_v49 = vpop.f32.mrf.mxu2  ;;  %v4494_v36 = vpop.f32.mrf.mxu3 }
 0x270   : > { %v4495_v18 = vadd.f32 %v4494_v36, %v4405_v49 }
 0x272   : > { %v4583_v39 = vpop.f32.mrf.mxu0  ;;  %v4672_v52 = vpop.f32.mrf.mxu1 }
 0x273   : > { %v4584_v15 = vadd.f32 %v4583_v39, %v4495_v18 }
 0x274   : > { %4447 = vmatmul.bf16.gmra.mxu2 %v7774_v57  ;;  %4536 = vmatmul.bf16.gmra.mxu3 %v7778_v29  ;;  %v7798_v57 = vor.u32 %v8999_v55, %v7797_v1  ;;  %v7802_v29 = vor.u32 %v8996_v27, %v7799_v30 }
 0x275   : > { %v10720_v60 = vadd.f32 %v4672_v52, %v4584_v15  ;;  %v9171_v15 = vld [vmem:[%s11330_s4 + $0x308] sm:$0xff] }
 0x276   : > { %5987 = vmatpush.bf16.msrb.mxu0 %v9171_v15  ;;  %v9356_v15 = vld [vmem:[%s11329_s3 + $0x1] ss:$0 sm:$0xff] }
 0x277   : > { %v4408_v13 = vpop.f32.mrf.mxu2  ;;  %v4497_v11 = vpop.f32.mrf.mxu3 }
 0x278   : > { %v4498_v51 = vadd.f32 %v4497_v11, %v4408_v13  ;;  %v9000_v13 = vld [vmem:[#allocation2 + $0x25c] sm:$0xf0]  ;;  %v8997_v11 = vld [vmem:[#allocation2 + $0x24c] sm:$0xf] }
 0x279   : > { %v7806_v1 = vor.u32 %v9000_v13, %v7805_v5  ;;  %v9357_v5 = vld [vmem:[%s11329_s3 + $0x3] ss:$0 sm:$0xff] }
 0x27a   : > { %v4586_v23 = vpop.f32.mrf.mxu0  ;;  %v4675_v43 = vpop.f32.mrf.mxu1 }
 0x27b   : > { %v4587_v25 = vadd.f32 %v4586_v23, %v4498_v51  ;;  %v7807_v51 = vld [vmem:[#allocation2 + $0x260] sm:$0xf0]  ;;  %v9305_v23 = vld [vmem:[%s9458_s12 + $0x78] sm:$0xff]  }
 0x27c   : > { %v9280_v37 = vunpack.c.l.bf16 %v9305_v23  ;;  %v7810_v55 = vor.u32 %v8997_v11, %v7807_v51  ;;  %v9005_v11 = vld [vmem:[#allocation2 + $0x284] sm:$0xf0]  ;;  %v9002_v51 = vld [vmem:[#allocation2 + $0x274] sm:$0xf] }
 0x27d   : > { %4625 = vmatmul.bf16.gmra.mxu0 %v7782_v48  ;;  %4714 = vmatmul.bf16.gmra.mxu1 %v7786_v16  ;;  %v10728_v59 = vadd.f32 %v4675_v43, %v4587_v25  ;;  %v9281_v25 = vunpack.c.h.bf16 %v9305_v23 }
 0x27f   : > { %v4410_v49 = vpop.f32.mrf.mxu2  ;;  %v4499_v36 = vpop.f32.mrf.mxu3 }
 0x280   : > { %v4500_v18 = vadd.f32 %v4499_v36, %v4410_v49  ;;  %v499_v49 = vmul.f32 %v9354_v46, %v9280_v37  ;;  %v500_v36 = vmul.f32 %v9354_v46, %v9281_v25 }
 0x282   : > { %v4588_v39 = vpop.f32.mrf.mxu0  ;;  %v4677_v52 = vpop.f32.mrf.mxu1  ;;  %v533_v3 = vadd.f32 %v9356_v15, %v500_v36 }
 0x283   : > { %v4589_v38 = vadd.f32 %v4588_v39, %v4500_v18  ;;  %v9355_v18 = vld [vmem:[%s11329_s3 + $0x2] ss:$0 sm:$0xff] }
 0x284   : > { %4452 = vmatmul.bf16.gmra.mxu2 %v7798_v57  ;;  %4541 = vmatmul.bf16.gmra.mxu3 %v7802_v29  ;;  %v597_v57 = vmul.f32 %v9355_v18, %v9280_v37  ;;  %v598_v39 = vmul.f32 %v9355_v18, %v9281_v25  ;;  %v565_v37 = vmax.f32 %v533_v3, 0.0 }
 0x285   : > { %v10736_v17 = vadd.f32 %v4677_v52, %v4589_v38  ;;  %v7821_v52 = vld [vmem:[#allocation2 + $0x270] sm:$0xf]  ;;  %v532_v38 = vadd.f32 %v9356_v15, %v499_v49 }
 0x286   : > { %v630_v13 = vadd.f32 %v9357_v5, %v597_v57  ;;  %v7822_v18 = vor.u32 %v9005_v11, %v7821_v52  ;;  %v7831_v11 = vld [vmem:[#allocation2 + $0x290] sm:$0xf0] }
 0x287   : > { %v4413_v48 = vpop.f32.mrf.mxu2  ;;  %v4502_v16 = vpop.f32.mrf.mxu3 }
 0x288   : > { %v4503_v43 = vadd.f32 %v4502_v16, %v4413_v48  ;;  %v7823_v48 = vld [vmem:[#allocation2 + $0x288] sm:$0xf0]  ;;  %v631_v16 = vadd.f32 %v9357_v5, %v598_v39  ;;  %v662_v25 = vmax.f32 %v630_v13, 0.0  ;;  %v9003_v13 = vld [vmem:[#allocation2 + $0x27c] sm:$0xf] }
 0x289   : > { %v7826_v15 = vor.u32 %v9002_v51, %v7823_v48 }
 0x28a   : > { %v4591_v27 = vpop.f32.mrf.mxu0  ;;  %v4680_v30 = vpop.f32.mrf.mxu1  ;;  %v663_v49 = vmax.f32 %v631_v16, 0.0 }
 0x28b   : > { %v4592_v29 = vadd.f32 %v4591_v27, %v4503_v43  ;;  %v564_v43 = vmax.f32 %v532_v38, 0.0  ;;  %v9006_v38 = vld [vmem:[#allocation2 + $0x28c] sm:$0xf0] }
 0x28c   : > { %v695_v19 = vpack.c.bf16 %v663_v49, %v565_v37  ;;  %v7834_v37 = vor.u32 %v9003_v13, %v7831_v11  ;;  %v9058_v49 = vld [vmem:[%s11330_s4 + $0x280] sm:$0xff] }
 0x28d   : > { %4630 = vmatmul.bf16.gmra.mxu0 %v7806_v1  ;;  %4719 = vmatmul.bf16.gmra.mxu1 %v7810_v55  ;;  %v10751_v23 = vadd.f32 %v4680_v30, %v4592_v29  ;;  %v694_v34 = vpack.c.bf16 %v662_v25, %v564_v43  ;;  %v7829_v29 = vld [vmem:[#allocation2 + $0x278] sm:$0xf] }
 0x28e   : > { %v790_v39 = vunpack.c.l.b16 %v695_v19  ;;  %v791_v30 = vunpack.c.h.b16 %v695_v19  ;;  %1725 = vst [vmem:[#allocation2 + $0x320] sm:$0xff] %v695_v19  ;;  %v7830_v43 = vor.u32 %v9006_v38, %v7829_v29  ;;  %4752 = vmatpush.bf16.msrb.mxu2 %v9058_v49  ;;  %v9066_v29 = vld [vmem:[%s11330_s4 + $0x2c0] sm:$0xff] }
 0x28f   : > { %v4415_v27 = vpop.f32.mrf.mxu2  ;;  %v4504_v46 = vpop.f32.mrf.mxu3  ;;  %v788_v55 = vunpack.c.l.b16 %v694_v34  ;;  %v789_v62 = vunpack.c.h.b16 %v694_v34  ;;  %1722 = vst [vmem:[#allocation2 + $0x308] sm:$0xff] %v694_v34  ;;  %4841 = vmatpush.bf16.msrb.mxu3 %v9066_v29 }
 0x290   : > { %v4505_v36 = vadd.f32 %v4504_v46, %v4415_v27 }
 0x291   : > { %v10753_v3 = vpack.c.b16 %v790_v39, %v788_v55  ;;  %v10755_v5 = vpack.c.b16 %v791_v30, %v789_v62  ;;  %v9008_v39 = vld [vmem:[#allocation2 + $0x2a4] sm:$0xf]  ;;  %v7847_v30 = vld [vmem:[#allocation2 + $0x2b8] sm:$0xf0] }
 0x292   : > { %v4593_v57 = vpop.f32.mrf.mxu0  ;;  %v4682_v1 = vpop.f32.mrf.mxu1 }
 0x293   : > { %v4594_v8 = vadd.f32 %v4593_v57, %v4505_v36  ;;  %v11393_v34 = vshrl.u32 %v10753_v3, 16  ;;  %v11392_v16 = vshrl.u32 %v10755_v5, 16  ;;  %v11395_v27 = vshll.u32 %v10753_v3, 16  ;;  %v7845_v57 = vld [vmem:[#allocation2 + $0x2a0] sm:$0xf] }
 0x294   : > { %4457 = vmatmul.bf16.gmra.mxu2 %v7822_v18  ;;  %4546 = vmatmul.bf16.gmra.mxu3 %v7826_v15  ;;  %v11394_v36 = vshll.u32 %v10755_v5, 16 }
 0x295   : > { %v10757_v52 = vadd.f32 %v4682_v1, %v4594_v8  ;;  %v1037_v25 = vrot.slane %v11393_v34, 7  ;;  %v1044_v8 = vrot.slane %v11392_v16, 7  ;;  %v9011_v1 = vld [vmem:[#allocation2 + $0x2b4] sm:$0xf0]  ;;  %v7850_v16 = vor.u32 %v9008_v39, %v7847_v30  ;;  %v9009_v39 = vld [vmem:[#allocation2 + $0x2ac] sm:$0xf] }
 0x296   : > { %v7846_v49 = vor.u32 %v9011_v1, %v7845_v57  ;;  %v9012_v1 = vld [vmem:[#allocation2 + $0x2bc] sm:$0xf0]  ;;  %v7855_v30 = vld [vmem:[#allocation2 + $0x2c0] sm:$0xf0] }
 0x297   : > { %v4418_v51 = vpop.f32.mrf.mxu2  ;;  %v4507_v48 = vpop.f32.mrf.mxu3  ;;  %v1040_v15 = vor.u32 %v11395_v27, %v1037_v25  ;;  %v1047_v55 = vor.u32 %v11394_v36, %v1044_v8 }
 0x298   : > { %v4508_v19 = vadd.f32 %v4507_v48, %v4418_v51 }
 0x299   : > { %v1113_v13 = vsel %vm9560_vm2, 0, %v1040_v15  ;;  %v1114_v51 = vsel %vm9560_vm2, 0, %v1047_v55  ;;  %v9178_v15 = vld [vmem:[%s11330_s4 + $0x340] sm:$0xff]  ;;  %v7853_v55 = vld [vmem:[#allocation2 + $0x2a8] sm:$0xf] }
 0x29a   : > { %v4596_v62 = vpop.f32.mrf.mxu0  ;;  %v4685_v46 = vpop.f32.mrf.mxu1  ;;  %v1430_v48 = vunpack.c.l.b16 %v1113_v13  ;;  %6077 = vmatpush.bf16.msrb.mxu1 %v9178_v15 }
 0x29b   : > { %v4597_v18 = vadd.f32 %v4596_v62, %v4508_v19  ;;  %v1434_v19 = vunpack.c.h.b16 %v1113_v13 }
 0x29d   : > { %4635 = vmatmul.bf16.gmra.mxu0 %v7830_v43  ;;  %4724 = vmatmul.bf16.gmra.mxu1 %v7834_v37  ;;  %v10779_v11 = vadd.f32 %v4685_v46, %v4597_v18  ;;  %v1431_v43 = vunpack.c.l.b16 %v1114_v51  ;;  %v1435_v37 = vunpack.c.h.b16 %v1114_v51  ;;  %v9170_v46 = vld [vmem:[%s11330_s4 + $0x300] sm:$0xff] }
 0x29e   : > { %5988 = vmatpush.bf16.msrb.mxu0 %v9170_v46 }
 0x29f   : > { %v4420_v25 = vpop.f32.mrf.mxu2  ;;  %v4509_v8 = vpop.f32.mrf.mxu3  ;;  %v1528_v34 = vpack.c.b16 %v1431_v43, %v1430_v48  ;;  %v1531_v36 = vpack.c.b16 %v1435_v37, %v1434_v19  ;;  %v7858_v48 = vor.u32 %v9009_v39, %v7855_v30  ;;  %v7871_v43 = vld [vmem:[#allocation2 + $0x2e8] sm:$0xf0]  ;;  %v9018_v30 = vld [vmem:[#allocation2 + $0x2ec] sm:$0xf0] }
 0x2a0   : > { %v4510_v62 = vadd.f32 %v4509_v8, %v4420_v25 }
 0x2a1   : > { %1721 = vst [vmem:[#allocation2 + $0x300] sm:$0xff] %v1528_v34  ;;  %v7869_v34 = vld [vmem:[#allocation2 + $0x2d0] sm:$0xf] }
 0x2a2   : > { %v4598_v27 = vpop.f32.mrf.mxu0  ;;  %v4687_v41 = vpop.f32.mrf.mxu1  ;;  %1724 = vst [vmem:[#allocation2 + $0x318] sm:$0xff] %v1531_v36  ;;  %v9014_v36 = vld [vmem:[#allocation2 + $0x2d4] sm:$0xf] }
 0x2a3   : > { %v4599_v18 = vadd.f32 %v4598_v27, %v4510_v62  ;;  %v7854_v27 = vor.u32 %v9012_v1, %v7853_v55  ;;  %v7877_v1 = vld [vmem:[#allocation2 + $0x2d8] sm:$0xf] }
 0x2a4   : > { %4462 = vmatmul.bf16.gmra.mxu2 %v7846_v49  ;;  %4551 = vmatmul.bf16.gmra.mxu3 %v7850_v16  ;;  %v9017_v16 = vld [vmem:[#allocation2 + $0x2e4] sm:$0xf0] }
 0x2a5   : > { %v10789_v57 = vadd.f32 %v4687_v41, %v4599_v18  ;;  %v7870_v46 = vor.u32 %v9017_v16, %v7869_v34  ;;  %v7874_v18 = vor.u32 %v9014_v36, %v7871_v43  ;;  %v9193_v34 = vld [vmem:[%s11330_s4 + $0x3b8] sm:$0xff] }
 0x2a6   : > { %6159 = vmatpush.bf16.msra.mxu2 %v9193_v34  ;;  %v7903_v34 = vld [vmem:[#allocation2 + $0x320] sm:$0xf0] }
 0x2a7   : > { %v4423_v29 = vpop.f32.mrf.mxu2  ;;  %v4512_v13 = vpop.f32.mrf.mxu3 }
 0x2a8   : > { %v4513_v51 = vadd.f32 %v4512_v13, %v4423_v29  ;;  %v9015_v13 = vld [vmem:[#allocation2 + $0x2dc] sm:$0xf]  ;;  %v7893_v36 = vld [vmem:[#allocation2 + $0x300] sm:$0xf]  ;;  %v9020_v43 = vld [vmem:[#allocation2 + $0x304] sm:$0xf] }
 0x2aa   : > { %v4601_v19 = vpop.f32.mrf.mxu0  ;;  %v4690_v25 = vpop.f32.mrf.mxu1 }
 0x2ab   : > { %v4602_v8 = vadd.f32 %v4601_v19, %v4513_v51  ;;  %v7879_v51 = vld [vmem:[#allocation2 + $0x2f0] sm:$0xf0] }
 0x2ad   : > { %4640 = vmatmul.bf16.gmra.mxu0 %v7854_v27  ;;  %4729 = vmatmul.bf16.gmra.mxu1 %v7858_v48  ;;  %v10791_v37 = vadd.f32 %v4690_v25, %v4602_v8  ;;  %v7878_v25 = vor.u32 %v9018_v30, %v7877_v1  ;;  %v7882_v8 = vor.u32 %v9015_v13, %v7879_v51  ;;  %v9209_v51 = vld [vmem:[%s11330_s4 + $0x438] sm:$0xff] }
 0x2ae   : > { %6337 = vmatpush.bf16.msra.mxu0 %v9209_v51 }
 0x2af   : > { %v4425_v41 = vpop.f32.mrf.mxu2  ;;  %v4514_v62 = vpop.f32.mrf.mxu3 }
 0x2b0   : > { %v4515_v49 = vadd.f32 %v4514_v62, %v4425_v41  ;;  %v9023_v62 = vld [vmem:[#allocation2 + $0x314] sm:$0xf0] }
 0x2b1   : > { %v7894_v1 = vor.u32 %v9023_v62, %v7893_v36 }
 0x2b2   : > { %v4603_v15 = vpop.f32.mrf.mxu0  ;;  %v4692_v29 = vpop.f32.mrf.mxu1 }
 0x2b3   : > { %v4604_v55 = vadd.f32 %v4603_v15, %v4515_v49  ;;  %v7895_v49 = vld [vmem:[#allocation2 + $0x318] sm:$0xf0] }
 0x2b4   : > { %4467 = vmatmul.bf16.gmra.mxu2 %v7870_v46  ;;  %4556 = vmatmul.bf16.gmra.mxu3 %v7874_v18  ;;  %v9201_v46 = vld [vmem:[%s11330_s4 + $0x3f8] sm:$0xff]  ;;  %v7898_v30 = vor.u32 %v9020_v43, %v7895_v49 }
 0x2b5   : > { %v10793_v39 = vadd.f32 %v4692_v29, %v4604_v55  ;;  %6248 = vmatpush.bf16.msra.mxu3 %v9201_v46 }
 0x2b7   : > { %v4428_v27 = vpop.f32.mrf.mxu2  ;;  %v4517_v48 = vpop.f32.mrf.mxu3 }
 0x2b8   : > { %v4518_v19 = vadd.f32 %v4517_v48, %v4428_v27  ;;  %v9217_v48 = vld [vmem:[%s11330_s4 + $0x478] sm:$0xff] }
 0x2b9   : > { %6426 = vmatpush.bf16.msra.mxu1 %v9217_v48 }
 0x2ba   : > { %v4606_v45 = vpop.f32.mrf.mxu0  ;;  %v4695_v41 = vpop.f32.mrf.mxu1 }
 0x2bb   : > { %v4607_v16 = vadd.f32 %v4606_v45, %v4518_v19  ;;  %v7901_v19 = vld [vmem:[#allocation2 + $0x308] sm:$0xf] }
 0x2bd   : > { %4645 = vmatmul.bf16.gmra.mxu0 %v7878_v25  ;;  %4734 = vmatmul.bf16.gmra.mxu1 %v7882_v8  ;;  %v10801_v18 = vadd.f32 %v4695_v41, %v4607_v16  ;;  %v9024_v8 = vld [vmem:[#allocation2 + $0x31c] sm:$0xf0]  ;;  %v9021_v41 = vld [vmem:[#allocation2 + $0x30c] sm:$0xf] }
 0x2be   : > { %v7902_v62 = vor.u32 %v9024_v8, %v7901_v19  ;;  %v7906_v49 = vor.u32 %v9021_v41, %v7903_v34  ;;  %v8205_v8 = vld [vmem:[#allocation2 + $0x60] sm:$0xf]  ;;  %v9077_v34 = vld [vmem:[#allocation2 + $0x74] sm:$0xf0] }
 0x2bf   : > { %v4430_v15 = vpop.f32.mrf.mxu2  ;;  %v4519_v29 = vpop.f32.mrf.mxu3 }
 0x2c0   : > { %v4520_v55 = vadd.f32 %v4519_v29, %v4430_v15 }
 0x2c2   : > { %v4608_v45 = vpop.f32.mrf.mxu0  ;;  %v4697_v13 = vpop.f32.mrf.mxu1 }
 0x2c3   : > { %v4609_v27 = vadd.f32 %v4608_v45, %v4520_v55  ;;  %v7549_v55 = vld [vmem:[#allocation2 + $0x40] sm:$0xf]  ;;  %v7551_v45 = vld [vmem:[#allocation2 + $0x58] sm:$0xf0] }
 0x2c4   : > { %4472 = vmatmul.bf16.gmra.mxu2 %v7894_v1  ;;  %4561 = vmatmul.bf16.gmra.mxu3 %v7898_v30  ;;  %v8935_v1 = vld [vmem:[#allocation2 + $0x54] sm:$0xf0]  ;;  %v8932_v30 = vld [vmem:[#allocation2 + $0x44] sm:$0xf] }
 0x2c5   : > { %v10809_v25 = vadd.f32 %v4697_v13, %v4609_v27  ;;  %v7550_v47 = vor.u32 %v8935_v1, %v7549_v55  ;;  %v7554_v24 = vor.u32 %v8932_v30, %v7551_v45  ;;  %v9192_v55 = vld [vmem:[%s11330_s4 + $0x3b0] sm:$0xff]  ;;  %v7575_v30 = vld [vmem:[#allocation2 + $0x88] sm:$0xf0] }
 0x2c6   : > { %6160 = vmatpush.bf16.msra.mxu2 %v9192_v55  ;;  %v8938_v1 = vld [vmem:[#allocation2 + $0x74] sm:$0xf]  ;;  %v8231_v55 = vld [vmem:[#allocation2 + $0xa8] sm:$0xf0] }
 0x2c7   : > { %v4433_v16 = vpop.f32.mrf.mxu2  ;;  %v4522_v36 = vpop.f32.mrf.mxu3  ;;  %v9200_v45 = vld [vmem:[%s11330_s4 + $0x3f0] sm:$0xff] }
 0x2c8   : > { %v4523_v43 = vadd.f32 %v4522_v36, %v4433_v16  ;;  %v9074_v36 = vld [vmem:[#allocation2 + $0x64] sm:$0xf]  ;;  %6249 = vmatpush.bf16.msra.mxu3 %v9200_v45 }
 0x2ca   : > { %v4611_v46 = vpop.f32.mrf.mxu0  ;;  %v4700_v15 = vpop.f32.mrf.mxu1 }
 0x2cb   : > { %v4612_v29 = vadd.f32 %v4611_v46, %v4523_v43  ;;  %v8207_v43 = vld [vmem:[#allocation2 + $0x78] sm:$0xf0] }
 0x2cd   : > { %4650 = vmatmul.bf16.gmra.mxu0 %v7902_v62  ;;  %4739 = vmatmul.bf16.gmra.mxu1 %v7906_v49  ;;  %v10811_v51 = vadd.f32 %v4700_v15, %v4612_v29  ;;  %v8206_v15 = vor.u32 %v9077_v34, %v8205_v8  ;;  %v8210_v29 = vor.u32 %v9074_v36, %v8207_v43  ;;  %v9208_v43 = vld [vmem:[%s11330_s4 + $0x430] sm:$0xff] }
 0x2ce   : > { %v7578_v34 = vor.u32 %v8938_v1, %v7575_v30  ;;  %6338 = vmatpush.bf16.msra.mxu0 %v9208_v43 }
 0x2cf   : > { %v4435_v13 = vpop.f32.mrf.mxu2  ;;  %v4524_v27 = vpop.f32.mrf.mxu3 }
 0x2d0   : > { %v4525_v48 = vadd.f32 %v4524_v27, %v4435_v13 }
 0x2d2   : > { %v4613_v58 = vpop.f32.mrf.mxu0  ;;  %v4702_v16 = vpop.f32.mrf.mxu1 }
 0x2d3   : > { %v4614_v19 = vadd.f32 %v4613_v58, %v4525_v48 }
 0x2d4   : > { %4753 = vmatmul.bf16.vlgmr.msrb.gmra.mxu2 %v7550_v47  ;;  %4842 = vmatmul.bf16.vlgmr.msrb.gmra.mxu3 %v7554_v24  ;;  %v7573_v47 = vld [vmem:[#allocation2 + $0x70] sm:$0xf]  ;;  %v8941_v24 = vld [vmem:[#allocation2 + $0x84] sm:$0xf0] }
 0x2d5   : > { %v10813_v41 = vadd.f32 %v4702_v16, %v4614_v19  ;;  %v7574_v8 = vor.u32 %v8941_v24, %v7573_v47 }
 0x2d7   : > { %v4438_v62 = vpop.f32.mrf.mxu2  ;;  %v4527_v49 = vpop.f32.mrf.mxu3 }
 0x2d8   : > { %v4528_v46 = vadd.f32 %v4527_v49, %v4438_v62  ;;  %v9216_v49 = vld [vmem:[%s11330_s4 + $0x470] sm:$0xff] }
 0x2d9   : > { %6427 = vmatpush.bf16.msra.mxu1 %v9216_v49 }
 0x2da   : > { %v4616_v32 = vpop.f32.mrf.mxu0  ;;  %v4705_v13 = vpop.f32.mrf.mxu1 }
 0x2db   : > { %v4617_v58 = vadd.f32 %v4616_v32, %v4528_v46  ;;  %v8229_v46 = vld [vmem:[#allocation2 + $0x90] sm:$0xf] }
 0x2dd   : > { %5989 = vmatmul.bf16.vlgmr.msrb.gmra.mxu0 %v8206_v15  ;;  %6078 = vmatmul.bf16.vlgmr.msrb.gmra.mxu1 %v8210_v29  ;;  %v10821_v27 = vadd.f32 %v4705_v13, %v4617_v58  ;;  %v9083_v29 = vld [vmem:[#allocation2 + $0xa4] sm:$0xf0]  ;;  %v9080_v13 = vld [vmem:[#allocation2 + $0x94] sm:$0xf] }
 0x2de   : > { %v8230_v1 = vor.u32 %v9083_v29, %v8229_v46  ;;  %v8234_v30 = vor.u32 %v9080_v13, %v8231_v55  ;;  %v8253_v29 = vld [vmem:[#allocation2 + $0xc0] sm:$0xf]  ;;  %v9089_v55 = vld [vmem:[#allocation2 + $0xd4] sm:$0xf0] }
 0x2df   : > { %v4440_v48 = vpop.f32.mrf.mxu2  ;;  %v4529_v16 = vpop.f32.mrf.mxu3 }
 0x2e0   : > { %v4530_v19 = vadd.f32 %v4529_v16, %v4440_v48 }
 0x2e2   : > { %v4618_v32 = vpop.f32.mrf.mxu0  ;;  %v4707_v36 = vpop.f32.mrf.mxu1 }
 0x2e3   : > { %v4619_v62 = vadd.f32 %v4618_v32, %v4530_v19  ;;  %v7597_v19 = vld [vmem:[#allocation2 + $0xa0] sm:$0xf]  ;;  %v7599_v32 = vld [vmem:[#allocation2 + $0xb8] sm:$0xf0] }
 0x2e4   : > { %4758 = vmatmul.bf16.gmra.mxu2 %v7574_v8  ;;  %4847 = vmatmul.bf16.gmra.mxu3 %v7578_v34  ;;  %v8947_v8 = vld [vmem:[#allocation2 + $0xb4] sm:$0xf0]  ;;  %v8944_v34 = vld [vmem:[#allocation2 + $0xa4] sm:$0xf] }
 0x2e5   : > { %v10829_v15 = vadd.f32 %v4707_v36, %v4619_v62  ;;  %v7598_v2 = vor.u32 %v8947_v8, %v7597_v19  ;;  %v7602_v61 = vor.u32 %v8944_v34, %v7599_v32  ;;  %v9191_v19 = vld [vmem:[%s11330_s4 + $0x3a8] sm:$0xff]  ;;  %v8950_v8 = vld [vmem:[#allocation2 + $0xd4] sm:$0xf] }
 0x2e6   : > { %6161 = vmatpush.bf16.msra.mxu2 %v9191_v19  ;;  %v7623_v34 = vld [vmem:[#allocation2 + $0xe8] sm:$0xf0] }
 0x2e7   : > { %v4443_v58 = vpop.f32.mrf.mxu2  ;;  %v4532_v47 = vpop.f32.mrf.mxu3  ;;  %v9199_v32 = vld [vmem:[%s11330_s4 + $0x3e8] sm:$0xff] }
 0x2e8   : > { %v4533_v24 = vadd.f32 %v4532_v47, %v4443_v58  ;;  %v9086_v47 = vld [vmem:[#allocation2 + $0xc4] sm:$0xf]  ;;  %6250 = vmatpush.bf16.msra.mxu3 %v9199_v32  ;;  %v8279_v19 = vld [vmem:[#allocation2 + $0x108] sm:$0xf0] }
 0x2ea   : > { %v4621_v45 = vpop.f32.mrf.mxu0  ;;  %v4710_v48 = vpop.f32.mrf.mxu1 }
 0x2eb   : > { %v4622_v16 = vadd.f32 %v4621_v45, %v4533_v24  ;;  %v8255_v24 = vld [vmem:[#allocation2 + $0xd8] sm:$0xf0] }
 0x2ed   : > { %5994 = vmatmul.bf16.gmra.mxu0 %v8230_v1  ;;  %6083 = vmatmul.bf16.gmra.mxu1 %v8234_v30  ;;  %v10831_v43 = vadd.f32 %v4710_v48, %v4622_v16  ;;  %v8254_v48 = vor.u32 %v9089_v55, %v8253_v29  ;;  %v8258_v16 = vor.u32 %v9086_v47, %v8255_v24  ;;  %v9207_v24 = vld [vmem:[%s11330_s4 + $0x428] sm:$0xff] }
 0x2ee   : > { %v7626_v55 = vor.u32 %v8950_v8, %v7623_v34  ;;  %6339 = vmatpush.bf16.msra.mxu0 %v9207_v24 }
 0x2ef   : > { %v4445_v36 = vpop.f32.mrf.mxu2  ;;  %v4534_v62 = vpop.f32.mrf.mxu3 }
 0x2f0   : > { %v4535_v49 = vadd.f32 %v4534_v62, %v4445_v36 }
 0x2f2   : > { %v4623_v40 = vpop.f32.mrf.mxu0  ;;  %v4712_v58 = vpop.f32.mrf.mxu1 }
 0x2f3   : > { %v4624_v46 = vadd.f32 %v4623_v40, %v4535_v49 }
 0x2f4   : > { %4763 = vmatmul.bf16.gmra.mxu2 %v7598_v2  ;;  %4852 = vmatmul.bf16.gmra.mxu3 %v7602_v61  ;;  %v7621_v2 = vld [vmem:[#allocation2 + $0xd0] sm:$0xf]  ;;  %v8953_v61 = vld [vmem:[#allocation2 + $0xe4] sm:$0xf0] }
 0x2f5   : > { %v10833_v13 = vadd.f32 %v4712_v58, %v4624_v46  ;;  %v7622_v29 = vor.u32 %v8953_v61, %v7621_v2 }
 0x2f7   : > { %11502 = vst [vmem:[#allocation16_spill] sm:$0xff] %v10833_v13  ;;  %v4448_v1 = vpop.f32.mrf.mxu2  ;;  %v4537_v30 = vpop.f32.mrf.mxu3 }
 0x2f8   : > { %v4538_v45 = vadd.f32 %v4537_v30, %v4448_v1  ;;  %v9215_v30 = vld [vmem:[%s11330_s4 + $0x468] sm:$0xff] }
 0x2f9   : > { %6428 = vmatpush.bf16.msra.mxu1 %v9215_v30 }
 0x2fa   : > { %v4626_v0 = vpop.f32.mrf.mxu0  ;;  %v4715_v36 = vpop.f32.mrf.mxu1 }
 0x2fb   : > { %v4627_v40 = vadd.f32 %v4626_v0, %v4538_v45  ;;  %v8277_v45 = vld [vmem:[#allocation2 + $0xf0] sm:$0xf] }
 0x2fd   : > { %5999 = vmatmul.bf16.gmra.mxu0 %v8254_v48  ;;  %6088 = vmatmul.bf16.gmra.mxu1 %v8258_v16  ;;  %v10841_v62 = vadd.f32 %v4715_v36, %v4627_v40  ;;  %v9095_v16 = vld [vmem:[#allocation2 + $0x104] sm:$0xf0]  ;;  %v9092_v36 = vld [vmem:[#allocation2 + $0xf4] sm:$0xf] }
 0x2fe   : > { %v8278_v8 = vor.u32 %v9095_v16, %v8277_v45  ;;  %v8282_v34 = vor.u32 %v9092_v36, %v8279_v19  ;;  %v8301_v16 = vld [vmem:[#allocation2 + $0x120] sm:$0xf]  ;;  %v9101_v19 = vld [vmem:[#allocation2 + $0x134] sm:$0xf0] }
 0x2ff   : > { %11503 = vst [vmem:[#allocation4_spill] sm:$0xff] %v10841_v62  ;;  %v4450_v49 = vpop.f32.mrf.mxu2  ;;  %v4539_v58 = vpop.f32.mrf.mxu3 }
 0x300   : > { %v4540_v46 = vadd.f32 %v4539_v58, %v4450_v49 }
 0x302   : > { %v4628_v0 = vpop.f32.mrf.mxu0  ;;  %v4717_v47 = vpop.f32.mrf.mxu1 }
 0x303   : > { %v4629_v1 = vadd.f32 %v4628_v0, %v4540_v46  ;;  %v7645_v46 = vld [vmem:[#allocation2 + $0x100] sm:$0xf]  ;;  %v7647_v0 = vld [vmem:[#allocation2 + $0x118] sm:$0xf0] }
 0x304   : > { %4768 = vmatmul.bf16.gmra.mxu2 %v7622_v29  ;;  %4857 = vmatmul.bf16.gmra.mxu3 %v7626_v55  ;;  %v8959_v29 = vld [vmem:[#allocation2 + $0x114] sm:$0xf0]  ;;  %v8956_v55 = vld [vmem:[#allocation2 + $0x104] sm:$0xf] }
 0x305   : > { %v10849_v48 = vadd.f32 %v4717_v47, %v4629_v1  ;;  %v7650_v62 = vor.u32 %v8956_v55, %v7647_v0  ;;  %v7671_v55 = vld [vmem:[#allocation2 + $0x148] sm:$0xf0]  ;;  %v9198_v0 = vld [vmem:[%s11330_s4 + $0x3e0] sm:$0xff] }
 0x306   : > { %6251 = vmatpush.bf16.msra.mxu3 %v9198_v0 }
 0x307   : > { %11504 = vst [vmem:[#allocation20_spill] sm:$0xff] %v10849_v48  ;;  %v4453_v40 = vpop.f32.mrf.mxu2  ;;  %v4542_v2 = vpop.f32.mrf.mxu3  ;;  %v7646_v48 = vor.u32 %v8959_v29, %v7645_v46  ;;  %v9190_v46 = vld [vmem:[%s11330_s4 + $0x3a0] sm:$0xff]  ;;  %v8962_v29 = vld [vmem:[#allocation2 + $0x134] sm:$0xf] }
 0x308   : > { %v4543_v61 = vadd.f32 %v4542_v2, %v4453_v40  ;;  %v9098_v2 = vld [vmem:[#allocation2 + $0x124] sm:$0xf]  ;;  %6162 = vmatpush.bf16.msra.mxu2 %v9190_v46  ;;  %v8327_v46 = vld [vmem:[#allocation2 + $0x168] sm:$0xf0] }
 0x30a   : > { %v4631_v32 = vpop.f32.mrf.mxu0  ;;  %v4720_v49 = vpop.f32.mrf.mxu1 }
 0x30b   : > { %v4632_v58 = vadd.f32 %v4631_v32, %v4543_v61  ;;  %v8303_v61 = vld [vmem:[#allocation2 + $0x138] sm:$0xf0] }
 0x30d   : > { %6004 = vmatmul.bf16.gmra.mxu0 %v8278_v8  ;;  %6093 = vmatmul.bf16.gmra.mxu1 %v8282_v34  ;;  %v10851_v24 = vadd.f32 %v4720_v49, %v4632_v58  ;;  %v8302_v49 = vor.u32 %v9101_v19, %v8301_v16  ;;  %v8306_v58 = vor.u32 %v9098_v2, %v8303_v61  ;;  %v9206_v61 = vld [vmem:[%s11330_s4 + $0x420] sm:$0xff] }
 0x30e   : > { %v7674_v19 = vor.u32 %v8962_v29, %v7671_v55  ;;  %6340 = vmatpush.bf16.msra.mxu0 %v9206_v61 }
 0x30f   : > { %11505 = vst [vmem:[#allocation21_spill] sm:$0xff] %v10851_v24  ;;  %v4455_v47 = vpop.f32.mrf.mxu2  ;;  %v4544_v1 = vpop.f32.mrf.mxu3 }
 0x310   : > { %v4545_v30 = vadd.f32 %v4544_v1, %v4455_v47 }
 0x312   : > { %v4633_v13 = vpop.f32.mrf.mxu0  ;;  %v4722_v40 = vpop.f32.mrf.mxu1 }
 0x313   : > { %v4634_v45 = vadd.f32 %v4633_v13, %v4545_v30 }
 0x314   : > { %4773 = vmatmul.bf16.gmra.mxu2 %v7646_v48  ;;  %4862 = vmatmul.bf16.gmra.mxu3 %v7650_v62  ;;  %v7669_v48 = vld [vmem:[#allocation2 + $0x130] sm:$0xf]  ;;  %v8965_v62 = vld [vmem:[#allocation2 + $0x144] sm:$0xf0] }
 0x315   : > { %v10853_v36 = vadd.f32 %v4722_v40, %v4634_v45  ;;  %v7670_v16 = vor.u32 %v8965_v62, %v7669_v48 }
 0x317   : > { %11506 = vst [vmem:[#allocation22_spill] sm:$0xff] %v10853_v36  ;;  %v4458_v8 = vpop.f32.mrf.mxu2  ;;  %v4547_v34 = vpop.f32.mrf.mxu3 }
 0x318   : > { %v4548_v32 = vadd.f32 %v4547_v34, %v4458_v8  ;;  %v9214_v34 = vld [vmem:[%s11330_s4 + $0x460] sm:$0xff] }
 0x319   : > { %6429 = vmatpush.bf16.msra.mxu1 %v9214_v34 }
 0x31a   : > { %v4636_v24 = vpop.f32.mrf.mxu0  ;;  %v4725_v47 = vpop.f32.mrf.mxu1 }
 0x31b   : > { %v4637_v13 = vadd.f32 %v4636_v24, %v4548_v32  ;;  %v8325_v32 = vld [vmem:[#allocation2 + $0x150] sm:$0xf] }
 0x31d   : > { %6009 = vmatmul.bf16.gmra.mxu0 %v8302_v49  ;;  %6098 = vmatmul.bf16.gmra.mxu1 %v8306_v58  ;;  %v10861_v1 = vadd.f32 %v4725_v47, %v4637_v13  ;;  %v9107_v58 = vld [vmem:[#allocation2 + $0x164] sm:$0xf0]  ;;  %v9104_v47 = vld [vmem:[#allocation2 + $0x154] sm:$0xf] }
 0x31e   : > { %v8326_v29 = vor.u32 %v9107_v58, %v8325_v32  ;;  %v8330_v55 = vor.u32 %v9104_v47, %v8327_v46  ;;  %v8349_v58 = vld [vmem:[#allocation2 + $0x180] sm:$0xf]  ;;  %v9113_v46 = vld [vmem:[#allocation2 + $0x194] sm:$0xf0] }
 0x31f   : > { %11507 = vst [vmem:[#allocation23_spill] sm:$0xff] %v10861_v1  ;;  %v4460_v30 = vpop.f32.mrf.mxu2  ;;  %v4549_v40 = vpop.f32.mrf.mxu3 }
 0x320   : > { %v4550_v45 = vadd.f32 %v4549_v40, %v4460_v30 }
 0x322   : > { %v4638_v24 = vpop.f32.mrf.mxu0  ;;  %v4727_v2 = vpop.f32.mrf.mxu1 }
 0x323   : > { %v4639_v8 = vadd.f32 %v4638_v24, %v4550_v45  ;;  %v7693_v45 = vld [vmem:[#allocation2 + $0x160] sm:$0xf]  ;;  %v7695_v24 = vld [vmem:[#allocation2 + $0x178] sm:$0xf0] }
 0x324   : > { %4778 = vmatmul.bf16.gmra.mxu2 %v7670_v16  ;;  %4867 = vmatmul.bf16.gmra.mxu3 %v7674_v19  ;;  %v8971_v16 = vld [vmem:[#allocation2 + $0x174] sm:$0xf0]  ;;  %v8968_v19 = vld [vmem:[#allocation2 + $0x164] sm:$0xf] }
 0x325   : > { %v10869_v49 = vadd.f32 %v4727_v2, %v4639_v8  ;;  %v7698_v1 = vor.u32 %v8968_v19, %v7695_v24  ;;  %v7719_v19 = vld [vmem:[#allocation2 + $0x1a8] sm:$0xf0]  ;;  %v9197_v24 = vld [vmem:[%s11330_s4 + $0x3d8] sm:$0xff] }
 0x326   : > { %6252 = vmatpush.bf16.msra.mxu3 %v9197_v24 }
 0x327   : > { %11508 = vst [vmem:[#allocation24_spill] sm:$0xff] %v10869_v49  ;;  %v4463_v13 = vpop.f32.mrf.mxu2  ;;  %v4552_v48 = vpop.f32.mrf.mxu3  ;;  %v7694_v49 = vor.u32 %v8971_v16, %v7693_v45  ;;  %v8974_v16 = vld [vmem:[#allocation2 + $0x194] sm:$0xf] }
 0x328   : > { %v4553_v62 = vadd.f32 %v4552_v48, %v4463_v13  ;;  %v9110_v48 = vld [vmem:[#allocation2 + $0x184] sm:$0xf] }
 0x32a   : > { %v4641_v0 = vpop.f32.mrf.mxu0  ;;  %v4730_v30 = vpop.f32.mrf.mxu1 }
 0x32b   : > { %v4642_v40 = vadd.f32 %v4641_v0, %v4553_v62  ;;  %v8351_v62 = vld [vmem:[#allocation2 + $0x198] sm:$0xf0] }
 0x32d   : > { %6014 = vmatmul.bf16.gmra.mxu0 %v8326_v29  ;;  %6103 = vmatmul.bf16.gmra.mxu1 %v8330_v55  ;;  %v10871_v61 = vadd.f32 %v4730_v30, %v4642_v40  ;;  %v8350_v30 = vor.u32 %v9113_v46, %v8349_v58  ;;  %v8354_v40 = vor.u32 %v9110_v48, %v8351_v62 }
 0x32e   : > { %v7722_v58 = vor.u32 %v8974_v16, %v7719_v19 }
 0x32f   : > { %11509 = vst [vmem:[#allocation25_spill] sm:$0xff] %v10871_v61  ;;  %v4465_v2 = vpop.f32.mrf.mxu2  ;;  %v4554_v8 = vpop.f32.mrf.mxu3 }
 0x330   : > { %v4555_v34 = vadd.f32 %v4554_v8, %v4465_v2 }
 0x332   : > { %v4643_v36 = vpop.f32.mrf.mxu0  ;;  %v4732_v13 = vpop.f32.mrf.mxu1 }
 0x333   : > { %v4644_v32 = vadd.f32 %v4643_v36, %v4555_v34  ;;  %v9189_v36 = vld [vmem:[%s11330_s4 + $0x398] sm:$0xff] }
 0x334   : > { %4783 = vmatmul.bf16.gmra.mxu2 %v7694_v49  ;;  %4872 = vmatmul.bf16.gmra.mxu3 %v7698_v1  ;;  %v7717_v49 = vld [vmem:[#allocation2 + $0x190] sm:$0xf]  ;;  %v8977_v1 = vld [vmem:[#allocation2 + $0x1a4] sm:$0xf0] }
 0x335   : > { %v10873_v47 = vadd.f32 %v4732_v13, %v4644_v32  ;;  %6163 = vmatpush.bf16.msra.mxu2 %v9189_v36  ;;  %v7718_v32 = vor.u32 %v8977_v1, %v7717_v49 }
 0x337   : > { %11510 = vst [vmem:[#allocation26_spill] sm:$0xff] %v10873_v47  ;;  %v4468_v29 = vpop.f32.mrf.mxu2  ;;  %v4557_v55 = vpop.f32.mrf.mxu3 }
 0x338   : > { %v4558_v0 = vadd.f32 %v4557_v55, %v4468_v29  ;;  %v9205_v29 = vld [vmem:[%s11330_s4 + $0x418] sm:$0xff] }
 0x339   : > { %v9213_v55 = vld [vmem:[%s11330_s4 + $0x458] sm:$0xff]  ;;  %6341 = vmatpush.bf16.msra.mxu0 %v9205_v29 }
 0x33a   : > { %v4646_v61 = vpop.f32.mrf.mxu0  ;;  %v4735_v2 = vpop.f32.mrf.mxu1  ;;  %6430 = vmatpush.bf16.msra.mxu1 %v9213_v55 }
 0x33b   : > { %v4647_v45 = vadd.f32 %v4646_v61, %v4558_v0  ;;  %v8373_v0 = vld [vmem:[#allocation2 + $0x1b0] sm:$0xf] }
 0x33d   : > { %6019 = vmatmul.bf16.gmra.mxu0 %v8350_v30  ;;  %6108 = vmatmul.bf16.gmra.mxu1 %v8354_v40  ;;  %v10881_v8 = vadd.f32 %v4735_v2, %v4647_v45  ;;  %v9119_v40 = vld [vmem:[#allocation2 + $0x1c4] sm:$0xf0]  ;;  %v9116_v2 = vld [vmem:[#allocation2 + $0x1b4] sm:$0xf]  ;;  %v8375_v45 = vld [vmem:[#allocation2 + $0x1c8] sm:$0xf0] }
 0x33e   : > { %v8374_v16 = vor.u32 %v9119_v40, %v8373_v0  ;;  %v8378_v19 = vor.u32 %v9116_v2, %v8375_v45  ;;  %v8397_v40 = vld [vmem:[#allocation2 + $0x1e0] sm:$0xf]  ;;  %v9125_v45 = vld [vmem:[#allocation2 + $0x1f4] sm:$0xf0] }
 0x33f   : > { %11511 = vst [vmem:[#allocation27_spill] sm:$0xff] %v10881_v8  ;;  %v4470_v34 = vpop.f32.mrf.mxu2  ;;  %v4559_v13 = vpop.f32.mrf.mxu3 }
 0x340   : > { %v4560_v61 = vadd.f32 %v4559_v13, %v4470_v34 }
 0x342   : > { %v4648_v46 = vpop.f32.mrf.mxu0  ;;  %v4737_v48 = vpop.f32.mrf.mxu1 }
 0x343   : > { %v4649_v62 = vadd.f32 %v4648_v46, %v4560_v61  ;;  %v7741_v61 = vld [vmem:[#allocation2 + $0x1c0] sm:$0xf]  ;;  %v7743_v46 = vld [vmem:[#allocation2 + $0x1d8] sm:$0xf0] }
 0x344   : > { %4788 = vmatmul.bf16.gmra.mxu2 %v7718_v32  ;;  %4877 = vmatmul.bf16.gmra.mxu3 %v7722_v58  ;;  %v8983_v32 = vld [vmem:[#allocation2 + $0x1d4] sm:$0xf0]  ;;  %v8980_v58 = vld [vmem:[#allocation2 + $0x1c4] sm:$0xf] }
 0x345   : > { %v10889_v30 = vadd.f32 %v4737_v48, %v4649_v62  ;;  %v7742_v55 = vor.u32 %v8983_v32, %v7741_v61  ;;  %v7746_v8 = vor.u32 %v8980_v58, %v7743_v46  ;;  %v8989_v46 = vld [vmem:[#allocation2 + $0x204] sm:$0xf0] }
 0x347   : > { %11512 = vst [vmem:[#allocation28_spill] sm:$0xff] %v10889_v30  ;;  %v4473_v36 = vpop.f32.mrf.mxu2  ;;  %v4562_v49 = vpop.f32.mrf.mxu3 }
 0x348   : > { %v4563_v1 = vadd.f32 %v4562_v49, %v4473_v36  ;;  %v9122_v49 = vld [vmem:[#allocation2 + $0x1e4] sm:$0xf] }
 0x34a   : > { %v4651_v24 = vpop.f32.mrf.mxu0  ;;  %v4740_v34 = vpop.f32.mrf.mxu1 }
 0x34b   : > { %v4652_v13 = vadd.f32 %v4651_v24, %v4563_v1  ;;  %v8399_v1 = vld [vmem:[#allocation2 + $0x1f8] sm:$0xf0] }
 0x34d   : > { %6024 = vmatmul.bf16.gmra.mxu0 %v8374_v16  ;;  %6113 = vmatmul.bf16.gmra.mxu1 %v8378_v19  ;;  %v10891_v48 = vadd.f32 %v4740_v34, %v4652_v13  ;;  %v8398_v34 = vor.u32 %v9125_v45, %v8397_v40  ;;  %v8402_v13 = vor.u32 %v9122_v49, %v8399_v1 }
 0x34f   : > { %v4475_v62 = vpop.f32.mrf.mxu2  ;;  %v4564_v29 = vpop.f32.mrf.mxu3 }
 0x350   : > { %v4565_v30 = vadd.f32 %v4564_v29, %v4475_v62  ;;  %v8986_v29 = vld [vmem:[#allocation2 + $0x1f4] sm:$0xf] }
 0x352   : > { %v4653_v47 = vpop.f32.mrf.mxu0  ;;  %v4742_v36 = vpop.f32.mrf.mxu1 }
 0x353   : > { %v4654_v0 = vadd.f32 %v4653_v47, %v4565_v30  ;;  %v9188_v47 = vld [vmem:[%s11330_s4 + $0x390] sm:$0xff] }
 0x354   : > { %4793 = vmatmul.bf16.gmra.mxu2 %v7742_v55  ;;  %4882 = vmatmul.bf16.gmra.mxu3 %v7746_v8  ;;  %v7765_v30 = vld [vmem:[#allocation2 + $0x1f0] sm:$0xf] }
 0x355   : > { %v10893_v2 = vadd.f32 %v4742_v36, %v4654_v0  ;;  %v9196_v55 = vld [vmem:[%s11330_s4 + $0x3d0] sm:$0xff]  ;;  %6164 = vmatpush.bf16.msra.mxu2 %v9188_v47  ;;  %v7766_v45 = vor.u32 %v8989_v46, %v7765_v30 }
 0x356   : > { %6253 = vmatpush.bf16.msra.mxu3 %v9196_v55 }
 0x357   : > { %v4754_v16 = vpop.f32.mrf.mxu2  ;;  %v4843_v19 = vpop.f32.mrf.mxu3 }
 0x358   : > { %v4755_v24 = vadd.f32 %v4754_v16, %v10708_v50  ;;  %v7767_v50 = vld [vmem:[#allocation2 + $0x208] sm:$0xf0] }
 0x359   : > { %v7770_v49 = vor.u32 %v8986_v29, %v7767_v50 }
 0x35a   : > { %v5990_v62 = vpop.f32.mrf.mxu0  ;;  %v6079_v61 = vpop.f32.mrf.mxu1  ;;  %v4844_v32 = vadd.f32 %v4843_v19, %v4755_v24  ;;  %v9204_v24 = vld [vmem:[%s11330_s4 + $0x410] sm:$0xff] }
 0x35b   : > { %v10896_v58 = vadd.f32 %v6079_v61, %v5990_v62  ;;  %6342 = vmatpush.bf16.msra.mxu0 %v9204_v24  ;;  %v9131_v62 = vld [vmem:[#allocation2 + $0x224] sm:$0xf0]  ;;  %v9128_v61 = vld [vmem:[#allocation2 + $0x214] sm:$0xf] }
 0x35c   : > { %v10902_v8 = vadd.f32 %v4844_v32, %v10458_v10  ;;  %v8423_v32 = vld [vmem:[#allocation2 + $0x228] sm:$0xf0] }
 0x35d   : > { %6029 = vmatmul.bf16.gmra.mxu0 %v8398_v34  ;;  %6118 = vmatmul.bf16.gmra.mxu1 %v8402_v13  ;;  %v8421_v13 = vld [vmem:[#allocation2 + $0x210] sm:$0xf]  ;;  %v8426_v50 = vor.u32 %v9128_v61, %v8423_v32 }
 0x35e   : > { %v8422_v29 = vor.u32 %v9131_v62, %v8421_v13 }
 0x35f   : > { %v4756_v36 = vpop.f32.mrf.mxu2  ;;  %v4845_v0 = vpop.f32.mrf.mxu3 }
 0x360   : > { %v4757_v40 = vadd.f32 %v4756_v36, %v10716_v20  ;;  %v9212_v20 = vld [vmem:[%s11330_s4 + $0x450] sm:$0xff] }
 0x361   : > { %6431 = vmatpush.bf16.msra.mxu1 %v9212_v20 }
 0x362   : > { %v5992_v10 = vpop.f32.mrf.mxu0  ;;  %v6081_v1 = vpop.f32.mrf.mxu1  ;;  %v4846_v16 = vadd.f32 %v4845_v0, %v4757_v40 }
 0x363   : > { %v10908_v19 = vadd.f32 %v6081_v1, %v5992_v10  ;;  %v8992_v10 = vld [vmem:[#allocation2 + $0x224] sm:$0xf]  ;;  %v7791_v1 = vld [vmem:[#allocation2 + $0x238] sm:$0xf0] }
 0x364   : > { %v10914_v34 = vadd.f32 %v4846_v16, %v10468_v31  ;;  %4798 = vmatmul.bf16.gmra.mxu2 %v7766_v45  ;;  %4887 = vmatmul.bf16.gmra.mxu3 %v7770_v49  ;;  %v7789_v45 = vld [vmem:[#allocation2 + $0x220] sm:$0xf]  ;;  %v8995_v49 = vld [vmem:[#allocation2 + $0x234] sm:$0xf0]  ;;  %v7794_v13 = vor.u32 %v8992_v10, %v7791_v1 }
 0x365   : > { %v7790_v20 = vor.u32 %v8995_v49, %v7789_v45 }
 0x367   : > { %v4759_v47 = vpop.f32.mrf.mxu2  ;;  %v4848_v30 = vpop.f32.mrf.mxu3 }
 0x368   : > { %v4760_v46 = vadd.f32 %v4759_v47, %v10718_v22 }
 0x36a   : > { %v5995_v31 = vpop.f32.mrf.mxu0  ;;  %v6084_v55 = vpop.f32.mrf.mxu1  ;;  %v4849_v36 = vadd.f32 %v4848_v30, %v4760_v46  ;;  %v8445_v30 = vld [vmem:[#allocation2 + $0x240] sm:$0xf]  ;;  %v9137_v46 = vld [vmem:[#allocation2 + $0x254] sm:$0xf0] }
 0x36b   : > { %v10920_v0 = vadd.f32 %v6084_v55, %v5995_v31 }
 0x36c   : > { %v10923_v40 = vadd.f32 %v4849_v36, %v10485_v9  ;;  %v8446_v36 = vor.u32 %v9137_v46, %v8445_v30 }
 0x36d   : > { %6034 = vmatmul.bf16.gmra.mxu0 %v8422_v29  ;;  %6123 = vmatmul.bf16.gmra.mxu1 %v8426_v50  ;;  %v9134_v29 = vld [vmem:[#allocation2 + $0x244] sm:$0xf]  ;;  %v8447_v50 = vld [vmem:[#allocation2 + $0x258] sm:$0xf0] }
 0x36e   : > { %v8450_v45 = vor.u32 %v9134_v29, %v8447_v50 }
 0x36f   : > { %v4761_v16 = vpop.f32.mrf.mxu2  ;;  %v4850_v24 = vpop.f32.mrf.mxu3 }
 0x370   : > { %v4762_v22 = vadd.f32 %v4761_v16, %v10720_v60 }
 0x372   : > { %v5997_v62 = vpop.f32.mrf.mxu0  ;;  %v6086_v61 = vpop.f32.mrf.mxu1  ;;  %v4851_v32 = vadd.f32 %v4850_v24, %v4762_v22  ;;  %v7813_v22 = vld [vmem:[#allocation2 + $0x250] sm:$0xf] }
 0x373   : > { %v10926_v47 = vadd.f32 %v6086_v61, %v5997_v62  ;;  %v9195_v62 = vld [vmem:[%s11330_s4 + $0x3c8] sm:$0xff] }
 0x374   : > { %v10929_v9 = vadd.f32 %v4851_v32, %v10487_v53  ;;  %4803 = vmatmul.bf16.gmra.mxu2 %v7790_v20  ;;  %4892 = vmatmul.bf16.gmra.mxu3 %v7794_v13  ;;  %v9187_v53 = vld [vmem:[%s11330_s4 + $0x388] sm:$0xff] }
 0x375   : > { %v9001_v20 = vld [vmem:[#allocation2 + $0x264] sm:$0xf0]  ;;  %v7815_v13 = vld [vmem:[#allocation2 + $0x268] sm:$0xf0]  ;;  %6165 = vmatpush.bf16.msra.mxu2 %v9187_v53  ;;  %6254 = vmatpush.bf16.msra.mxu3 %v9195_v62 }
 0x376   : > { %11513 = vst [vmem:[#allocation29_spill] sm:$0xff] %v10929_v9  ;;  %v7814_v46 = vor.u32 %v9001_v20, %v7813_v22 }
 0x377   : > { %v4764_v31 = vpop.f32.mrf.mxu2  ;;  %v4853_v55 = vpop.f32.mrf.mxu3 }
 0x378   : > { %v4765_v60 = vadd.f32 %v4764_v31, %v10728_v59  ;;  %v8998_v59 = vld [vmem:[#allocation2 + $0x254] sm:$0xf] }
 0x379   : > { %v7818_v29 = vor.u32 %v8998_v59, %v7815_v13 }
 0x37a   : > { %v6000_v49 = vpop.f32.mrf.mxu0  ;;  %v6089_v10 = vpop.f32.mrf.mxu1  ;;  %v4854_v1 = vadd.f32 %v4853_v55, %v4765_v60  ;;  %v9203_v60 = vld [vmem:[%s11330_s4 + $0x408] sm:$0xff] }
 0x37b   : > { %v10932_v16 = vadd.f32 %v6089_v10, %v6000_v49  ;;  %6343 = vmatpush.bf16.msra.mxu0 %v9203_v60  ;;  %v9143_v49 = vld [vmem:[#allocation2 + $0x284] sm:$0xf0]  ;;  %v9140_v10 = vld [vmem:[#allocation2 + $0x274] sm:$0xf]  ;;  %v9359_v60 = vld [vmem:[%s11329_s3 + $0x2] ss:$0 sm:$0xff] }
 0x37c   : > { %v10938_v24 = vadd.f32 %v4854_v1, %v10508_v4  ;;  %v8471_v1 = vld [vmem:[#allocation2 + $0x288] sm:$0xf0] }
 0x37d   : > { %11514 = vst [vmem:[#allocation30_spill] sm:$0xff] %v10932_v16  ;;  %6039 = vmatmul.bf16.gmra.mxu0 %v8446_v36  ;;  %6128 = vmatmul.bf16.gmra.mxu1 %v8450_v45  ;;  %v8469_v45 = vld [vmem:[#allocation2 + $0x270] sm:$0xf] }
 0x37e   : > { %11515 = vst [vmem:[#allocation31_spill] sm:$0xff] %v10938_v24  ;;  %v8470_v62 = vor.u32 %v9143_v49, %v8469_v45  ;;  %v7837_v49 = vld [vmem:[#allocation2 + $0x280] sm:$0xf] }
 0x37f   : > { %v4766_v61 = vpop.f32.mrf.mxu2  ;;  %v4855_v32 = vpop.f32.mrf.mxu3 }
 0x380   : > { %v4767_v30 = vadd.f32 %v4766_v61, %v10736_v17  ;;  %v9211_v17 = vld [vmem:[%s11330_s4 + $0x448] sm:$0xff]  ;;  %v8474_v61 = vor.u32 %v9140_v10, %v8471_v1  ;;  %v9007_v10 = vld [vmem:[#allocation2 + $0x294] sm:$0xf0]  ;;  %v9360_v1 = vld [vmem:[%s11329_s3 + $0x1] ss:$0 sm:$0xff] }
 0x381   : > { %6432 = vmatpush.bf16.msra.mxu1 %v9211_v17 }
 0x382   : > { %v6002_v4 = vpop.f32.mrf.mxu0  ;;  %v6091_v50 = vpop.f32.mrf.mxu1  ;;  %v4856_v31 = vadd.f32 %v4855_v32, %v4767_v30 }
 0x383   : > { %v10945_v55 = vadd.f32 %v6091_v50, %v6002_v4 }
 0x384   : > { %v10951_v36 = vadd.f32 %v4856_v31, %v10518_v56  ;;  %4808 = vmatmul.bf16.gmra.mxu2 %v7814_v46  ;;  %4897 = vmatmul.bf16.gmra.mxu3 %v7818_v29  ;;  %v9287_v56 = vld [vmem:[%s377_s30] sm:$0xff]  }
 0x385   : > { %11516 = vst [vmem:[#allocation32_spill] sm:$0xff] %v10945_v55  ;;  %v9288_v59 = vunpack.c.l.bf16 %v9287_v56  ;;  %v9289_v13 = vunpack.c.h.bf16 %v9287_v56  ;;  %v9358_v29 = vld [vmem:[%s11329_s3] ss:$0 sm:$0xff]  ;;  %v9004_v56 = vld [vmem:[#allocation2 + $0x284] sm:$0xf] }
 0x386   : > { %11517 = vst [vmem:[#allocation33_spill] sm:$0xff] %v10951_v36 }
 0x387   : > { %v4769_v53 = vpop.f32.mrf.mxu2  ;;  %v4858_v22 = vpop.f32.mrf.mxu3  ;;  %v1818_v4 = vmul.f32 %v9358_v29, %v9288_v59  ;;  %v1819_v50 = vmul.f32 %v9358_v29, %v9289_v13  ;;  %v1825_v17 = vmul.f32 %v9359_v60, %v9289_v13 }
 0x388   : > { %v4770_v20 = vadd.f32 %v4769_v53, %v10751_v23  ;;  %v1824_v23 = vmul.f32 %v9359_v60, %v9288_v59  ;;  %v9361_v59 = vld [vmem:[%s11329_s3 + $0x3] ss:$0 sm:$0xff]  ;;  %v7838_v60 = vor.u32 %v9007_v10, %v7837_v49  ;;  %v9149_v10 = vld [vmem:[#allocation2 + $0x2b4] sm:$0xf0] }
 0x389   : > { %v1820_v53 = vadd.f32 %v9360_v1, %v1818_v4  ;;  %v8493_v49 = vld [vmem:[#allocation2 + $0x2a0] sm:$0xf] }
 0x38a   : > { %v6005_v32 = vpop.f32.mrf.mxu0  ;;  %v6094_v30 = vpop.f32.mrf.mxu1  ;;  %v4859_v46 = vadd.f32 %v4858_v22, %v4770_v20  ;;  %v1821_v22 = vadd.f32 %v9360_v1, %v1819_v50  ;;  %v7839_v20 = vld [vmem:[#allocation2 + $0x298] sm:$0xf0]  ;;  %v1826_v13 = vadd.f32 %v9361_v59, %v1824_v23 }
 0x38b   : > { %v10963_v31 = vadd.f32 %v6094_v30, %v6005_v32  ;;  %v1827_v32 = vadd.f32 %v9361_v59, %v1825_v17  ;;  %v7842_v50 = vor.u32 %v9004_v56, %v7839_v20 }
 0x38c   : > { %v10969_v45 = vadd.f32 %v4859_v46, %v10535_v35  ;;  %v1822_v35 = vmax.f32 %v1820_v53, 0.0  ;;  %v1823_v30 = vmax.f32 %v1821_v22, 0.0  ;;  %v8495_v22 = vld [vmem:[#allocation2 + $0x2b8] sm:$0xf0] }
 0x38d   : > { %11518 = vst [vmem:[#allocation34_spill] sm:$0xff] %v10963_v31  ;;  %6044 = vmatmul.bf16.gmra.mxu0 %v8470_v62  ;;  %6133 = vmatmul.bf16.gmra.mxu1 %v8474_v61  ;;  %v1829_v31 = vmax.f32 %v1827_v32, 0.0 }
 0x38e   : > { %11519 = vst [vmem:[#allocation35_spill] sm:$0xff] %v10969_v45  ;;  %v1828_v45 = vmax.f32 %v1826_v13, 0.0  ;;  %v1831_v62 = vmul.f32 0.0, %v1822_v35  ;;  %v1832_v61 = vmul.f32 0.0, %v1823_v30  ;;  %v11521_v35 = vshll.u32 %v10755_v5, 16 }
 0x38f   : > { %v4771_v46 = vpop.f32.mrf.mxu2  ;;  %v4860_v29 = vpop.f32.mrf.mxu3  ;;  %v1834_v36 = vmul.f32 0.0, %v1829_v31 }
 0x390   : > { %v4772_v4 = vadd.f32 %v4771_v46, %v10757_v52  ;;  %v1833_v1 = vmul.f32 0.0, %v1828_v45  ;;  %v9146_v52 = vld [vmem:[#allocation2 + $0x2a4] sm:$0xf]  ;;  %v1177_v30 = vrot.slane %v11521_v35, 1 }
 0x391   : > { %v1836_v17 = vpack.c.bf16 %v1834_v36, %v1832_v61  ;;  %v8494_v36 = vor.u32 %v9149_v10, %v8493_v49  ;;  %v8498_v13 = vor.u32 %v9146_v52, %v8495_v22  ;;  %v7861_v61 = vld [vmem:[#allocation2 + $0x2b0] sm:$0xf]  ;;  %v11523_v49 = vshrl.u32 %v10755_v5, 16  ;;  %v9010_v22 = vld [vmem:[#allocation2 + $0x2b4] sm:$0xf] }
 0x392   : > { %v6007_v55 = vpop.f32.mrf.mxu0  ;;  %v6096_v24 = vpop.f32.mrf.mxu1  ;;  %v4861_v16 = vadd.f32 %v4860_v29, %v4772_v4  ;;  %v1835_v23 = vpack.c.bf16 %v1833_v1, %v1831_v62  ;;  %v9013_v1 = vld [vmem:[#allocation2 + $0x2c4] sm:$0xf0] }
 0x393   : > { %v10978_v9 = vadd.f32 %v6096_v24, %v6007_v55  ;;  %v1841_v45 = vunpack.c.l.b16 %v1836_v17  ;;  %v1842_v31 = vunpack.c.h.b16 %v1836_v17  ;;  %1900 = vst [vmem:[#allocation2 + $0x350] sm:$0xff] %v1836_v17  ;;  %v1178_v10 = vor.u32 %v1177_v30, %v11523_v49 }
 0x394   : > { %v10981_v53 = vadd.f32 %v4861_v16, %v10537_v6  ;;  %4813 = vmatmul.bf16.gmra.mxu2 %v7838_v60  ;;  %4902 = vmatmul.bf16.gmra.mxu3 %v7842_v50  ;;  %v1839_v56 = vunpack.c.l.b16 %v1835_v23  ;;  %v1840_v20 = vunpack.c.h.b16 %v1835_v23  ;;  %1897 = vst [vmem:[#allocation2 + $0x338] sm:$0xff] %v1835_v23  ;;  %v11520_v16 = vshll.u32 %v10753_v3, 16 }
 0x395   : > { %v11522_v23 = vshrl.u32 %v10753_v3, 16  ;;  %v9194_v3 = vld [vmem:[%s11330_s4 + $0x3c0] sm:$0xff]  ;;  %v7862_v35 = vor.u32 %v9013_v1, %v7861_v61 }
 0x396   : > { %v10983_v55 = vpack.c.b16 %v1841_v45, %v1839_v56  ;;  %v1175_v32 = vrot.slane %v11520_v16, 1  ;;  %v10990_v46 = vpack.c.b16 %v1842_v31, %v1840_v20  ;;  %v7863_v56 = vld [vmem:[#allocation2 + $0x2c8] sm:$0xf0]  ;;  %6255 = vmatpush.bf16.msra.mxu3 %v9194_v3 }
 0x397   : > { %v4774_v59 = vpop.f32.mrf.mxu2  ;;  %v4863_v24 = vpop.f32.mrf.mxu3 }
 0x398   : > { %v4775_v6 = vadd.f32 %v4774_v59, %v10779_v11  ;;  %v11397_v29 = vshrl.u32 %v10983_v55, 16  ;;  %v9186_v11 = vld [vmem:[%s11330_s4 + $0x380] sm:$0xff]  ;;  %v1176_v17 = vor.u32 %v1175_v32, %v11522_v23  ;;  %v11399_v45 = vshll.u32 %v10983_v55, 16 }
 0x399   : > { %v11396_v31 = vshrl.u32 %v10990_v46, 16  ;;  %v11398_v59 = vshll.u32 %v10990_v46, 16  ;;  %6166 = vmatpush.bf16.msra.mxu2 %v9186_v11 }
 0x39a   : > { %v6010_v60 = vpop.f32.mrf.mxu0  ;;  %v6099_v4 = vpop.f32.mrf.mxu1  ;;  %v4864_v50 = vadd.f32 %v4863_v24, %v4775_v6  ;;  %v1848_v20 = vrot.slane %v11397_v29, 7  ;;  %v1244_v5 = vsel %vm10137_vm5, %v1176_v17, 0 }
 0x39b   : > { %v10993_v62 = vadd.f32 %v6099_v4, %v6010_v60  ;;  %v1432_v24 = vunpack.c.l.b16 %v1244_v5  ;;  %v1436_v16 = vunpack.c.h.b16 %v1244_v5  ;;  %v1855_v60 = vrot.slane %v11396_v31, 7  ;;  %v11529_v31 = vld [vmem:[#allocation20_spill] sm:$0xff] }
 0x39c   : > { %v11003_v52 = vadd.f32 %v4864_v50, %v10558_v63  ;;  %v1245_v63 = vsel %vm10137_vm5, %v1178_v10, 0  ;;  %v1851_v30 = vor.u32 %v11399_v45, %v1848_v20  ;;  %v7866_v50 = vor.u32 %v9010_v22, %v7863_v56 }
 0x39d   : > { %6049 = vmatmul.bf16.gmra.mxu0 %v8494_v36  ;;  %6138 = vmatmul.bf16.gmra.mxu1 %v8498_v13  ;;  %v1433_v6 = vunpack.c.l.b16 %v1245_v63  ;;  %v1437_v36 = vunpack.c.h.b16 %v1245_v63  ;;  %v1858_v11 = vor.u32 %v11398_v59, %v1855_v60  ;;  %v9210_v63 = vld [vmem:[%s11330_s4 + $0x440] sm:$0xff]  ;;  %v11532_v59 = vld [vmem:[#allocation21_spill] sm:$0xff] }
 0x39e   : > { %v1861_v49 = vsel %vm9560_vm2, 0, %v1851_v30  ;;  %6433 = vmatpush.bf16.msra.mxu1 %v9210_v63 }
 0x39f   : > { %v4776_v13 = vpop.f32.mrf.mxu2  ;;  %v4865_v32 = vpop.f32.mrf.mxu3  ;;  %v1530_v23 = vpack.c.b16 %v1433_v6, %v1432_v24  ;;  %v1533_v17 = vpack.c.b16 %v1437_v36, %v1436_v16  ;;  %v1875_v3 = vunpack.c.l.b16 %v1861_v49  ;;  %v1879_v20 = vunpack.c.h.b16 %v1861_v49  ;;  %v8517_v16 = vld [vmem:[#allocation2 + $0x2d0] sm:$0xf]  ;;  %v9155_v36 = vld [vmem:[#allocation2 + $0x2e4] sm:$0xf0] }
 0x3a0   : > { %v4777_v4 = vadd.f32 %v4776_v13, %v10789_v57  ;;  %v9202_v57 = vld [vmem:[%s11330_s4 + $0x400] sm:$0xff]  ;;  %v1862_v22 = vsel %vm9560_vm2, 0, %v1858_v11  ;;  %v9152_v13 = vld [vmem:[#allocation2 + $0x2d4] sm:$0xf] }
 0x3a1   : > { %1723 = vst [vmem:[#allocation2 + $0x310] sm:$0xff] %v1530_v23  ;;  %v1876_v24 = vunpack.c.l.b16 %v1862_v22  ;;  %v1880_v6 = vunpack.c.h.b16 %v1862_v22  ;;  %6344 = vmatpush.bf16.msra.mxu0 %v9202_v57 }
 0x3a2   : > { %v6012_v10 = vpop.f32.mrf.mxu0  ;;  %v6101_v61 = vpop.f32.mrf.mxu1  ;;  %v4866_v1 = vadd.f32 %v4865_v32, %v4777_v4  ;;  %1726 = vst [vmem:[#allocation2 + $0x328] sm:$0xff] %v1533_v17  ;;  %v8519_v32 = vld [vmem:[#allocation2 + $0x2e8] sm:$0xf0] }
 0x3a3   : > { %v11026_v5 = vadd.f32 %v6101_v61, %v6012_v10  ;;  %v1883_v30 = vpack.c.b16 %v1876_v24, %v1875_v3  ;;  %v1886_v38 = vpack.c.b16 %v1880_v6, %v1879_v20  ;;  %v7885_v61 = vld [vmem:[#allocation2 + $0x2e0] sm:$0xf]  ;;  %v9016_v3 = vld [vmem:[#allocation2 + $0x2e4] sm:$0xf]  ;;  %v7887_v20 = vld [vmem:[#allocation2 + $0x2f8] sm:$0xf0] }
 0x3a4   : > { %v11034_v56 = vadd.f32 %v4866_v1, %v10568_v28  ;;  %4818 = vmatmul.bf16.gmra.mxu2 %v7862_v35  ;;  %4907 = vmatmul.bf16.gmra.mxu3 %v7866_v50  ;;  %v8518_v35 = vor.u32 %v9155_v36, %v8517_v16  ;;  %v8522_v50 = vor.u32 %v9152_v13, %v8519_v32  ;;  %v9019_v1 = vld [vmem:[#allocation2 + $0x2f4] sm:$0xf0]  ;;  %v8541_v32 = vld [vmem:[#allocation2 + $0x300] sm:$0xf] }
 0x3a5   : > { %1896 = vst [vmem:[#allocation2 + $0x330] sm:$0xff] %v1883_v30  ;;  %v7886_v63 = vor.u32 %v9019_v1, %v7885_v61  ;;  %v7890_v24 = vor.u32 %v9016_v3, %v7887_v20  ;;  %v9161_v30 = vld [vmem:[#allocation2 + $0x314] sm:$0xf0] }
 0x3a6   : > { %1899 = vst [vmem:[#allocation2 + $0x348] sm:$0xff] %v1886_v38  ;;  %v9158_v38 = vld [vmem:[#allocation2 + $0x304] sm:$0xf] }
 0x3a7   : > { %v4779_v60 = vpop.f32.mrf.mxu2  ;;  %v4868_v4 = vpop.f32.mrf.mxu3 }
 0x3a8   : > { %v4780_v28 = vadd.f32 %v4779_v60, %v10791_v37  ;;  %v8543_v60 = vld [vmem:[#allocation2 + $0x318] sm:$0xf0]  ;;  %v7909_v1 = vld [vmem:[#allocation2 + $0x310] sm:$0xf]  ;;  %v9022_v20 = vld [vmem:[#allocation2 + $0x314] sm:$0xf] }
 0x3a9   : > { %v9025_v3 = vld [vmem:[#allocation2 + $0x324] sm:$0xf0] }
 0x3aa   : > { %v6015_v23 = vpop.f32.mrf.mxu0  ;;  %v6104_v17 = vpop.f32.mrf.mxu1  ;;  %v4869_v11 = vadd.f32 %v4868_v4, %v4780_v28 }
 0x3ab   : > { %v11040_v49 = vadd.f32 %v6104_v17, %v6015_v23 }
 0x3ac   : > { %v11043_v10 = vadd.f32 %v4869_v11, %v10573_v21 }
 0x3ad   : > { %6054 = vmatmul.bf16.gmra.mxu0 %v8518_v35  ;;  %6143 = vmatmul.bf16.gmra.mxu1 %v8522_v50  ;;  %v8542_v35 = vor.u32 %v9161_v30, %v8541_v32  ;;  %v8546_v50 = vor.u32 %v9158_v38, %v8543_v60  ;;  %v8565_v30 = vld [vmem:[#allocation2 + $0x330] sm:$0xf]  ;;  %v9167_v38 = vld [vmem:[#allocation2 + $0x344] sm:$0xf0]  ;;  %v9164_v60 = vld [vmem:[#allocation2 + $0x334] sm:$0xf] }
 0x3af   : > { %v4781_v57 = vpop.f32.mrf.mxu2  ;;  %v4870_v37 = vpop.f32.mrf.mxu3 }
 0x3b0   : > { %v4782_v22 = vadd.f32 %v4781_v57, %v10793_v39  ;;  %v7911_v57 = vld [vmem:[#allocation2 + $0x328] sm:$0xf0] }
 0x3b2   : > { %v6017_v6 = vpop.f32.mrf.mxu0  ;;  %v6106_v16 = vpop.f32.mrf.mxu1  ;;  %v4871_v36 = vadd.f32 %v4870_v37, %v4782_v22 }
 0x3b3   : > { %v11046_v13 = vadd.f32 %v6106_v16, %v6017_v6 }
 0x3b4   : > { %v11049_v21 = vadd.f32 %v4871_v36, %v10575_v33  ;;  %4823 = vmatmul.bf16.gmra.mxu2 %v7886_v63  ;;  %4912 = vmatmul.bf16.gmra.mxu3 %v7890_v24  ;;  %v7910_v63 = vor.u32 %v9025_v3, %v7909_v1  ;;  %v7914_v24 = vor.u32 %v9022_v20, %v7911_v57  ;;  %v8213_v3 = vld [vmem:[#allocation2 + $0x68] sm:$0xf]  ;;  %v9078_v20 = vld [vmem:[#allocation2 + $0x7c] sm:$0xf0]  ;;  %v9075_v57 = vld [vmem:[#allocation2 + $0x6c] sm:$0xf] }
 0x3b7   : > { %v4784_v4 = vpop.f32.mrf.mxu2  ;;  %v4873_v28 = vpop.f32.mrf.mxu3 }
 0x3b8   : > { %v4785_v39 = vadd.f32 %v4784_v4, %v10801_v18  ;;  %v8567_v4 = vld [vmem:[#allocation2 + $0x348] sm:$0xf0] }
 0x3ba   : > { %v6020_v23 = vpop.f32.mrf.mxu0  ;;  %v6109_v17 = vpop.f32.mrf.mxu1  ;;  %v4874_v11 = vadd.f32 %v4873_v28, %v4785_v39 }
 0x3bb   : > { %v11052_v61 = vadd.f32 %v6109_v17, %v6020_v23 }
 0x3bc   : > { %v11055_v33 = vadd.f32 %v4874_v11, %v10584_v44 }
 0x3bd   : > { %6059 = vmatmul.bf16.gmra.mxu0 %v8542_v35  ;;  %6148 = vmatmul.bf16.gmra.mxu1 %v8546_v50  ;;  %v8566_v35 = vor.u32 %v9167_v38, %v8565_v30  ;;  %v8570_v50 = vor.u32 %v9164_v60, %v8567_v4  ;;  %v8221_v38 = vld [vmem:[#allocation2 + $0x70] sm:$0xf]  ;;  %v9079_v60 = vld [vmem:[#allocation2 + $0x84] sm:$0xf0]  ;;  %v9076_v4 = vld [vmem:[#allocation2 + $0x74] sm:$0xf] }
 0x3bf   : > { %v4786_v37 = vpop.f32.mrf.mxu2  ;;  %v4875_v22 = vpop.f32.mrf.mxu3 }
 0x3c0   : > { %v4787_v18 = vadd.f32 %v4786_v37, %v10809_v25  ;;  %v8215_v37 = vld [vmem:[#allocation2 + $0x80] sm:$0xf0] }
 0x3c2   : > { %v6022_v6 = vpop.f32.mrf.mxu0  ;;  %v6111_v16 = vpop.f32.mrf.mxu1  ;;  %v4876_v36 = vadd.f32 %v4875_v22, %v4787_v18 }
 0x3c3   : > { %v11058_v32 = vadd.f32 %v6111_v16, %v6022_v6 }
 0x3c4   : > { %v11061_v44 = vadd.f32 %v4876_v36, %v10593_v26  ;;  %4828 = vmatmul.bf16.gmra.mxu2 %v7910_v63  ;;  %4917 = vmatmul.bf16.gmra.mxu3 %v7914_v24  ;;  %v8214_v63 = vor.u32 %v9078_v20, %v8213_v3  ;;  %v8218_v24 = vor.u32 %v9075_v57, %v8215_v37  ;;  %v8237_v20 = vld [vmem:[#allocation2 + $0x98] sm:$0xf]  ;;  %v9084_v57 = vld [vmem:[#allocation2 + $0xac] sm:$0xf0]  ;;  %v9081_v37 = vld [vmem:[#allocation2 + $0x9c] sm:$0xf] }
 0x3c7   : > { %v4789_v28 = vpop.f32.mrf.mxu2  ;;  %v4878_v39 = vpop.f32.mrf.mxu3 }
 0x3c8   : > { %v4790_v25 = vadd.f32 %v4789_v28, %v10811_v51  ;;  %v8223_v28 = vld [vmem:[#allocation2 + $0x88] sm:$0xf0] }
 0x3ca   : > { %v6025_v23 = vpop.f32.mrf.mxu0  ;;  %v6114_v17 = vpop.f32.mrf.mxu1  ;;  %v4879_v11 = vadd.f32 %v4878_v39, %v4790_v25 }
 0x3cb   : > { %v11064_v1 = vadd.f32 %v6114_v17, %v6025_v23 }
 0x3cc   : > { %v11067_v26 = vadd.f32 %v4879_v11, %v10596_v42 }
 0x3cd   : > { %6064 = vmatmul.bf16.gmra.mxu0 %v8566_v35  ;;  %6153 = vmatmul.bf16.gmra.mxu1 %v8570_v50  ;;  %v8222_v35 = vor.u32 %v9079_v60, %v8221_v38  ;;  %v8226_v50 = vor.u32 %v9076_v4, %v8223_v28  ;;  %v8245_v60 = vld [vmem:[#allocation2 + $0xa0] sm:$0xf]  ;;  %v9085_v4 = vld [vmem:[#allocation2 + $0xb4] sm:$0xf0]  ;;  %v9082_v28 = vld [vmem:[#allocation2 + $0xa4] sm:$0xf] }
 0x3cf   : > { %v4791_v22 = vpop.f32.mrf.mxu2  ;;  %v4880_v18 = vpop.f32.mrf.mxu3 }
 0x3d0   : > { %v4792_v51 = vadd.f32 %v4791_v22, %v10813_v41  ;;  %v8239_v22 = vld [vmem:[#allocation2 + $0xb0] sm:$0xf0] }
 0x3d2   : > { %v6027_v6 = vpop.f32.mrf.mxu0  ;;  %v6116_v16 = vpop.f32.mrf.mxu1  ;;  %v4881_v36 = vadd.f32 %v4880_v18, %v4792_v51 }
 0x3d3   : > { %v11070_v30 = vadd.f32 %v6116_v16, %v6027_v6 }
 0x3d4   : > { %v11073_v42 = vadd.f32 %v4881_v36, %v10599_v14  ;;  %6167 = vmatmul.bf16.vlgmr.msra.gmra.mxu2 %v8214_v63  ;;  %6256 = vmatmul.bf16.vlgmr.msra.gmra.mxu3 %v8218_v24  ;;  %v8238_v63 = vor.u32 %v9084_v57, %v8237_v20  ;;  %v8242_v24 = vor.u32 %v9081_v37, %v8239_v22  ;;  %v11524_v57 = vld [vmem:[#allocation17_spill] sm:$0xff]  ;;  %v9090_v22 = vld [vmem:[#allocation2 + $0xdc] sm:$0xf0] }
 0x3d5   : > { %v8261_v37 = vld [vmem:[#allocation2 + $0xc8] sm:$0xf] }
 0x3d7   : > { %v4794_v39 = vpop.f32.mrf.mxu2  ;;  %v4883_v25 = vpop.f32.mrf.mxu3 }
 0x3d8   : > { %v4795_v41 = vadd.f32 %v4794_v39, %v10821_v27  ;;  %v8247_v39 = vld [vmem:[#allocation2 + $0xb8] sm:$0xf0] }
 0x3da   : > { %v6030_v23 = vpop.f32.mrf.mxu0  ;;  %v6119_v17 = vpop.f32.mrf.mxu1  ;;  %v4884_v11 = vadd.f32 %v4883_v25, %v4795_v41 }
 0x3db   : > { %v11076_v3 = vadd.f32 %v6119_v17, %v6030_v23 }
 0x3dc   : > { %v11079_v14 = vadd.f32 %v4884_v11, %v10610_v54 }
 0x3dd   : > { %6345 = vmatmul.bf16.vlgmr.msra.gmra.mxu0 %v8222_v35  ;;  %6434 = vmatmul.bf16.vlgmr.msra.gmra.mxu1 %v8226_v50  ;;  %v8246_v35 = vor.u32 %v9085_v4, %v8245_v60  ;;  %v8250_v50 = vor.u32 %v9082_v28, %v8247_v39  ;;  %v11526_v39 = vld [vmem:[#allocation18_spill] sm:$0xff] }
 0x3df   : > { %v4796_v18 = vpop.f32.mrf.mxu2  ;;  %v4885_v51 = vpop.f32.mrf.mxu3 }
 0x3e0   : > { %v4797_v27 = vadd.f32 %v4796_v18, %v10829_v15  ;;  %v9087_v18 = vld [vmem:[#allocation2 + $0xcc] sm:$0xf] }
 0x3e2   : > { %v6032_v6 = vpop.f32.mrf.mxu0  ;;  %v6121_v16 = vpop.f32.mrf.mxu1  ;;  %v4886_v36 = vadd.f32 %v4885_v51, %v4797_v27  ;;  %v8263_v51 = vld [vmem:[#allocation2 + $0xe0] sm:$0xf0] }
 0x3e3   : > { %v11082_v38 = vadd.f32 %v6121_v16, %v6032_v6  ;;  %v8262_v6 = vor.u32 %v9090_v22, %v8261_v37  ;;  %v8266_v16 = vor.u32 %v9087_v18, %v8263_v51 }
 0x3e4   : > { %v11085_v54 = vadd.f32 %v4886_v36, %v10618_v12  ;;  %6172 = vmatmul.bf16.gmra.mxu2 %v8238_v63  ;;  %6261 = vmatmul.bf16.gmra.mxu3 %v8242_v24  ;;  %v11525_v24 = vld [vmem:[#allocation16_spill] sm:$0xff] }
 0x3e7   : > { %v4799_v25 = vpop.f32.mrf.mxu2  ;;  %v4888_v41 = vpop.f32.mrf.mxu3 }
 0x3e8   : > { %v4800_v15 = vadd.f32 %v4799_v25, %v10831_v43 }
 0x3ea   : > { %v6035_v23 = vpop.f32.mrf.mxu0  ;;  %v6124_v17 = vpop.f32.mrf.mxu1  ;;  %v4889_v11 = vadd.f32 %v4888_v41, %v4800_v15  ;;  %v8269_v41 = vld [vmem:[#allocation2 + $0xd0] sm:$0xf]  ;;  %v9091_v15 = vld [vmem:[#allocation2 + $0xe4] sm:$0xf0] }
 0x3eb   : > { %v11088_v20 = vadd.f32 %v6124_v17, %v6035_v23  ;;  %v8270_v37 = vor.u32 %v9091_v15, %v8269_v41 }
 0x3ec   : > { %v11091_v12 = vadd.f32 %v4889_v11, %v11524_v57  ;;  %v11527_v11 = vld [vmem:[#allocation4_spill] sm:$0xff] }
 0x3ed   : > { %6350 = vmatmul.bf16.gmra.mxu0 %v8246_v35  ;;  %6439 = vmatmul.bf16.gmra.mxu1 %v8250_v50  ;;  %v9088_v35 = vld [vmem:[#allocation2 + $0xd4] sm:$0xf]  ;;  %v8271_v50 = vld [vmem:[#allocation2 + $0xe8] sm:$0xf0] }
 0x3ee   : > { %v8274_v22 = vor.u32 %v9088_v35, %v8271_v50 }
 0x3ef   : > { %v4801_v27 = vpop.f32.mrf.mxu2  ;;  %v4890_v63 = vpop.f32.mrf.mxu3 }
 0x3f0   : > { %v4802_v43 = vadd.f32 %v4801_v27, %v11525_v24  ;;  %v11528_v24 = vld [vmem:[#allocation5_spill] sm:$0xff] }
 0x3f2   : > { %v6037_v36 = vpop.f32.mrf.mxu0  ;;  %v6126_v60 = vpop.f32.mrf.mxu1  ;;  %v4891_v4 = vadd.f32 %v4890_v63, %v4802_v43 }
 0x3f3   : > { %v11094_v28 = vadd.f32 %v6126_v60, %v6037_v36  ;;  %v9093_v36 = vld [vmem:[#allocation2 + $0xfc] sm:$0xf]  ;;  %v8287_v60 = vld [vmem:[#allocation2 + $0x110] sm:$0xf0] }
 0x3f4   : > { %v11097_v25 = vadd.f32 %v4891_v4, %v11526_v39  ;;  %6177 = vmatmul.bf16.gmra.mxu2 %v8262_v6  ;;  %6266 = vmatmul.bf16.gmra.mxu3 %v8266_v16  ;;  %v8285_v6 = vld [vmem:[#allocation2 + $0xf8] sm:$0xf]  ;;  %v9096_v16 = vld [vmem:[#allocation2 + $0x10c] sm:$0xf0]  ;;  %v8290_v15 = vor.u32 %v9093_v36, %v8287_v60 }
 0x3f5   : > { %v8286_v41 = vor.u32 %v9096_v16, %v8285_v6 }
 0x3f7   : > { %v4804_v23 = vpop.f32.mrf.mxu2  ;;  %v4893_v17 = vpop.f32.mrf.mxu3 }
 0x3f8   : > { %v4805_v57 = vadd.f32 %v4804_v23, %v11527_v11 }
 0x3fa   : > { %v6040_v18 = vpop.f32.mrf.mxu0  ;;  %v6129_v51 = vpop.f32.mrf.mxu1  ;;  %v4894_v27 = vadd.f32 %v4893_v17, %v4805_v57  ;;  %v11530_v57 = vld [vmem:[#allocation19_spill] sm:$0xff] }
 0x3fb   : > { %v11100_v63 = vadd.f32 %v6129_v51, %v6040_v18  ;;  %v9094_v51 = vld [vmem:[#allocation2 + $0x104] sm:$0xf] }
 0x3fc   : > { %v11103_v43 = vadd.f32 %v4894_v27, %v11528_v24  ;;  %v8295_v27 = vld [vmem:[#allocation2 + $0x118] sm:$0xf0] }
 0x3fd   : > { %6355 = vmatmul.bf16.gmra.mxu0 %v8270_v37  ;;  %6444 = vmatmul.bf16.gmra.mxu1 %v8274_v22  ;;  %v8293_v37 = vld [vmem:[#allocation2 + $0x100] sm:$0xf]  ;;  %v9097_v22 = vld [vmem:[#allocation2 + $0x114] sm:$0xf0]  ;;  %v8298_v16 = vor.u32 %v9094_v51, %v8295_v27 }
 0x3fe   : > { %v8294_v6 = vor.u32 %v9097_v22, %v8293_v37 }
 0x3ff   : > { %v4806_v4 = vpop.f32.mrf.mxu2  ;;  %v4895_v39 = vpop.f32.mrf.mxu3 }
 0x400   : > { %v4807_v23 = vadd.f32 %v4806_v4, %v11529_v31 }
 0x402   : > { %v6042_v35 = vpop.f32.mrf.mxu0  ;;  %v6131_v50 = vpop.f32.mrf.mxu1  ;;  %v4896_v17 = vadd.f32 %v4895_v39, %v4807_v23  ;;  %v11534_v23 = vld [vmem:[#allocation6_spill] sm:$0xff] }
 0x403   : > { %v11106_v11 = vadd.f32 %v6131_v50, %v6042_v35  ;;  %v9099_v50 = vld [vmem:[#allocation2 + $0x12c] sm:$0xf] }
 0x404   : > { %v11109_v18 = vadd.f32 %v4896_v17, %v11530_v57  ;;  %6182 = vmatmul.bf16.gmra.mxu2 %v8286_v41  ;;  %6271 = vmatmul.bf16.gmra.mxu3 %v8290_v15  ;;  %v8309_v41 = vld [vmem:[#allocation2 + $0x128] sm:$0xf]  ;;  %v9102_v15 = vld [vmem:[#allocation2 + $0x13c] sm:$0xf0]  ;;  %v8311_v17 = vld [vmem:[#allocation2 + $0x140] sm:$0xf0] }
 0x405   : > { %v8310_v37 = vor.u32 %v9102_v15, %v8309_v41  ;;  %v8314_v22 = vor.u32 %v9099_v50, %v8311_v17 }
 0x406   : > { %11531 = vst [vmem:[#allocation17_spill] sm:$0xff] %v11109_v18  ;;  %v11536_v18 = vld [vmem:[#allocation22_spill] sm:$0xff] }
 0x407   : > { %v4809_v24 = vpop.f32.mrf.mxu2  ;;  %v4898_v29 = vpop.f32.mrf.mxu3 }
 0x408   : > { %v4810_v31 = vadd.f32 %v4809_v24, %v11532_v59 }
 0x40a   : > { %v6045_v36 = vpop.f32.mrf.mxu0  ;;  %v6134_v60 = vpop.f32.mrf.mxu1  ;;  %v4899_v4 = vadd.f32 %v4898_v29, %v4810_v31  ;;  %v11538_v31 = vld [vmem:[#allocation7_spill] sm:$0xff] }
 0x40b   : > { %v11112_v39 = vadd.f32 %v6134_v60, %v6045_v36  ;;  %v9100_v60 = vld [vmem:[#allocation2 + $0x134] sm:$0xf] }
 0x40c   : > { %v11115_v35 = vadd.f32 %v4899_v4, %v11534_v23  ;;  %v8319_v4 = vld [vmem:[#allocation2 + $0x148] sm:$0xf0] }
 0x40d   : > { %11533 = vst [vmem:[#allocation16_spill] sm:$0xff] %v11112_v39  ;;  %6360 = vmatmul.bf16.gmra.mxu0 %v8294_v6  ;;  %6449 = vmatmul.bf16.gmra.mxu1 %v8298_v16  ;;  %v8317_v6 = vld [vmem:[#allocation2 + $0x130] sm:$0xf]  ;;  %v9103_v16 = vld [vmem:[#allocation2 + $0x144] sm:$0xf0]  ;;  %v11540_v39 = vld [vmem:[#allocation23_spill] sm:$0xff]  ;;  %v8322_v15 = vor.u32 %v9100_v60, %v8319_v4 }
 0x40e   : > { %11535 = vst [vmem:[#allocation18_spill] sm:$0xff] %v11115_v35  ;;  %v8318_v41 = vor.u32 %v9103_v16, %v8317_v6 }
 0x40f   : > { %v4811_v57 = vpop.f32.mrf.mxu2  ;;  %v4900_v45 = vpop.f32.mrf.mxu3 }
 0x410   : > { %v4812_v59 = vadd.f32 %v4811_v57, %v11536_v18 }
 0x412   : > { %v6047_v51 = vpop.f32.mrf.mxu0  ;;  %v6136_v27 = vpop.f32.mrf.mxu1  ;;  %v4901_v29 = vadd.f32 %v4900_v45, %v4812_v59  ;;  %v11542_v59 = vld [vmem:[#allocation8_spill] sm:$0xff] }
 0x413   : > { %v11118_v24 = vadd.f32 %v6136_v27, %v6047_v51  ;;  %v9105_v27 = vld [vmem:[#allocation2 + $0x15c] sm:$0xf] }
 0x414   : > { %v11121_v36 = vadd.f32 %v4901_v29, %v11538_v31  ;;  %6187 = vmatmul.bf16.gmra.mxu2 %v8310_v37  ;;  %6276 = vmatmul.bf16.gmra.mxu3 %v8314_v22  ;;  %v8333_v37 = vld [vmem:[#allocation2 + $0x158] sm:$0xf]  ;;  %v9108_v22 = vld [vmem:[#allocation2 + $0x16c] sm:$0xf0]  ;;  %v8335_v29 = vld [vmem:[#allocation2 + $0x170] sm:$0xf0] }
 0x415   : > { %11537 = vst [vmem:[#allocation4_spill] sm:$0xff] %v11118_v24  ;;  %v11544_v24 = vld [vmem:[#allocation24_spill] sm:$0xff]  ;;  %v8334_v6 = vor.u32 %v9108_v22, %v8333_v37  ;;  %v8338_v16 = vor.u32 %v9105_v27, %v8335_v29 }
 0x416   : > { %11539 = vst [vmem:[#allocation5_spill] sm:$0xff] %v11121_v36 }
 0x417   : > { %v4814_v23 = vpop.f32.mrf.mxu2  ;;  %v4903_v35 = vpop.f32.mrf.mxu3 }
 0x418   : > { %v4815_v18 = vadd.f32 %v4814_v23, %v11540_v39 }
 0x41a   : > { %v6050_v50 = vpop.f32.mrf.mxu0  ;;  %v6139_v17 = vpop.f32.mrf.mxu1  ;;  %v4904_v45 = vadd.f32 %v4903_v35, %v4815_v18  ;;  %v11546_v18 = vld [vmem:[#allocation9_spill] sm:$0xff] }
 0x41b   : > { %v11124_v57 = vadd.f32 %v6139_v17, %v6050_v50  ;;  %v9106_v17 = vld [vmem:[#allocation2 + $0x164] sm:$0xf] }
 0x41c   : > { %v11127_v51 = vadd.f32 %v4904_v45, %v11542_v59  ;;  %v8343_v45 = vld [vmem:[#allocation2 + $0x178] sm:$0xf0] }
 0x41d   : > { %11541 = vst [vmem:[#allocation20_spill] sm:$0xff] %v11124_v57  ;;  %6365 = vmatmul.bf16.gmra.mxu0 %v8318_v41  ;;  %6454 = vmatmul.bf16.gmra.mxu1 %v8322_v15  ;;  %v8341_v41 = vld [vmem:[#allocation2 + $0x160] sm:$0xf]  ;;  %v9109_v15 = vld [vmem:[#allocation2 + $0x174] sm:$0xf0]  ;;  %v11548_v57 = vld [vmem:[#allocation25_spill] sm:$0xff]  ;;  %v8346_v22 = vor.u32 %v9106_v17, %v8343_v45 }
 0x41e   : > { %11543 = vst [vmem:[#allocation19_spill] sm:$0xff] %v11127_v51  ;;  %v8342_v37 = vor.u32 %v9109_v15, %v8341_v41 }
 0x41f   : > { %v4816_v31 = vpop.f32.mrf.mxu2  ;;  %v4905_v36 = vpop.f32.mrf.mxu3 }
 0x420   : > { %v4817_v39 = vadd.f32 %v4816_v31, %v11544_v24 }
 0x422   : > { %v6052_v60 = vpop.f32.mrf.mxu0  ;;  %v6141_v4 = vpop.f32.mrf.mxu1  ;;  %v4906_v35 = vadd.f32 %v4905_v36, %v4817_v39  ;;  %v11550_v39 = vld [vmem:[#allocation10_spill] sm:$0xff] }
 0x423   : > { %v11130_v23 = vadd.f32 %v6141_v4, %v6052_v60  ;;  %v9111_v4 = vld [vmem:[#allocation2 + $0x18c] sm:$0xf] }
 0x424   : > { %v11133_v50 = vadd.f32 %v4906_v35, %v11546_v18  ;;  %6192 = vmatmul.bf16.gmra.mxu2 %v8334_v6  ;;  %6281 = vmatmul.bf16.gmra.mxu3 %v8338_v16  ;;  %v8357_v6 = vld [vmem:[#allocation2 + $0x188] sm:$0xf]  ;;  %v9114_v16 = vld [vmem:[#allocation2 + $0x19c] sm:$0xf0]  ;;  %v8359_v35 = vld [vmem:[#allocation2 + $0x1a0] sm:$0xf0] }
 0x425   : > { %11545 = vst [vmem:[#allocation21_spill] sm:$0xff] %v11130_v23  ;;  %v11552_v23 = vld [vmem:[#allocation26_spill] sm:$0xff]  ;;  %v8358_v41 = vor.u32 %v9114_v16, %v8357_v6  ;;  %v8362_v15 = vor.u32 %v9111_v4, %v8359_v35 }
 0x426   : > { %11547 = vst [vmem:[#allocation6_spill] sm:$0xff] %v11133_v50 }
 0x427   : > { %v4819_v59 = vpop.f32.mrf.mxu2  ;;  %v4908_v51 = vpop.f32.mrf.mxu3 }
 0x428   : > { %v4820_v24 = vadd.f32 %v4819_v59, %v11548_v57 }
 0x42a   : > { %v6055_v27 = vpop.f32.mrf.mxu0  ;;  %v6144_v29 = vpop.f32.mrf.mxu1  ;;  %v4909_v36 = vadd.f32 %v4908_v51, %v4820_v24  ;;  %v11554_v24 = vld [vmem:[#allocation11_spill] sm:$0xff] }
 0x42b   : > { %v11136_v31 = vadd.f32 %v6144_v29, %v6055_v27  ;;  %v9112_v29 = vld [vmem:[#allocation2 + $0x194] sm:$0xf] }
 0x42c   : > { %v11139_v60 = vadd.f32 %v4909_v36, %v11550_v39  ;;  %v8367_v36 = vld [vmem:[#allocation2 + $0x1a8] sm:$0xf0] }
 0x42d   : > { %11549 = vst [vmem:[#allocation22_spill] sm:$0xff] %v11136_v31  ;;  %6370 = vmatmul.bf16.gmra.mxu0 %v8342_v37  ;;  %6459 = vmatmul.bf16.gmra.mxu1 %v8346_v22  ;;  %v8365_v37 = vld [vmem:[#allocation2 + $0x190] sm:$0xf]  ;;  %v9115_v22 = vld [vmem:[#allocation2 + $0x1a4] sm:$0xf0]  ;;  %v11556_v31 = vld [vmem:[#allocation27_spill] sm:$0xff]  ;;  %v8370_v16 = vor.u32 %v9112_v29, %v8367_v36 }
 0x42e   : > { %11551 = vst [vmem:[#allocation7_spill] sm:$0xff] %v11139_v60  ;;  %v8366_v6 = vor.u32 %v9115_v22, %v8365_v37 }
 0x42f   : > { %v4821_v18 = vpop.f32.mrf.mxu2  ;;  %v4910_v50 = vpop.f32.mrf.mxu3 }
 0x430   : > { %v4822_v57 = vadd.f32 %v4821_v18, %v11552_v23 }
 0x432   : > { %v6057_v17 = vpop.f32.mrf.mxu0  ;;  %v6146_v45 = vpop.f32.mrf.mxu1  ;;  %v4911_v51 = vadd.f32 %v4910_v50, %v4822_v57  ;;  %v11557_v57 = vld [vmem:[#allocation12_spill] sm:$0xff] }
 0x433   : > { %v11142_v59 = vadd.f32 %v6146_v45, %v6057_v17  ;;  %v9117_v45 = vld [vmem:[#allocation2 + $0x1bc] sm:$0xf] }
 0x434   : > { %v11145_v27 = vadd.f32 %v4911_v51, %v11554_v24  ;;  %6197 = vmatmul.bf16.gmra.mxu2 %v8358_v41  ;;  %6286 = vmatmul.bf16.gmra.mxu3 %v8362_v15  ;;  %v8381_v41 = vld [vmem:[#allocation2 + $0x1b8] sm:$0xf]  ;;  %v9120_v15 = vld [vmem:[#allocation2 + $0x1cc] sm:$0xf0]  ;;  %v8383_v51 = vld [vmem:[#allocation2 + $0x1d0] sm:$0xf0] }
 0x435   : > { %11553 = vst [vmem:[#allocation23_spill] sm:$0xff] %v11142_v59  ;;  %v11559_v59 = vld [vmem:[#allocation28_spill] sm:$0xff]  ;;  %v8382_v37 = vor.u32 %v9120_v15, %v8381_v41  ;;  %v8386_v22 = vor.u32 %v9117_v45, %v8383_v51 }
 0x436   : > { %11555 = vst [vmem:[#allocation8_spill] sm:$0xff] %v11145_v27 }
 0x437   : > { %v4824_v39 = vpop.f32.mrf.mxu2  ;;  %v4913_v60 = vpop.f32.mrf.mxu3 }
 0x438   : > { %v4825_v23 = vadd.f32 %v4824_v39, %v11556_v31 }
 0x43a   : > { %v6060_v4 = vpop.f32.mrf.mxu0  ;;  %v6149_v35 = vpop.f32.mrf.mxu1  ;;  %v4914_v50 = vadd.f32 %v4913_v60, %v4825_v23  ;;  %v11560_v23 = vld [vmem:[#allocation13_spill] sm:$0xff] }
 0x43b   : > { %v11148_v18 = vadd.f32 %v6149_v35, %v6060_v4  ;;  %v9118_v35 = vld [vmem:[#allocation2 + $0x1c4] sm:$0xf] }
 0x43c   : > { %v11151_v17 = vadd.f32 %v4914_v50, %v11557_v57  ;;  %v8391_v50 = vld [vmem:[#allocation2 + $0x1d8] sm:$0xf0] }
 0x43d   : > { %6375 = vmatmul.bf16.gmra.mxu0 %v8366_v6  ;;  %6464 = vmatmul.bf16.gmra.mxu1 %v8370_v16  ;;  %v8389_v6 = vld [vmem:[#allocation2 + $0x1c0] sm:$0xf]  ;;  %v9121_v16 = vld [vmem:[#allocation2 + $0x1d4] sm:$0xf0]  ;;  %v8394_v15 = vor.u32 %v9118_v35, %v8391_v50 }
 0x43e   : > { %11558 = vst [vmem:[#allocation24_spill] sm:$0xff] %v11151_v17  ;;  %v8390_v41 = vor.u32 %v9121_v16, %v8389_v6 }
 0x43f   : > { %v4826_v24 = vpop.f32.mrf.mxu2  ;;  %v4915_v27 = vpop.f32.mrf.mxu3 }
 0x440   : > { %v4827_v31 = vadd.f32 %v4826_v24, %v11559_v59 }
 0x442   : > { %v6062_v29 = vpop.f32.mrf.mxu0  ;;  %v6151_v36 = vpop.f32.mrf.mxu1  ;;  %v4916_v60 = vadd.f32 %v4915_v27, %v4827_v31  ;;  %v11562_v31 = vld [vmem:[#allocation14_spill] sm:$0xff] }
 0x443   : > { %v11154_v39 = vadd.f32 %v6151_v36, %v6062_v29  ;;  %v9123_v36 = vld [vmem:[#allocation2 + $0x1ec] sm:$0xf] }
 0x444   : > { %v11157_v4 = vadd.f32 %v4916_v60, %v11560_v23  ;;  %6202 = vmatmul.bf16.gmra.mxu2 %v8382_v37  ;;  %6291 = vmatmul.bf16.gmra.mxu3 %v8386_v22  ;;  %v8405_v37 = vld [vmem:[#allocation2 + $0x1e8] sm:$0xf]  ;;  %v9126_v22 = vld [vmem:[#allocation2 + $0x1fc] sm:$0xf0]  ;;  %v8407_v60 = vld [vmem:[#allocation2 + $0x200] sm:$0xf0] }
 0x445   : > { %v8406_v6 = vor.u32 %v9126_v22, %v8405_v37  ;;  %v8410_v16 = vor.u32 %v9123_v36, %v8407_v60 }
 0x446   : > { %11561 = vst [vmem:[#allocation9_spill] sm:$0xff] %v11157_v4 }
 0x447   : > { %v4829_v57 = vpop.f32.mrf.mxu2  ;;  %v4918_v17 = vpop.f32.mrf.mxu3 }
 0x448   : > { %v4830_v59 = vadd.f32 %v4829_v57, %v10891_v48 }
 0x44a   : > { %v6065_v45 = vpop.f32.mrf.mxu0  ;;  %v6154_v51 = vpop.f32.mrf.mxu1  ;;  %v4919_v27 = vadd.f32 %v4918_v17, %v4830_v59  ;;  %v11564_v59 = vld [vmem:[#allocation15_spill] sm:$0xff] }
 0x44b   : > { %v11160_v24 = vadd.f32 %v6154_v51, %v6065_v45  ;;  %v9124_v51 = vld [vmem:[#allocation2 + $0x1f4] sm:$0xf] }
 0x44c   : > { %v11163_v29 = vadd.f32 %v4919_v27, %v11562_v31  ;;  %v8415_v27 = vld [vmem:[#allocation2 + $0x208] sm:$0xf0] }
 0x44d   : > { %6380 = vmatmul.bf16.gmra.mxu0 %v8390_v41  ;;  %6469 = vmatmul.bf16.gmra.mxu1 %v8394_v15  ;;  %v8413_v41 = vld [vmem:[#allocation2 + $0x1f0] sm:$0xf]  ;;  %v9127_v15 = vld [vmem:[#allocation2 + $0x204] sm:$0xf0]  ;;  %v8418_v22 = vor.u32 %v9124_v51, %v8415_v27 }
 0x44e   : > { %11563 = vst [vmem:[#allocation25_spill] sm:$0xff] %v11163_v29  ;;  %v8414_v37 = vor.u32 %v9127_v15, %v8413_v41 }
 0x44f   : > { %v4831_v23 = vpop.f32.mrf.mxu2  ;;  %v4920_v4 = vpop.f32.mrf.mxu3 }
 0x450   : > { %v4832_v48 = vadd.f32 %v4831_v23, %v10893_v2 }
 0x452   : > { %v6067_v35 = vpop.f32.mrf.mxu0  ;;  %v6156_v50 = vpop.f32.mrf.mxu1  ;;  %v4921_v17 = vadd.f32 %v4920_v4, %v4832_v48  ;;  %v8429_v48 = vld [vmem:[#allocation2 + $0x218] sm:$0xf] }
 0x453   : > { %v11166_v57 = vadd.f32 %v6156_v50, %v6067_v35  ;;  %v8431_v35 = vld [vmem:[#allocation2 + $0x230] sm:$0xf0] }
 0x454   : > { %v11169_v45 = vadd.f32 %v4921_v17, %v11564_v59  ;;  %6207 = vmatmul.bf16.gmra.mxu2 %v8406_v6  ;;  %6296 = vmatmul.bf16.gmra.mxu3 %v8410_v16  ;;  %v9132_v6 = vld [vmem:[#allocation2 + $0x22c] sm:$0xf0]  ;;  %v9129_v16 = vld [vmem:[#allocation2 + $0x21c] sm:$0xf] }
 0x455   : > { %v8430_v41 = vor.u32 %v9132_v6, %v8429_v48  ;;  %v8434_v15 = vor.u32 %v9129_v16, %v8431_v35 }
 0x456   : > { %11565 = vst [vmem:[#allocation10_spill] sm:$0xff] %v11169_v45 }
 0x457   : > { %v6168_v31 = vpop.f32.mrf.mxu2  ;;  %v6257_v29 = vpop.f32.mrf.mxu3 }
 0x458   : > { %v6169_v2 = vadd.f32 %v6168_v31, %v10896_v58 }
 0x45a   : > { %v6346_v36 = vpop.f32.mrf.mxu0  ;;  %v6435_v60 = vpop.f32.mrf.mxu1  ;;  %v6258_v4 = vadd.f32 %v6257_v29, %v6169_v2 }
 0x45c   : > { %v6347_v23 = vadd.f32 %v6346_v36, %v6258_v4  ;;  %v8439_v36 = vld [vmem:[#allocation2 + $0x238] sm:$0xf0] }
 0x45d   : > { %6385 = vmatmul.bf16.gmra.mxu0 %v8414_v37  ;;  %6474 = vmatmul.bf16.gmra.mxu1 %v8418_v22  ;;  %v9133_v37 = vld [vmem:[#allocation2 + $0x234] sm:$0xf0]  ;;  %v9130_v22 = vld [vmem:[#allocation2 + $0x224] sm:$0xf] }
 0x45e   : > { %v6436_v50 = vadd.f32 %v6435_v60, %v6347_v23  ;;  %v8442_v6 = vor.u32 %v9130_v22, %v8439_v36 }
 0x45f   : > { %v6170_v17 = vpop.f32.mrf.mxu2  ;;  %v6259_v59 = vpop.f32.mrf.mxu3 }
 0x460   : > { %v6547_v45 = vadd.f32 %v6436_v50, %v10902_v8  ;;  %v6171_v58 = vadd.f32 %v6170_v17, %v10908_v19  ;;  %v8437_v8 = vld [vmem:[#allocation2 + $0x220] sm:$0xf] }
 0x461   : > { %v8438_v48 = vor.u32 %v9133_v37, %v8437_v8 }
 0x462   : > { %v6643_v29 = vpack.c.bf16 %v6547_v45, %v6547_v45  ;;  %v6348_v51 = vpop.f32.mrf.mxu0  ;;  %v6437_v27 = vpop.f32.mrf.mxu1  ;;  %v6260_v31 = vadd.f32 %v6259_v59, %v6171_v58  ;;  %v8453_v58 = vld [vmem:[#allocation2 + $0x248] sm:$0xf] }
 0x464   : > { %6676 = vst.msk [vmem:[%s11178_s28] sm:$0xf] %vm6675_vm6, %v6643_v29  ;;  %v6349_v2 = vadd.f32 %v6348_v51, %v6260_v31  ;;  %6212 = vmatmul.bf16.gmra.mxu2 %v8430_v41  ;;  %6301 = vmatmul.bf16.gmra.mxu3 %v8434_v15  ;;  %v9138_v41 = vld [vmem:[#allocation2 + $0x25c] sm:$0xf0]  ;;  %v9135_v15 = vld [vmem:[#allocation2 + $0x24c] sm:$0xf] }
 0x465   : > { %v8455_v29 = vld [vmem:[#allocation2 + $0x260] sm:$0xf0] }
 0x466   : > { %v6438_v19 = vadd.f32 %v6437_v27, %v6349_v2  ;;  %v8454_v2 = vor.u32 %v9138_v41, %v8453_v58  ;;  %v8458_v8 = vor.u32 %v9135_v15, %v8455_v29 }
 0x467   : > { %v6173_v60 = vpop.f32.mrf.mxu2  ;;  %v6262_v4 = vpop.f32.mrf.mxu3 }
 0x468   : > { %v6548_v23 = vadd.f32 %v6438_v19, %v10914_v34  ;;  %v6174_v45 = vadd.f32 %v6173_v60, %v10920_v0 }
 0x46a   : > { %v6644_v16 = vpack.c.bf16 %v6548_v23, %v6548_v23  ;;  %v6351_v35 = vpop.f32.mrf.mxu0  ;;  %v6440_v50 = vpop.f32.mrf.mxu1  ;;  %v6263_v17 = vadd.f32 %v6262_v4, %v6174_v45  ;;  %v8461_v4 = vld [vmem:[#allocation2 + $0x250] sm:$0xf]  ;;  %v9139_v45 = vld [vmem:[#allocation2 + $0x264] sm:$0xf0] }
 0x46c   : > { %6677 = vst.msk [vmem:[%s11178_s28 + $0x4] sm:$0xf] %vm6675_vm6, %v6644_v16  ;;  %v6352_v59 = vadd.f32 %v6351_v35, %v6263_v17 }
 0x46d   : > { %6390 = vmatmul.bf16.gmra.mxu0 %v8438_v48  ;;  %6479 = vmatmul.bf16.gmra.mxu1 %v8442_v6  ;;  %v9136_v48 = vld [vmem:[#allocation2 + $0x254] sm:$0xf]  ;;  %v8463_v6 = vld [vmem:[#allocation2 + $0x268] sm:$0xf0] }
 0x46e   : > { %v6441_v51 = vadd.f32 %v6440_v50, %v6352_v59  ;;  %v11567_v50 = vld [vmem:[#allocation30_spill] sm:$0xff]  ;;  %v8462_v59 = vor.u32 %v9139_v45, %v8461_v4  ;;  %v8466_v58 = vor.u32 %v9136_v48, %v8463_v6 }
 0x46f   : > { %v6175_v34 = vpop.f32.mrf.mxu2  ;;  %v6264_v27 = vpop.f32.mrf.mxu3 }
 0x470   : > { %v6549_v0 = vadd.f32 %v6441_v51, %v10923_v40  ;;  %v6176_v31 = vadd.f32 %v6175_v34, %v10926_v47  ;;  %v11566_v47 = vld [vmem:[#allocation29_spill] sm:$0xff] }
 0x472   : > { %v6645_v19 = vpack.c.bf16 %v6549_v0, %v6549_v0  ;;  %v6353_v37 = vpop.f32.mrf.mxu0  ;;  %v6442_v22 = vpop.f32.mrf.mxu1  ;;  %v6265_v36 = vadd.f32 %v6264_v27, %v6176_v31  ;;  %v8477_v27 = vld [vmem:[#allocation2 + $0x278] sm:$0xf]  ;;  %v9144_v0 = vld [vmem:[#allocation2 + $0x28c] sm:$0xf0]  ;;  %v9141_v31 = vld [vmem:[#allocation2 + $0x27c] sm:$0xf] }
 0x474   : > { %6678 = vst.msk [vmem:[%s11178_s28 + $0x8] sm:$0xf] %vm6675_vm6, %v6645_v19  ;;  %v6354_v60 = vadd.f32 %v6353_v37, %v6265_v36  ;;  %6217 = vmatmul.bf16.gmra.mxu2 %v8454_v2  ;;  %6306 = vmatmul.bf16.gmra.mxu3 %v8458_v8  ;;  %v8479_v2 = vld [vmem:[#allocation2 + $0x290] sm:$0xf0] }
 0x475   : > { %v8482_v45 = vor.u32 %v9141_v31, %v8479_v2 }
 0x476   : > { %v6443_v23 = vadd.f32 %v6442_v22, %v6354_v60  ;;  %v11568_v22 = vld [vmem:[#allocation31_spill] sm:$0xff]  ;;  %v11569_v60 = vld [vmem:[#allocation32_spill] sm:$0xff] }
 0x477   : > { %v6178_v40 = vpop.f32.mrf.mxu2  ;;  %v6267_v16 = vpop.f32.mrf.mxu3 }
 0x478   : > { %v6550_v35 = vadd.f32 %v6443_v23, %v11566_v47  ;;  %v6179_v17 = vadd.f32 %v6178_v40, %v11567_v50  ;;  %v8478_v23 = vor.u32 %v9144_v0, %v8477_v27 }
 0x47a   : > { %v6646_v41 = vpack.c.bf16 %v6550_v35, %v6550_v35  ;;  %v6356_v15 = vpop.f32.mrf.mxu0  ;;  %v6445_v29 = vpop.f32.mrf.mxu1  ;;  %v6268_v51 = vadd.f32 %v6267_v16, %v6179_v17  ;;  %v8485_v35 = vld [vmem:[#allocation2 + $0x280] sm:$0xf]  ;;  %v9145_v17 = vld [vmem:[#allocation2 + $0x294] sm:$0xf0] }
 0x47b   : > { %v8486_v0 = vor.u32 %v9145_v17, %v8485_v35 }
 0x47c   : > { %6679 = vst.msk [vmem:[%s11178_s28 + $0xc] sm:$0xf] %vm6675_vm6, %v6646_v41  ;;  %v6357_v34 = vadd.f32 %v6356_v15, %v6268_v51 }
 0x47d   : > { %6395 = vmatmul.bf16.gmra.mxu0 %v8462_v59  ;;  %6484 = vmatmul.bf16.gmra.mxu1 %v8466_v58  ;;  %v9142_v59 = vld [vmem:[#allocation2 + $0x284] sm:$0xf]  ;;  %v8487_v58 = vld [vmem:[#allocation2 + $0x298] sm:$0xf0] }
 0x47e   : > { %v6446_v8 = vadd.f32 %v6445_v29, %v6357_v34  ;;  %v11570_v29 = vld [vmem:[#allocation33_spill] sm:$0xff]  ;;  %v11571_v34 = vld [vmem:[#allocation34_spill] sm:$0xff]  ;;  %v8490_v31 = vor.u32 %v9142_v59, %v8487_v58 }
 0x47f   : > { %v6180_v19 = vpop.f32.mrf.mxu2  ;;  %v6269_v37 = vpop.f32.mrf.mxu3 }
 0x480   : > { %v6551_v36 = vadd.f32 %v6446_v8, %v11568_v22  ;;  %v6181_v4 = vadd.f32 %v6180_v19, %v11569_v60  ;;  %v9150_v60 = vld [vmem:[#allocation2 + $0x2bc] sm:$0xf0] }
 0x482   : > { %v6647_v48 = vpack.c.bf16 %v6551_v36, %v6551_v36  ;;  %v6358_v6 = vpop.f32.mrf.mxu0  ;;  %v6447_v40 = vpop.f32.mrf.mxu1  ;;  %v6270_v16 = vadd.f32 %v6269_v37, %v6181_v4  ;;  %v8501_v36 = vld [vmem:[#allocation2 + $0x2a8] sm:$0xf]  ;;  %v9147_v4 = vld [vmem:[#allocation2 + $0x2ac] sm:$0xf] }
 0x483   : > { %v8502_v35 = vor.u32 %v9150_v60, %v8501_v36 }
 0x484   : > { %6680 = vst.msk [vmem:[%s11178_s28 + $0x10] sm:$0xf] %vm6675_vm6, %v6647_v48  ;;  %v6359_v47 = vadd.f32 %v6358_v6, %v6270_v16  ;;  %6222 = vmatmul.bf16.gmra.mxu2 %v8478_v23  ;;  %6311 = vmatmul.bf16.gmra.mxu3 %v8482_v45  ;;  %v8503_v23 = vld [vmem:[#allocation2 + $0x2c0] sm:$0xf0] }
 0x486   : > { %v6448_v50 = vadd.f32 %v6447_v40, %v6359_v47  ;;  %v11572_v40 = vld [vmem:[#allocation35_spill] sm:$0xff] }
 0x487   : > { %v6183_v41 = vpop.f32.mrf.mxu2  ;;  %v6272_v15 = vpop.f32.mrf.mxu3 }
 0x488   : > { %v6552_v51 = vadd.f32 %v6448_v50, %v11570_v29  ;;  %v6184_v27 = vadd.f32 %v6183_v41, %v11571_v34  ;;  %v8506_v50 = vor.u32 %v9147_v4, %v8503_v23  ;;  %v8509_v29 = vld [vmem:[#allocation2 + $0x2b0] sm:$0xf]  ;;  %v9151_v34 = vld [vmem:[#allocation2 + $0x2c4] sm:$0xf0]  ;;  %v11573_v23 = vshll.u32 %v10983_v55, 16 }
 0x48a   : > { %v6648_v2 = vpack.c.bf16 %v6552_v51, %v6552_v51  ;;  %v6361_v8 = vpop.f32.mrf.mxu0  ;;  %v6450_v19 = vpop.f32.mrf.mxu1  ;;  %v6273_v37 = vadd.f32 %v6272_v15, %v6184_v27  ;;  %v9148_v27 = vld [vmem:[#allocation2 + $0x2b4] sm:$0xf] }
 0x48c   : > { %6681 = vst.msk [vmem:[%s11178_s28 + $0x14] sm:$0xf] %vm6675_vm6, %v6648_v2  ;;  %v6362_v22 = vadd.f32 %v6361_v8, %v6273_v37 }
 0x48d   : > { %6400 = vmatmul.bf16.gmra.mxu0 %v8486_v0  ;;  %6489 = vmatmul.bf16.gmra.mxu1 %v8490_v31  ;;  %v8511_v0 = vld [vmem:[#allocation2 + $0x2c8] sm:$0xf0] }
 0x48e   : > { %v6451_v45 = vadd.f32 %v6450_v19, %v6362_v22  ;;  %v8510_v19 = vor.u32 %v9151_v34, %v8509_v29  ;;  %v8514_v37 = vor.u32 %v9148_v27, %v8511_v0 }
 0x48f   : > { %v6185_v48 = vpop.f32.mrf.mxu2  ;;  %v6274_v6 = vpop.f32.mrf.mxu3 }
 0x490   : > { %v6553_v16 = vadd.f32 %v6451_v45, %v11572_v40  ;;  %v6186_v47 = vadd.f32 %v6185_v48, %v10978_v9  ;;  %v1863_v45 = vrot.slane %v11573_v23, 1  ;;  %v8525_v48 = vld [vmem:[#allocation2 + $0x2d8] sm:$0xf]  ;;  %v11574_v40 = vshll.u32 %v10990_v46, 16 }
 0x491   : > { %v9157_v23 = vld [vmem:[#allocation2 + $0x2f4] sm:$0xf0] }
 0x492   : > { %v6649_v17 = vpack.c.bf16 %v6553_v16, %v6553_v16  ;;  %v6363_v59 = vpop.f32.mrf.mxu0  ;;  %v6452_v58 = vpop.f32.mrf.mxu1  ;;  %v6275_v41 = vadd.f32 %v6274_v6, %v6186_v47  ;;  %v9156_v6 = vld [vmem:[#allocation2 + $0x2ec] sm:$0xf0]  ;;  %v1865_v16 = vrot.slane %v11574_v40, 1 }
 0x494   : > { %6682 = vst.msk [vmem:[%s11178_s28 + $0x18] sm:$0xf] %vm6675_vm6, %v6649_v17  ;;  %v6364_v15 = vadd.f32 %v6363_v59, %v6275_v41  ;;  %6227 = vmatmul.bf16.gmra.mxu2 %v8502_v35  ;;  %6316 = vmatmul.bf16.gmra.mxu3 %v8506_v50  ;;  %v8527_v35 = vld [vmem:[#allocation2 + $0x2f0] sm:$0xf0]  ;;  %v11576_v17 = vshrl.u32 %v10990_v46, 16  ;;  %v8526_v41 = vor.u32 %v9156_v6, %v8525_v48 }
 0x496   : > { %v6453_v51 = vadd.f32 %v6452_v58, %v6364_v15  ;;  %v1866_v59 = vor.u32 %v1865_v16, %v11576_v17 }
 0x497   : > { %v6188_v31 = vpop.f32.mrf.mxu2  ;;  %v6277_v2 = vpop.f32.mrf.mxu3 }
 0x498   : > { %v6554_v9 = vadd.f32 %v6453_v51, %v10981_v53  ;;  %v6189_v8 = vadd.f32 %v6188_v31, %v10993_v62  ;;  %v9153_v53 = vld [vmem:[#allocation2 + $0x2dc] sm:$0xf]  ;;  %v11575_v62 = vshrl.u32 %v10983_v55, 16  ;;  %v1870_v27 = vsel %vm10137_vm5, %v1866_v59, 0 }
 0x499   : > { %v8530_v34 = vor.u32 %v9153_v53, %v8527_v35  ;;  %v1878_v46 = vunpack.c.l.b16 %v1870_v27 }
 0x49a   : > { %v6650_v22 = vpack.c.bf16 %v6554_v9, %v6554_v9  ;;  %v6366_v36 = vpop.f32.mrf.mxu0  ;;  %v6455_v60 = vpop.f32.mrf.mxu1  ;;  %v6278_v4 = vadd.f32 %v6277_v2, %v6189_v8  ;;  %v1864_v50 = vor.u32 %v1863_v45, %v11575_v62  ;;  %v1882_v9 = vunpack.c.h.b16 %v1870_v27  ;;  %v9154_v45 = vld [vmem:[#allocation2 + $0x2e4] sm:$0xf] }
 0x49c   : > { %6683 = vst.msk [vmem:[%s11178_s28 + $0x1c] sm:$0xf] %vm6675_vm6, %v6650_v22  ;;  %v6367_v47 = vadd.f32 %v6366_v36, %v6278_v4  ;;  %v1869_v15 = vsel %vm10137_vm5, %v1864_v50, 0 }
 0x49d   : > { %6405 = vmatmul.bf16.gmra.mxu0 %v8510_v19  ;;  %6494 = vmatmul.bf16.gmra.mxu1 %v8514_v37  ;;  %v1877_v0 = vunpack.c.l.b16 %v1869_v15  ;;  %v1881_v55 = vunpack.c.h.b16 %v1869_v15  ;;  %v9159_v15 = vld [vmem:[#allocation2 + $0x30c] sm:$0xf] }
 0x49e   : > { %v6456_v58 = vadd.f32 %v6455_v60, %v6367_v47  ;;  %v8534_v47 = vor.u32 %v9157_v23, %v8533_v7 }
 0x49f   : > { %v6190_v29 = vpop.f32.mrf.mxu2  ;;  %v6279_v51 = vpop.f32.mrf.mxu3  ;;  %v1885_v36 = vpack.c.b16 %v1878_v46, %v1877_v0  ;;  %v1888_v60 = vpack.c.b16 %v1882_v9, %v1881_v55 }
 0x4a0   : > { %v6555_v31 = vadd.f32 %v6456_v58, %v11003_v52  ;;  %v6191_v2 = vadd.f32 %v6190_v29, %v11026_v5  ;;  %v8535_v5 = vld [vmem:[#allocation2 + $0x2f8] sm:$0xf0]  ;;  %v8549_v58 = vld [vmem:[#allocation2 + $0x308] sm:$0xf]  ;;  %v8551_v29 = vld [vmem:[#allocation2 + $0x320] sm:$0xf0] }
 0x4a1   : > { %1898 = vst [vmem:[#allocation2 + $0x340] sm:$0xff] %v1885_v36  ;;  %v8538_v53 = vor.u32 %v9154_v45, %v8535_v5  ;;  %v8554_v55 = vor.u32 %v9159_v15, %v8551_v29  ;;  %v9160_v36 = vld [vmem:[#allocation2 + $0x314] sm:$0xf] }
 0x4a2   : > { %v6651_v8 = vpack.c.bf16 %v6555_v31, %v6555_v31  ;;  %v6368_v19 = vpop.f32.mrf.mxu0  ;;  %v6457_v37 = vpop.f32.mrf.mxu1  ;;  %v6280_v22 = vadd.f32 %v6279_v51, %v6191_v2  ;;  %1901 = vst [vmem:[#allocation2 + $0x358] sm:$0xff] %v1888_v60  ;;  %v8559_v60 = vld [vmem:[#allocation2 + $0x328] sm:$0xf0] }
 0x4a4   : > { %6684 = vst.msk [vmem:[%s11178_s28 + $0x20] sm:$0xf] %vm6675_vm6, %v6651_v8  ;;  %v6369_v4 = vadd.f32 %v6368_v19, %v6280_v22  ;;  %6232 = vmatmul.bf16.gmra.mxu2 %v8526_v41  ;;  %6321 = vmatmul.bf16.gmra.mxu3 %v8530_v34  ;;  %v9162_v41 = vld [vmem:[#allocation2 + $0x31c] sm:$0xf0]  ;;  %v8557_v19 = vld [vmem:[#allocation2 + $0x310] sm:$0xf] }
 0x4a5   : > { %v8550_v0 = vor.u32 %v9162_v41, %v8549_v58  ;;  %v9163_v22 = vld [vmem:[#allocation2 + $0x324] sm:$0xf0] }
 0x4a6   : > { %v6458_v52 = vadd.f32 %v6457_v37, %v6369_v4  ;;  %v8558_v23 = vor.u32 %v9163_v22, %v8557_v19 }
 0x4a7   : > { %v6193_v48 = vpop.f32.mrf.mxu2  ;;  %v6282_v6 = vpop.f32.mrf.mxu3 }
 0x4a8   : > { %v6556_v40 = vadd.f32 %v6458_v52, %v11034_v56  ;;  %v6194_v16 = vadd.f32 %v6193_v48, %v11040_v49  ;;  %v8562_v52 = vor.u32 %v9160_v36, %v8559_v60 }
 0x4aa   : > { %v6652_v35 = vpack.c.bf16 %v6556_v40, %v6556_v40  ;;  %v6371_v62 = vpop.f32.mrf.mxu0  ;;  %v6460_v50 = vpop.f32.mrf.mxu1  ;;  %v6283_v17 = vadd.f32 %v6282_v6, %v6194_v16  ;;  %v8573_v16 = vld [vmem:[#allocation2 + $0x338] sm:$0xf] }
 0x4ac   : > { %6685 = vst.msk [vmem:[%s11178_s28 + $0x24] sm:$0xf] %vm6675_vm6, %v6652_v35  ;;  %v6372_v59 = vadd.f32 %v6371_v62, %v6283_v17  ;;  %v8575_v35 = vld [vmem:[#allocation2 + $0x350] sm:$0xf0] }
 0x4ad   : > { %6410 = vmatmul.bf16.gmra.mxu0 %v8534_v47  ;;  %6499 = vmatmul.bf16.gmra.mxu1 %v8538_v53  ;;  %v9168_v47 = vld [vmem:[#allocation2 + $0x34c] sm:$0xf0]  ;;  %v9165_v53 = vld [vmem:[#allocation2 + $0x33c] sm:$0xf] }
 0x4ae   : > { %v6461_v51 = vadd.f32 %v6460_v50, %v6372_v59  ;;  %v8574_v59 = vor.u32 %v9168_v47, %v8573_v16  ;;  %v8578_v58 = vor.u32 %v9165_v53, %v8575_v35 }
 0x4af   : > { %v6195_v56 = vpop.f32.mrf.mxu2  ;;  %v6284_v34 = vpop.f32.mrf.mxu3 }
 0x4b0   : > { %v6557_v49 = vadd.f32 %v6461_v51, %v11043_v10  ;;  %v6196_v27 = vadd.f32 %v6195_v56, %v11046_v13 }
 0x4b2   : > { %v6653_v31 = vpack.c.bf16 %v6557_v49, %v6557_v49  ;;  %v6373_v2 = vpop.f32.mrf.mxu0  ;;  %v6462_v46 = vpop.f32.mrf.mxu1  ;;  %v6285_v9 = vadd.f32 %v6284_v34, %v6196_v27  ;;  %v8581_v34 = vld [vmem:[#allocation2 + $0x340] sm:$0xf]  ;;  %v9169_v27 = vld [vmem:[#allocation2 + $0x354] sm:$0xf0] }
 0x4b4   : > { %6686 = vst.msk [vmem:[%s11178_s28 + $0x28] sm:$0xf] %vm6675_vm6, %v6653_v31  ;;  %v6374_v8 = vadd.f32 %v6373_v2, %v6285_v9  ;;  %6237 = vmatmul.bf16.gmra.mxu2 %v8550_v0  ;;  %6326 = vmatmul.bf16.gmra.mxu3 %v8554_v55  ;;  %v9166_v0 = vld [vmem:[#allocation2 + $0x344] sm:$0xf]  ;;  %v8583_v55 = vld [vmem:[#allocation2 + $0x358] sm:$0xf0] }
 0x4b5   : > { %v8586_v9 = vor.u32 %v9166_v0, %v8583_v55 }
 0x4b6   : > { %v6463_v37 = vadd.f32 %v6462_v46, %v6374_v8  ;;  %v8582_v46 = vor.u32 %v9169_v27, %v8581_v34 }
 0x4b7   : > { %v6198_v10 = vpop.f32.mrf.mxu2  ;;  %v6287_v4 = vpop.f32.mrf.mxu3 }
 0x4b8   : > { %v6558_v13 = vadd.f32 %v6463_v37, %v11049_v21  ;;  %v6199_v7 = vadd.f32 %v6198_v10, %v11052_v61 }
 0x4ba   : > { %v6654_v45 = vpack.c.bf16 %v6558_v13, %v6558_v13  ;;  %v6376_v5 = vpop.f32.mrf.mxu0  ;;  %v6465_v48 = vpop.f32.mrf.mxu1  ;;  %v6288_v6 = vadd.f32 %v6287_v4, %v6199_v7 }
 0x4bc   : > { %6687 = vst.msk [vmem:[%s11178_s28 + $0x2c] sm:$0xf] %vm6675_vm6, %v6654_v45  ;;  %v6377_v40 = vadd.f32 %v6376_v5, %v6288_v6 }
 0x4bd   : > { %6415 = vmatmul.bf16.gmra.mxu0 %v8558_v23  ;;  %6504 = vmatmul.bf16.gmra.mxu1 %v8562_v52 }
 0x4be   : > { %v6466_v62 = vadd.f32 %v6465_v48, %v6377_v40 }
 0x4bf   : > { %v6200_v21 = vpop.f32.mrf.mxu2  ;;  %v6289_v50 = vpop.f32.mrf.mxu3 }
 0x4c0   : > { %v6559_v61 = vadd.f32 %v6466_v62, %v11055_v33  ;;  %v6201_v17 = vadd.f32 %v6200_v21, %v11058_v32 }
 0x4c2   : > { %v6655_v41 = vpack.c.bf16 %v6559_v61, %v6559_v61  ;;  %v6378_v15 = vpop.f32.mrf.mxu0  ;;  %v6467_v29 = vpop.f32.mrf.mxu1  ;;  %v6290_v51 = vadd.f32 %v6289_v50, %v6201_v17 }
 0x4c4   : > { %6688 = vst.msk [vmem:[%s11178_s28 + $0x30] sm:$0xf] %vm6675_vm6, %v6655_v41  ;;  %v6379_v56 = vadd.f32 %v6378_v15, %v6290_v51  ;;  %6242 = vmatmul.bf16.gmra.mxu2 %v8574_v59  ;;  %6331 = vmatmul.bf16.gmra.mxu3 %v8578_v58 }
 0x4c6   : > { %v6468_v49 = vadd.f32 %v6467_v29, %v6379_v56 }
 0x4c7   : > { %v6203_v33 = vpop.f32.mrf.mxu2  ;;  %v6292_v31 = vpop.f32.mrf.mxu3 }
 0x4c8   : > { %v6560_v32 = vadd.f32 %v6468_v49, %v11061_v44  ;;  %v6204_v2 = vadd.f32 %v6203_v33, %v11064_v1 }
 0x4ca   : > { %v6656_v8 = vpack.c.bf16 %v6560_v32, %v6560_v32  ;;  %v6381_v19 = vpop.f32.mrf.mxu0  ;;  %v6470_v37 = vpop.f32.mrf.mxu1  ;;  %v6293_v22 = vadd.f32 %v6292_v31, %v6204_v2 }
 0x4cc   : > { %6689 = vst.msk [vmem:[%s11178_s28 + $0x34] sm:$0xf] %vm6675_vm6, %v6656_v8  ;;  %v6382_v36 = vadd.f32 %v6381_v19, %v6293_v22 }
 0x4cd   : > { %6420 = vmatmul.bf16.gmra.mxu0 %v8582_v46  ;;  %6509 = vmatmul.bf16.gmra.mxu1 %v8586_v9 }
 0x4ce   : > { %v6471_v60 = vadd.f32 %v6470_v37, %v6382_v36 }
 0x4cf   : > { %v6205_v10 = vpop.f32.mrf.mxu2  ;;  %v6294_v4 = vpop.f32.mrf.mxu3 }
 0x4d0   : > { %v6561_v13 = vadd.f32 %v6471_v60, %v11067_v26  ;;  %v6206_v44 = vadd.f32 %v6205_v10, %v11070_v30 }
 0x4d2   : > { %v6657_v1 = vpack.c.bf16 %v6561_v13, %v6561_v13  ;;  %v6383_v7 = vpop.f32.mrf.mxu0  ;;  %v6472_v23 = vpop.f32.mrf.mxu1  ;;  %v6295_v52 = vadd.f32 %v6294_v4, %v6206_v44 }
 0x4d4   : > { %6690 = vst.msk [vmem:[%s11178_s28 + $0x38] sm:$0xf] %vm6675_vm6, %v6657_v1  ;;  %v6384_v45 = vadd.f32 %v6383_v7, %v6295_v52 }
 0x4d6   : > { %v6473_v5 = vadd.f32 %v6472_v23, %v6384_v45 }
 0x4d7   : > { %v6208_v48 = vpop.f32.mrf.mxu2  ;;  %v6297_v6 = vpop.f32.mrf.mxu3 }
 0x4d8   : > { %v6562_v40 = vadd.f32 %v6473_v5, %v11073_v42  ;;  %v6209_v16 = vadd.f32 %v6208_v48, %v11076_v3 }
 0x4da   : > { %v6658_v47 = vpack.c.bf16 %v6562_v40, %v6562_v40  ;;  %v6386_v26 = vpop.f32.mrf.mxu0  ;;  %v6475_v53 = vpop.f32.mrf.mxu1  ;;  %v6298_v30 = vadd.f32 %v6297_v6, %v6209_v16 }
 0x4dc   : > { %6691 = vst.msk [vmem:[%s11178_s28 + $0x3c] sm:$0xf] %vm6675_vm6, %v6658_v47  ;;  %v6387_v35 = vadd.f32 %v6386_v26, %v6298_v30  ;;  %v11577_v47 = vld [vmem:[#allocation17_spill] sm:$0xff] }
 0x4de   : > { %v6476_v62 = vadd.f32 %v6475_v53, %v6387_v35  ;;  %v11578_v53 = vld [vmem:[#allocation16_spill] sm:$0xff] }
 0x4df   : > { %v6210_v21 = vpop.f32.mrf.mxu2  ;;  %v6299_v50 = vpop.f32.mrf.mxu3 }
 0x4e0   : > { %v6563_v61 = vadd.f32 %v6476_v62, %v11079_v14  ;;  %v6211_v17 = vadd.f32 %v6210_v21, %v11082_v38 }
 0x4e2   : > { %v6659_v59 = vpack.c.bf16 %v6563_v61, %v6563_v61  ;;  %v6388_v42 = vpop.f32.mrf.mxu0  ;;  %v6477_v58 = vpop.f32.mrf.mxu1  ;;  %v6300_v3 = vadd.f32 %v6299_v50, %v6211_v17 }
 0x4e4   : > { %6692 = vst.msk [vmem:[%s11178_s28 + $0x40] sm:$0xf] %vm6675_vm6, %v6659_v59  ;;  %v6389_v41 = vadd.f32 %v6388_v42, %v6300_v3  ;;  %v11579_v59 = vld [vmem:[#allocation18_spill] sm:$0xff] }
 0x4e6   : > { %v6478_v15 = vadd.f32 %v6477_v58, %v6389_v41  ;;  %v11580_v58 = vld [vmem:[#allocation4_spill] sm:$0xff] }
 0x4e7   : > { %v6213_v29 = vpop.f32.mrf.mxu2  ;;  %v6302_v51 = vpop.f32.mrf.mxu3 }
 0x4e8   : > { %v6564_v56 = vadd.f32 %v6478_v15, %v11085_v54  ;;  %v6214_v34 = vadd.f32 %v6213_v29, %v11088_v20 }
 0x4ea   : > { %v6660_v49 = vpack.c.bf16 %v6564_v56, %v6564_v56  ;;  %v6391_v14 = vpop.f32.mrf.mxu0  ;;  %v6480_v27 = vpop.f32.mrf.mxu1  ;;  %v6303_v38 = vadd.f32 %v6302_v51, %v6214_v34 }
 0x4ec   : > { %6693 = vst.msk [vmem:[%s11178_s28 + $0x44] sm:$0xf] %vm6675_vm6, %v6660_v49  ;;  %v6392_v0 = vadd.f32 %v6391_v14, %v6303_v38 }
 0x4ee   : > { %v6481_v55 = vadd.f32 %v6480_v27, %v6392_v0  ;;  %v11581_v27 = vld [vmem:[#allocation5_spill] sm:$0xff]  ;;  %v11582_v0 = vld [vmem:[#allocation20_spill] sm:$0xff] }
 0x4ef   : > { %v6215_v33 = vpop.f32.mrf.mxu2  ;;  %v6304_v31 = vpop.f32.mrf.mxu3 }
 0x4f0   : > { %v6565_v32 = vadd.f32 %v6481_v55, %v11091_v12  ;;  %v6216_v2 = vadd.f32 %v6215_v33, %v11094_v28 }
 0x4f2   : > { %v6661_v46 = vpack.c.bf16 %v6565_v32, %v6565_v32  ;;  %v6393_v54 = vpop.f32.mrf.mxu0  ;;  %v6482_v9 = vpop.f32.mrf.mxu1  ;;  %v6305_v20 = vadd.f32 %v6304_v31, %v6216_v2 }
 0x4f4   : > { %6694 = vst.msk [vmem:[%s11178_s28 + $0x48] sm:$0xf] %vm6675_vm6, %v6661_v46  ;;  %v6394_v8 = vadd.f32 %v6393_v54, %v6305_v20 }
 0x4f6   : > { %v6483_v19 = vadd.f32 %v6482_v9, %v6394_v8  ;;  %v11583_v8 = vld [vmem:[#allocation19_spill] sm:$0xff] }
 0x4f7   : > { %v6218_v37 = vpop.f32.mrf.mxu2  ;;  %v6307_v22 = vpop.f32.mrf.mxu3 }
 0x4f8   : > { %v6566_v36 = vadd.f32 %v6483_v19, %v11097_v25  ;;  %v6219_v60 = vadd.f32 %v6218_v37, %v11100_v63  ;;  %v11584_v37 = vld [vmem:[#allocation21_spill] sm:$0xff] }
 0x4fa   : > { %v6662_v10 = vpack.c.bf16 %v6566_v36, %v6566_v36  ;;  %v6396_v12 = vpop.f32.mrf.mxu0  ;;  %v6485_v4 = vpop.f32.mrf.mxu1  ;;  %v6308_v28 = vadd.f32 %v6307_v22, %v6219_v60 }
 0x4fc   : > { %6695 = vst.msk [vmem:[%s11178_s28 + $0x4c] sm:$0xf] %vm6675_vm6, %v6662_v10  ;;  %v6397_v13 = vadd.f32 %v6396_v12, %v6308_v28 }
 0x4fe   : > { %v6486_v44 = vadd.f32 %v6485_v4, %v6397_v13 }
 0x4ff   : > { %v6220_v1 = vpop.f32.mrf.mxu2  ;;  %v6309_v7 = vpop.f32.mrf.mxu3 }
 0x500   : > { %v6567_v23 = vadd.f32 %v6486_v44, %v11103_v43  ;;  %v6221_v52 = vadd.f32 %v6220_v1, %v11106_v11  ;;  %v11585_v1 = vld [vmem:[#allocation6_spill] sm:$0xff] }
 0x502   : > { %v6663_v45 = vpack.c.bf16 %v6567_v23, %v6567_v23  ;;  %v6398_v25 = vpop.f32.mrf.mxu0  ;;  %v6487_v5 = vpop.f32.mrf.mxu1  ;;  %v6310_v63 = vadd.f32 %v6309_v7, %v6221_v52  ;;  %v11586_v23 = vld [vmem:[#allocation22_spill] sm:$0xff] }
 0x504   : > { %6696 = vst.msk [vmem:[%s11178_s28 + $0x50] sm:$0xf] %vm6675_vm6, %v6663_v45  ;;  %v6399_v48 = vadd.f32 %v6398_v25, %v6310_v63 }
 0x506   : > { %v6488_v6 = vadd.f32 %v6487_v5, %v6399_v48 }
 0x507   : > { %v6223_v40 = vpop.f32.mrf.mxu2  ;;  %v6312_v16 = vpop.f32.mrf.mxu3 }
 0x508   : > { %v6568_v26 = vadd.f32 %v6488_v6, %v11577_v47  ;;  %v6224_v30 = vadd.f32 %v6223_v40, %v11578_v53  ;;  %v11587_v47 = vld [vmem:[#allocation7_spill] sm:$0xff] }
 0x509   : > { %v11588_v53 = vld [vmem:[#allocation23_spill] sm:$0xff] }
 0x50a   : > { %v6664_v35 = vpack.c.bf16 %v6568_v26, %v6568_v26  ;;  %v6401_v43 = vpop.f32.mrf.mxu0  ;;  %v6490_v62 = vpop.f32.mrf.mxu1  ;;  %v6313_v11 = vadd.f32 %v6312_v16, %v6224_v30 }
 0x50c   : > { %6697 = vst.msk [vmem:[%s11178_s28 + $0x54] sm:$0xf] %vm6675_vm6, %v6664_v35  ;;  %v6402_v21 = vadd.f32 %v6401_v43, %v6313_v11 }
 0x50e   : > { %v6491_v50 = vadd.f32 %v6490_v62, %v6402_v21 }
 0x50f   : > { %v6225_v61 = vpop.f32.mrf.mxu2  ;;  %v6314_v17 = vpop.f32.mrf.mxu3 }
 0x510   : > { %v6569_v42 = vadd.f32 %v6491_v50, %v11579_v59  ;;  %v6226_v3 = vadd.f32 %v6225_v61, %v11580_v58  ;;  %v11589_v59 = vld [vmem:[#allocation8_spill] sm:$0xff] }
 0x512   : > { %v6665_v41 = vpack.c.bf16 %v6569_v42, %v6569_v42  ;;  %v6403_v15 = vpop.f32.mrf.mxu0  ;;  %v6492_v29 = vpop.f32.mrf.mxu1  ;;  %v6315_v51 = vadd.f32 %v6314_v17, %v6226_v3 }
 0x514   : > { %6698 = vst.msk [vmem:[%s11178_s28 + $0x58] sm:$0xf] %vm6675_vm6, %v6665_v41  ;;  %v6404_v56 = vadd.f32 %v6403_v15, %v6315_v51 }
 0x516   : > { %v6493_v34 = vadd.f32 %v6492_v29, %v6404_v56 }
 0x517   : > { %v6228_v49 = vpop.f32.mrf.mxu2  ;;  %v6317_v14 = vpop.f32.mrf.mxu3 }
 0x518   : > { %v6570_v38 = vadd.f32 %v6493_v34, %v11581_v27  ;;  %v6229_v55 = vadd.f32 %v6228_v49, %v11582_v0 }
 0x51a   : > { %v6666_v33 = vpack.c.bf16 %v6570_v38, %v6570_v38  ;;  %v6406_v31 = vpop.f32.mrf.mxu0  ;;  %v6495_v32 = vpop.f32.mrf.mxu1  ;;  %v6318_v2 = vadd.f32 %v6317_v14, %v6229_v55  ;;  %v11590_v14 = vld [vmem:[#allocation24_spill] sm:$0xff] }
 0x51c   : > { %6699 = vst.msk [vmem:[%s11178_s28 + $0x5c] sm:$0xf] %vm6675_vm6, %v6666_v33  ;;  %v6407_v46 = vadd.f32 %v6406_v31, %v6318_v2 }
 0x51e   : > { %v6496_v54 = vadd.f32 %v6495_v32, %v6407_v46 }
 0x51f   : > { %v6230_v9 = vpop.f32.mrf.mxu2  ;;  %v6319_v20 = vpop.f32.mrf.mxu3 }
 0x520   : > { %v6571_v19 = vadd.f32 %v6496_v54, %v11583_v8  ;;  %v6231_v22 = vadd.f32 %v6230_v9, %v11584_v37  ;;  %v11591_v54 = vld [vmem:[#allocation9_spill] sm:$0xff] }
 0x522   : > { %v6667_v36 = vpack.c.bf16 %v6571_v19, %v6571_v19  ;;  %v6408_v60 = vpop.f32.mrf.mxu0  ;;  %v6497_v10 = vpop.f32.mrf.mxu1  ;;  %v6320_v12 = vadd.f32 %v6319_v20, %v6231_v22 }
 0x524   : > { %6700 = vst.msk [vmem:[%s11178_s28 + $0x60] sm:$0xf] %vm6675_vm6, %v6667_v36  ;;  %v6409_v4 = vadd.f32 %v6408_v60, %v6320_v12 }
 0x526   : > { %v6498_v28 = vadd.f32 %v6497_v10, %v6409_v4  ;;  %v11592_v10 = vld [vmem:[#allocation25_spill] sm:$0xff] }
 0x527   : > { %v6233_v13 = vpop.f32.mrf.mxu2  ;;  %v6322_v44 = vpop.f32.mrf.mxu3 }
 0x528   : > { %v6572_v7 = vadd.f32 %v6498_v28, %v11585_v1  ;;  %v6234_v52 = vadd.f32 %v6233_v13, %v11586_v23 }
 0x52a   : > { %v6668_v45 = vpack.c.bf16 %v6572_v7, %v6572_v7  ;;  %v6411_v25 = vpop.f32.mrf.mxu0  ;;  %v6500_v5 = vpop.f32.mrf.mxu1  ;;  %v6323_v63 = vadd.f32 %v6322_v44, %v6234_v52  ;;  %v11593_v52 = vld [vmem:[#allocation10_spill] sm:$0xff] }
 0x52c   : > { %6701 = vst.msk [vmem:[%s11178_s28 + $0x64] sm:$0xf] %vm6675_vm6, %v6668_v45  ;;  %v6412_v48 = vadd.f32 %v6411_v25, %v6323_v63 }
 0x52e   : > { %v6501_v6 = vadd.f32 %v6500_v5, %v6412_v48 }
 0x52f   : > { %v6235_v40 = vpop.f32.mrf.mxu2  ;;  %v6324_v16 = vpop.f32.mrf.mxu3 }
 0x530   : > { %v6573_v26 = vadd.f32 %v6501_v6, %v11587_v47  ;;  %v6236_v30 = vadd.f32 %v6235_v40, %v11588_v53 }
 0x532   : > { %v6669_v35 = vpack.c.bf16 %v6573_v26, %v6573_v26  ;;  %v6413_v43 = vpop.f32.mrf.mxu0  ;;  %v6502_v62 = vpop.f32.mrf.mxu1  ;;  %v6325_v11 = vadd.f32 %v6324_v16, %v6236_v30 }
 0x534   : > { %6702 = vst.msk [vmem:[%s11178_s28 + $0x68] sm:$0xf] %vm6675_vm6, %v6669_v35  ;;  %v6414_v21 = vadd.f32 %v6413_v43, %v6325_v11 }
 0x536   : > { %v6503_v50 = vadd.f32 %v6502_v62, %v6414_v21 }
 0x537   : > { %v6238_v61 = vpop.f32.mrf.mxu2  ;;  %v6327_v17 = vpop.f32.mrf.mxu3 }
 0x538   : > { %v6574_v42 = vadd.f32 %v6503_v50, %v11589_v59  ;;  %v6239_v58 = vadd.f32 %v6238_v61, %v11148_v18 }
 0x53a   : > { %v6670_v3 = vpack.c.bf16 %v6574_v42, %v6574_v42  ;;  %v6416_v41 = vpop.f32.mrf.mxu0  ;;  %v6505_v15 = vpop.f32.mrf.mxu1  ;;  %v6328_v29 = vadd.f32 %v6327_v17, %v6239_v58 }
 0x53c   : > { %6703 = vst.msk [vmem:[%s11178_s28 + $0x6c] sm:$0xf] %vm6675_vm6, %v6670_v3  ;;  %v6417_v51 = vadd.f32 %v6416_v41, %v6328_v29 }
 0x53e   : > { %v6506_v56 = vadd.f32 %v6505_v15, %v6417_v51 }
 0x53f   : > { %v6240_v34 = vpop.f32.mrf.mxu2  ;;  %v6329_v49 = vpop.f32.mrf.mxu3 }
 0x540   : > { %v6575_v27 = vadd.f32 %v6506_v56, %v11590_v14  ;;  %v6241_v38 = vadd.f32 %v6240_v34, %v11154_v39 }
 0x542   : > { %v6671_v0 = vpack.c.bf16 %v6575_v27, %v6575_v27  ;;  %v6418_v55 = vpop.f32.mrf.mxu0  ;;  %v6507_v33 = vpop.f32.mrf.mxu1  ;;  %v6330_v18 = vadd.f32 %v6329_v49, %v6241_v38 }
 0x544   : > { %6704 = vst.msk [vmem:[%s11178_s28 + $0x70] sm:$0xf] %vm6675_vm6, %v6671_v0  ;;  %v6419_v31 = vadd.f32 %v6418_v55, %v6330_v18 }
 0x546   : > { %v6508_v32 = vadd.f32 %v6507_v33, %v6419_v31 }
 0x547   : > { %v6243_v2 = vpop.f32.mrf.mxu2  ;;  %v6332_v46 = vpop.f32.mrf.mxu3 }
 0x548   : > { %v6576_v9 = vadd.f32 %v6508_v32, %v11591_v54  ;;  %v6244_v20 = vadd.f32 %v6243_v2, %v11160_v24 }
 0x54a   : > { %v6672_v8 = vpack.c.bf16 %v6576_v9, %v6576_v9  ;;  %v6421_v19 = vpop.f32.mrf.mxu0  ;;  %v6333_v37 = vadd.f32 %v6332_v46, %v6244_v20  ;;  %v6510_v39 = vpop.f32.mrf.mxu1 }
 0x54c   : > { %6705 = vst.msk [vmem:[%s11178_s28 + $0x74] sm:$0xf] %vm6675_vm6, %v6672_v8  ;;  %v6422_v22 = vadd.f32 %v6421_v19, %v6333_v37 }
 0x54e   : > { %v6511_v36 = vadd.f32 %v6510_v39, %v6422_v22 }
 0x54f   : > { %v6245_v60 = vpop.f32.mrf.mxu2  ;;  %v6334_v28 = vpop.f32.mrf.mxu3 }
 0x550   : > { %v6577_v12 = vadd.f32 %v6511_v36, %v11592_v10  ;;  %v6246_v4 = vadd.f32 %v6245_v60, %v11166_v57 }
 0x552   : > { %v6673_v13 = vpack.c.bf16 %v6577_v12, %v6577_v12  ;;  %v6335_v44 = vadd.f32 %v6334_v28, %v6246_v4  ;;  %v6423_v1 = vpop.f32.mrf.mxu0  ;;  %v6512_v7 = vpop.f32.mrf.mxu1 }
 0x554   : > { %6706 = vst.msk [vmem:[%s11178_s28 + $0x78] sm:$0xf] %vm6675_vm6, %v6673_v13  ;;  %v6424_v24 = vadd.f32 %v6423_v1, %v6335_v44 }
 0x556   : > { %v6513_v23 = vadd.f32 %v6512_v7, %v6424_v24 }
 0x558   : > { %v6578_v45 = vadd.f32 %v6513_v23, %v11593_v52 }
 0x55a   : > { %v6674_v25 = vpack.c.bf16 %v6578_v45, %v6578_v45 }
 0x55c   : > { %6707 = vst.msk [vmem:[%s11178_s28 + $0x7c] sm:$0xf] %vm6675_vm6, %v6674_v25 }
 0x55d PF: > { %s15_s20 = sadd.s32 1, %s9384_s20   ;;  %s11594_s18 = smov %s9380_s19 }
 0x55e   : > { %p12_p5 = scmp.ge.s32.totalorder %s15_s20, 4   ;;  %s11595_s19 = smov %s11597_s21 }
 0x560   :  { %14 = sbr.rel (!%p12_p5) target bundleno = 2 (0x2), region = 81 }

</bundles_post_ra>
